<compile_context>
chip_gen: v7x
topology: tpu7x:2x2x1
jax: 0.10.0
libtpu: 0.0.40
codegen_flags: <defaults>
</compile_context>

<pallas_src>
import jax
import jax.numpy as jnp
from jax.experimental import pallas as pl
from jax.experimental.pallas import tpu as pltpu


# ---------------------------------------------------------------------------
# Fused Pallas kernel: 5x (conv3 replicate-pad + folded-BN bias + ReLU) + Linear
# ---------------------------------------------------------------------------
def _n_vcnn_fused_kernel(z_ref, sp_ref, sn_ref,
                         w1_ref, b1_ref, w2_ref, b2_ref, w3_ref, b3_ref,
                         w4_ref, b4_ref, w5_ref, b5_ref,
                         wl_ref, lb_ref, o_ref):
    """
    z_ref : (B*C0, L)            input, rows are batch-major (b*C0 + c), L on lanes
    sp_ref: (L, L)               shift matrix: col l has 1 at row max(l-1, 0)
    sn_ref: (L, L)               shift matrix: col l has 1 at row min(l+1, L-1)
    wX_ref: (3, B*Cout, B*Cin)   per-tap, BN-folded, batch-block-diagonal conv weight
    bX_ref: (B*Cout, 1)          folded (conv + BN) bias, tiled over batch
    wl_ref: (C, L, 512)          Linear weight rearranged to flatten order c*L + l
    lb_ref: (1, 512)             Linear bias
    o_ref : (B, 512)             output
    """
    f32 = jnp.float32
    L = z_ref.shape[1]
    C = wl_ref.shape[0]            # final channel count == num_channel
    B = z_ref.shape[0] // C
    O = o_ref.shape[1]

    sp = sp_ref[...]               # (L, L)
    sn = sn_ref[...]               # (L, L)

    z = z_ref[...]                 # (B*C0, L)
    for w_ref, b_ref in ((w1_ref, b1_ref), (w2_ref, b2_ref), (w3_ref, b3_ref),
                         (w4_ref, b4_ref), (w5_ref, b5_ref)):
        zp = jnp.dot(z, sp, preferred_element_type=f32)   # x[l-1] (replicate at l=0)
        zn = jnp.dot(z, sn, preferred_element_type=f32)   # x[l+1] (replicate at l=L-1)
        y = jnp.dot(w_ref[0], zp, preferred_element_type=f32)
        y = y + jnp.dot(w_ref[1], z, preferred_element_type=f32)
        y = y + jnp.dot(w_ref[2], zn, preferred_element_type=f32)
        z = jnp.maximum(y + b_ref[...], 0.0)              # folded bias/BN + ReLU

    # Linear: out[b, o] = sum_{c,l} z[b*C + c, l] * wl[c, l, o] + lb[o]
    lb = lb_ref[...]                                      # (1, O)
    for b in range(B):
        acc = jnp.zeros((1, O), f32)
        for c in range(C):
            acc = acc + jnp.dot(z[b * C + c:b * C + c + 1, :], wl_ref[c],
                                preferred_element_type=f32)
        o_ref[b:b + 1, :] = (acc + lb).astype(o_ref.dtype)


# ---------------------------------------------------------------------------
# One-time parameter preparation (hoisted out of the forward path)
# ---------------------------------------------------------------------------
def _shift_matrices(L):
    i = jnp.arange(L)
    prev_src = jnp.clip(i - 1, 0, L - 1)
    next_src = jnp.clip(i + 1, 0, L - 1)
    rows = jnp.arange(L)[:, None]
    s_prev = (rows == prev_src[None, :]).astype(jnp.float32)   # (L, L)
    s_next = (rows == next_src[None, :]).astype(jnp.float32)   # (L, L)
    return s_prev, s_next


def prepare_params(params, B, L, eps=1e-5):
    """Fold eval-mode BN, split conv taps, block-diagonalize over batch,
    permute the Linear weight to the kernel's flatten order, build shift matrices."""
    eye_b = jnp.eye(B, dtype=jnp.float32)
    conv_prepped = []
    for i, (w, b) in enumerate(params["conv"]):          # w: (Cout, Cin, 3), b: (Cout,)
        if i < len(params["bn"]):                        # BN after convs 1..4 only
            gamma, beta, mean, var = params["bn"][i]
            s = gamma / jnp.sqrt(var + eps)
            w = w * s[:, None, None]
            b = s * (b - mean) + beta
        taps = [jnp.kron(eye_b, w[:, :, k]) for k in range(3)]  # (B*Cout, B*Cin) each
        w_bd = jnp.stack(taps, axis=0)                          # (3, B*Cout, B*Cin)
        b_t = jnp.tile(b, B).reshape(B * w.shape[0], 1)         # (B*Cout, 1)
        conv_prepped.append((w_bd, b_t))

    lw, lb = params["linear"]                            # lw: (512, C*L), lb: (512,)
    O, F = lw.shape
    C = F // L
    # wl[c, l, o] = lw[o, c*L + l]  (PyTorch channel-major flatten order)
    wl = jnp.transpose(lw.reshape(O, C, L), (1, 2, 0))   # (C, L, O)
    s_prev, s_next = _shift_matrices(L)
    return {"conv": conv_prepped, "wl": wl, "lb": lb.reshape(1, O),
            "s_prev": s_prev, "s_next": s_next}


# ---------------------------------------------------------------------------
# Forward (matches N_VCNN.forward) — one reshape + one pallas_call
# ---------------------------------------------------------------------------
def n_vcnn_forward(x_ncl, prepped):
    B, C, L = x_ncl.shape
    z0 = x_ncl.reshape(B * C, L)            # (B*C, L): rows are b-major, free reshape
    O = prepped["lb"].shape[1]

    vmem = pl.BlockSpec(memory_space=pltpu.MemorySpace.VMEM)
    args = [z0, prepped["s_prev"], prepped["s_next"]]
    for w_bd, b_t in prepped["conv"]:
        args += [w_bd, b_t]
    args += [prepped["wl"], prepped["lb"]]

    return pl.pallas_call(
        _n_vcnn_fused_kernel,
        out_shape=jax.ShapeDtypeStruct((B, O), jnp.float32),
        in_specs=[vmem] * len(args),
        out_specs=vmem,
    )(*args)


# ---------------------------------------------------------------------------
# Deterministic synthetic parameters (PyTorch layouts)
# ---------------------------------------------------------------------------
def init_params(key, C):
    dims = [(C, 16 * C), (16 * C, 8 * C), (8 * C, 4 * C), (4 * C, 2 * C), (2 * C, C)]
    keys = iter(jax.random.split(key, 32))
    convs = []
    for cin, cout in dims:
        w = jax.random.normal(next(keys), (cout, cin, 3), jnp.float32) / jnp.sqrt(3.0 * cin)
        b = 0.05 * jax.random.normal(next(keys), (cout,), jnp.float32)
        convs.append((w, b))
    bns = []
    for _, cout in dims[:4]:
        gamma = 1.0 + 0.1 * jax.random.normal(next(keys), (cout,), jnp.float32)
        beta = 0.1 * jax.random.normal(next(keys), (cout,), jnp.float32)
        mean = 0.1 * jax.random.normal(next(keys), (cout,), jnp.float32)
        var = 1.0 + 0.1 * jnp.abs(jax.random.normal(next(keys), (cout,), jnp.float32))
        bns.append((gamma, beta, mean, var))
    lw = jax.random.normal(next(keys), (512, C * 160), jnp.float32) / jnp.sqrt(float(C * 160))
    lb = 0.05 * jax.random.normal(next(keys), (512,), jnp.float32)
    return {"conv": convs, "bn": bns, "linear": (lw, lb)}


if __name__ == "__main__":
    C, B, L = 4, 2, 160   # L must be 160 so the flatten yields num_channel*160 features
    key = jax.random.PRNGKey(0)
    pkey, xkey = jax.random.split(key)
    params = init_params(pkey, C)
    prepped = prepare_params(params, B, L)            # hoisted, one-time prep
    x = jax.random.normal(xkey, (B, C, L), jnp.float32)   # PyTorch NCL layout
    fwd = jax.jit(n_vcnn_forward)
    out = jax.block_until_ready(fwd(x, prepped))
    assert out.shape == (B, 512) and out.dtype == jnp.float32
    print("KERNEL_OK")
</pallas_src>

<mosaic_0001>
module attributes {stable_mosaic.version = 11 : i64} {
  func.func @_n_vcnn_fused_kernel(%arg0: memref<8x160xf32, #tpu.memory_space<vmem>>, %arg1: memref<160x160xf32, #tpu.memory_space<vmem>>, %arg2: memref<160x160xf32, #tpu.memory_space<vmem>>, %arg3: memref<3x128x8xf32, #tpu.memory_space<vmem>>, %arg4: memref<128x1xf32, #tpu.memory_space<vmem>>, %arg5: memref<3x64x128xf32, #tpu.memory_space<vmem>>, %arg6: memref<64x1xf32, #tpu.memory_space<vmem>>, %arg7: memref<3x32x64xf32, #tpu.memory_space<vmem>>, %arg8: memref<32x1xf32, #tpu.memory_space<vmem>>, %arg9: memref<3x16x32xf32, #tpu.memory_space<vmem>>, %arg10: memref<16x1xf32, #tpu.memory_space<vmem>>, %arg11: memref<3x8x16xf32, #tpu.memory_space<vmem>>, %arg12: memref<8x1xf32, #tpu.memory_space<vmem>>, %arg13: memref<4x160x512xf32, #tpu.memory_space<vmem>>, %arg14: memref<1x512xf32, #tpu.memory_space<vmem>>, %arg15: memref<2x512xf32, #tpu.memory_space<vmem>>) attributes {dimension_semantics = [], scalar_prefetch = 0 : i64, scratch_operands = 0 : i64, tpu.core_type = #tpu.core_type<tc>} {
    %c0 = arith.constant 0 : index
    %c0_0 = arith.constant 0 : index
    %0 = vector.load %arg1[%c0, %c0_0] : memref<160x160xf32, #tpu.memory_space<vmem>>, vector<160x160xf32>
    %c0_1 = arith.constant 0 : index
    %c0_2 = arith.constant 0 : index
    %1 = vector.load %arg2[%c0_1, %c0_2] : memref<160x160xf32, #tpu.memory_space<vmem>>, vector<160x160xf32>
    %c0_3 = arith.constant 0 : index
    %c0_4 = arith.constant 0 : index
    %2 = vector.load %arg0[%c0_3, %c0_4] : memref<8x160xf32, #tpu.memory_space<vmem>>, vector<8x160xf32>
    %cst = arith.constant dense<0.000000e+00> : vector<8x160xf32>
    %3 = tpu.matmul %2, %0, %cst {dimension_numbers = #tpu.dot_dimension_numbers<[1], [0], [0], [1], [0, 0, 1, 1], [], []>} : vector<8x160xf32>, vector<160x160xf32>, vector<8x160xf32> -> vector<8x160xf32>
    %cst_5 = arith.constant dense<0.000000e+00> : vector<8x160xf32>
    %4 = tpu.matmul %2, %1, %cst_5 {dimension_numbers = #tpu.dot_dimension_numbers<[1], [0], [0], [1], [0, 0, 1, 1], [], []>} : vector<8x160xf32>, vector<160x160xf32>, vector<8x160xf32> -> vector<8x160xf32>
    %c0_6 = arith.constant 0 : index
    %c0_7 = arith.constant 0 : index
    %c0_8 = arith.constant 0 : index
    %5 = vector.load %arg3[%c0_6, %c0_7, %c0_8] : memref<3x128x8xf32, #tpu.memory_space<vmem>>, vector<1x128x8xf32>
    %6 = vector.shape_cast %5 : vector<1x128x8xf32> to vector<128x8xf32>
    %cst_9 = arith.constant dense<0.000000e+00> : vector<128x160xf32>
    %7 = tpu.matmul %6, %3, %cst_9 {dimension_numbers = #tpu.dot_dimension_numbers<[1], [0], [0], [1], [0, 0, 1, 1], [], []>} : vector<128x8xf32>, vector<8x160xf32>, vector<128x160xf32> -> vector<128x160xf32>
    %c1 = arith.constant 1 : index
    %c0_10 = arith.constant 0 : index
    %c0_11 = arith.constant 0 : index
    %8 = vector.load %arg3[%c1, %c0_10, %c0_11] : memref<3x128x8xf32, #tpu.memory_space<vmem>>, vector<1x128x8xf32>
    %9 = vector.shape_cast %8 : vector<1x128x8xf32> to vector<128x8xf32>
    %cst_12 = arith.constant dense<0.000000e+00> : vector<128x160xf32>
    %10 = tpu.matmul %9, %2, %cst_12 {dimension_numbers = #tpu.dot_dimension_numbers<[1], [0], [0], [1], [0, 0, 1, 1], [], []>} : vector<128x8xf32>, vector<8x160xf32>, vector<128x160xf32> -> vector<128x160xf32>
    %11 = arith.addf %7, %10 : vector<128x160xf32>
    %c2 = arith.constant 2 : index
    %c0_13 = arith.constant 0 : index
    %c0_14 = arith.constant 0 : index
    %12 = vector.load %arg3[%c2, %c0_13, %c0_14] : memref<3x128x8xf32, #tpu.memory_space<vmem>>, vector<1x128x8xf32>
    %13 = vector.shape_cast %12 : vector<1x128x8xf32> to vector<128x8xf32>
    %cst_15 = arith.constant dense<0.000000e+00> : vector<128x160xf32>
    %14 = tpu.matmul %13, %4, %cst_15 {dimension_numbers = #tpu.dot_dimension_numbers<[1], [0], [0], [1], [0, 0, 1, 1], [], []>} : vector<128x8xf32>, vector<8x160xf32>, vector<128x160xf32> -> vector<128x160xf32>
    %15 = arith.addf %11, %14 : vector<128x160xf32>
    %c0_16 = arith.constant 0 : index
    %c0_17 = arith.constant 0 : index
    %16 = vector.load %arg4[%c0_16, %c0_17] : memref<128x1xf32, #tpu.memory_space<vmem>>, vector<128x1xf32>
    %17 = vector.broadcast %16 : vector<128x1xf32> to vector<128x160xf32>
    %18 = arith.addf %15, %17 : vector<128x160xf32>
    %cst_18 = arith.constant 0.000000e+00 : f32
    %19 = vector.broadcast %cst_18 : f32 to vector<128x160xf32>
    %20 = arith.maximumf %18, %19 : vector<128x160xf32>
    %cst_19 = arith.constant dense<0.000000e+00> : vector<128x160xf32>
    %21 = tpu.matmul %20, %0, %cst_19 {dimension_numbers = #tpu.dot_dimension_numbers<[1], [0], [0], [1], [0, 0, 1, 1], [], []>} : vector<128x160xf32>, vector<160x160xf32>, vector<128x160xf32> -> vector<128x160xf32>
    %cst_20 = arith.constant dense<0.000000e+00> : vector<128x160xf32>
    %22 = tpu.matmul %20, %1, %cst_20 {dimension_numbers = #tpu.dot_dimension_numbers<[1], [0], [0], [1], [0, 0, 1, 1], [], []>} : vector<128x160xf32>, vector<160x160xf32>, vector<128x160xf32> -> vector<128x160xf32>
    %c0_21 = arith.constant 0 : index
    %c0_22 = arith.constant 0 : index
    %c0_23 = arith.constant 0 : index
    %23 = vector.load %arg5[%c0_21, %c0_22, %c0_23] : memref<3x64x128xf32, #tpu.memory_space<vmem>>, vector<1x64x128xf32>
    %24 = vector.shape_cast %23 : vector<1x64x128xf32> to vector<64x128xf32>
    %cst_24 = arith.constant dense<0.000000e+00> : vector<64x160xf32>
    %25 = tpu.matmul %24, %21, %cst_24 {dimension_numbers = #tpu.dot_dimension_numbers<[1], [0], [0], [1], [0, 0, 1, 1], [], []>} : vector<64x128xf32>, vector<128x160xf32>, vector<64x160xf32> -> vector<64x160xf32>
    %c1_25 = arith.constant 1 : index
    %c0_26 = arith.constant 0 : index
    %c0_27 = arith.constant 0 : index
    %26 = vector.load %arg5[%c1_25, %c0_26, %c0_27] : memref<3x64x128xf32, #tpu.memory_space<vmem>>, vector<1x64x128xf32>
    %27 = vector.shape_cast %26 : vector<1x64x128xf32> to vector<64x128xf32>
    %cst_28 = arith.constant dense<0.000000e+00> : vector<64x160xf32>
    %28 = tpu.matmul %27, %20, %cst_28 {dimension_numbers = #tpu.dot_dimension_numbers<[1], [0], [0], [1], [0, 0, 1, 1], [], []>} : vector<64x128xf32>, vector<128x160xf32>, vector<64x160xf32> -> vector<64x160xf32>
    %29 = arith.addf %25, %28 : vector<64x160xf32>
    %c2_29 = arith.constant 2 : index
    %c0_30 = arith.constant 0 : index
    %c0_31 = arith.constant 0 : index
    %30 = vector.load %arg5[%c2_29, %c0_30, %c0_31] : memref<3x64x128xf32, #tpu.memory_space<vmem>>, vector<1x64x128xf32>
    %31 = vector.shape_cast %30 : vector<1x64x128xf32> to vector<64x128xf32>
    %cst_32 = arith.constant dense<0.000000e+00> : vector<64x160xf32>
    %32 = tpu.matmul %31, %22, %cst_32 {dimension_numbers = #tpu.dot_dimension_numbers<[1], [0], [0], [1], [0, 0, 1, 1], [], []>} : vector<64x128xf32>, vector<128x160xf32>, vector<64x160xf32> -> vector<64x160xf32>
    %33 = arith.addf %29, %32 : vector<64x160xf32>
    %c0_33 = arith.constant 0 : index
    %c0_34 = arith.constant 0 : index
    %34 = vector.load %arg6[%c0_33, %c0_34] : memref<64x1xf32, #tpu.memory_space<vmem>>, vector<64x1xf32>
    %35 = vector.broadcast %34 : vector<64x1xf32> to vector<64x160xf32>
    %36 = arith.addf %33, %35 : vector<64x160xf32>
    %cst_35 = arith.constant 0.000000e+00 : f32
    %37 = vector.broadcast %cst_35 : f32 to vector<64x160xf32>
    %38 = arith.maximumf %36, %37 : vector<64x160xf32>
    %cst_36 = arith.constant dense<0.000000e+00> : vector<64x160xf32>
    %39 = tpu.matmul %38, %0, %cst_36 {dimension_numbers = #tpu.dot_dimension_numbers<[1], [0], [0], [1], [0, 0, 1, 1], [], []>} : vector<64x160xf32>, vector<160x160xf32>, vector<64x160xf32> -> vector<64x160xf32>
    %cst_37 = arith.constant dense<0.000000e+00> : vector<64x160xf32>
    %40 = tpu.matmul %38, %1, %cst_37 {dimension_numbers = #tpu.dot_dimension_numbers<[1], [0], [0], [1], [0, 0, 1, 1], [], []>} : vector<64x160xf32>, vector<160x160xf32>, vector<64x160xf32> -> vector<64x160xf32>
    %c0_38 = arith.constant 0 : index
    %c0_39 = arith.constant 0 : index
    %c0_40 = arith.constant 0 : index
    %41 = vector.load %arg7[%c0_38, %c0_39, %c0_40] : memref<3x32x64xf32, #tpu.memory_space<vmem>>, vector<1x32x64xf32>
    %42 = vector.shape_cast %41 : vector<1x32x64xf32> to vector<32x64xf32>
    %cst_41 = arith.constant dense<0.000000e+00> : vector<32x160xf32>
    %43 = tpu.matmul %42, %39, %cst_41 {dimension_numbers = #tpu.dot_dimension_numbers<[1], [0], [0], [1], [0, 0, 1, 1], [], []>} : vector<32x64xf32>, vector<64x160xf32>, vector<32x160xf32> -> vector<32x160xf32>
    %c1_42 = arith.constant 1 : index
    %c0_43 = arith.constant 0 : index
    %c0_44 = arith.constant 0 : index
    %44 = vector.load %arg7[%c1_42, %c0_43, %c0_44] : memref<3x32x64xf32, #tpu.memory_space<vmem>>, vector<1x32x64xf32>
    %45 = vector.shape_cast %44 : vector<1x32x64xf32> to vector<32x64xf32>
    %cst_45 = arith.constant dense<0.000000e+00> : vector<32x160xf32>
    %46 = tpu.matmul %45, %38, %cst_45 {dimension_numbers = #tpu.dot_dimension_numbers<[1], [0], [0], [1], [0, 0, 1, 1], [], []>} : vector<32x64xf32>, vector<64x160xf32>, vector<32x160xf32> -> vector<32x160xf32>
    %47 = arith.addf %43, %46 : vector<32x160xf32>
    %c2_46 = arith.constant 2 : index
    %c0_47 = arith.constant 0 : index
    %c0_48 = arith.constant 0 : index
    %48 = vector.load %arg7[%c2_46, %c0_47, %c0_48] : memref<3x32x64xf32, #tpu.memory_space<vmem>>, vector<1x32x64xf32>
    %49 = vector.shape_cast %48 : vector<1x32x64xf32> to vector<32x64xf32>
    %cst_49 = arith.constant dense<0.000000e+00> : vector<32x160xf32>
    %50 = tpu.matmul %49, %40, %cst_49 {dimension_numbers = #tpu.dot_dimension_numbers<[1], [0], [0], [1], [0, 0, 1, 1], [], []>} : vector<32x64xf32>, vector<64x160xf32>, vector<32x160xf32> -> vector<32x160xf32>
    %51 = arith.addf %47, %50 : vector<32x160xf32>
    %c0_50 = arith.constant 0 : index
    %c0_51 = arith.constant 0 : index
    %52 = vector.load %arg8[%c0_50, %c0_51] : memref<32x1xf32, #tpu.memory_space<vmem>>, vector<32x1xf32>
    %53 = vector.broadcast %52 : vector<32x1xf32> to vector<32x160xf32>
    %54 = arith.addf %51, %53 : vector<32x160xf32>
    %cst_52 = arith.constant 0.000000e+00 : f32
    %55 = vector.broadcast %cst_52 : f32 to vector<32x160xf32>
    %56 = arith.maximumf %54, %55 : vector<32x160xf32>
    %cst_53 = arith.constant dense<0.000000e+00> : vector<32x160xf32>
    %57 = tpu.matmul %56, %0, %cst_53 {dimension_numbers = #tpu.dot_dimension_numbers<[1], [0], [0], [1], [0, 0, 1, 1], [], []>} : vector<32x160xf32>, vector<160x160xf32>, vector<32x160xf32> -> vector<32x160xf32>
    %cst_54 = arith.constant dense<0.000000e+00> : vector<32x160xf32>
    %58 = tpu.matmul %56, %1, %cst_54 {dimension_numbers = #tpu.dot_dimension_numbers<[1], [0], [0], [1], [0, 0, 1, 1], [], []>} : vector<32x160xf32>, vector<160x160xf32>, vector<32x160xf32> -> vector<32x160xf32>
    %c0_55 = arith.constant 0 : index
    %c0_56 = arith.constant 0 : index
    %c0_57 = arith.constant 0 : index
    %59 = vector.load %arg9[%c0_55, %c0_56, %c0_57] : memref<3x16x32xf32, #tpu.memory_space<vmem>>, vector<1x16x32xf32>
    %60 = vector.shape_cast %59 : vector<1x16x32xf32> to vector<16x32xf32>
    %cst_58 = arith.constant dense<0.000000e+00> : vector<16x160xf32>
    %61 = tpu.matmul %60, %57, %cst_58 {dimension_numbers = #tpu.dot_dimension_numbers<[1], [0], [0], [1], [0, 0, 1, 1], [], []>} : vector<16x32xf32>, vector<32x160xf32>, vector<16x160xf32> -> vector<16x160xf32>
    %c1_59 = arith.constant 1 : index
    %c0_60 = arith.constant 0 : index
    %c0_61 = arith.constant 0 : index
    %62 = vector.load %arg9[%c1_59, %c0_60, %c0_61] : memref<3x16x32xf32, #tpu.memory_space<vmem>>, vector<1x16x32xf32>
    %63 = vector.shape_cast %62 : vector<1x16x32xf32> to vector<16x32xf32>
    %cst_62 = arith.constant dense<0.000000e+00> : vector<16x160xf32>
    %64 = tpu.matmul %63, %56, %cst_62 {dimension_numbers = #tpu.dot_dimension_numbers<[1], [0], [0], [1], [0, 0, 1, 1], [], []>} : vector<16x32xf32>, vector<32x160xf32>, vector<16x160xf32> -> vector<16x160xf32>
    %65 = arith.addf %61, %64 : vector<16x160xf32>
    %c2_63 = arith.constant 2 : index
    %c0_64 = arith.constant 0 : index
    %c0_65 = arith.constant 0 : index
    %66 = vector.load %arg9[%c2_63, %c0_64, %c0_65] : memref<3x16x32xf32, #tpu.memory_space<vmem>>, vector<1x16x32xf32>
    %67 = vector.shape_cast %66 : vector<1x16x32xf32> to vector<16x32xf32>
    %cst_66 = arith.constant dense<0.000000e+00> : vector<16x160xf32>
    %68 = tpu.matmul %67, %58, %cst_66 {dimension_numbers = #tpu.dot_dimension_numbers<[1], [0], [0], [1], [0, 0, 1, 1], [], []>} : vector<16x32xf32>, vector<32x160xf32>, vector<16x160xf32> -> vector<16x160xf32>
    %69 = arith.addf %65, %68 : vector<16x160xf32>
    %c0_67 = arith.constant 0 : index
    %c0_68 = arith.constant 0 : index
    %70 = vector.load %arg10[%c0_67, %c0_68] : memref<16x1xf32, #tpu.memory_space<vmem>>, vector<16x1xf32>
    %71 = vector.broadcast %70 : vector<16x1xf32> to vector<16x160xf32>
    %72 = arith.addf %69, %71 : vector<16x160xf32>
    %cst_69 = arith.constant 0.000000e+00 : f32
    %73 = vector.broadcast %cst_69 : f32 to vector<16x160xf32>
    %74 = arith.maximumf %72, %73 : vector<16x160xf32>
    %cst_70 = arith.constant dense<0.000000e+00> : vector<16x160xf32>
    %75 = tpu.matmul %74, %0, %cst_70 {dimension_numbers = #tpu.dot_dimension_numbers<[1], [0], [0], [1], [0, 0, 1, 1], [], []>} : vector<16x160xf32>, vector<160x160xf32>, vector<16x160xf32> -> vector<16x160xf32>
    %cst_71 = arith.constant dense<0.000000e+00> : vector<16x160xf32>
    %76 = tpu.matmul %74, %1, %cst_71 {dimension_numbers = #tpu.dot_dimension_numbers<[1], [0], [0], [1], [0, 0, 1, 1], [], []>} : vector<16x160xf32>, vector<160x160xf32>, vector<16x160xf32> -> vector<16x160xf32>
    %c0_72 = arith.constant 0 : index
    %c0_73 = arith.constant 0 : index
    %c0_74 = arith.constant 0 : index
    %77 = vector.load %arg11[%c0_72, %c0_73, %c0_74] : memref<3x8x16xf32, #tpu.memory_space<vmem>>, vector<1x8x16xf32>
    %78 = vector.shape_cast %77 : vector<1x8x16xf32> to vector<8x16xf32>
    %cst_75 = arith.constant dense<0.000000e+00> : vector<8x160xf32>
    %79 = tpu.matmul %78, %75, %cst_75 {dimension_numbers = #tpu.dot_dimension_numbers<[1], [0], [0], [1], [0, 0, 1, 1], [], []>} : vector<8x16xf32>, vector<16x160xf32>, vector<8x160xf32> -> vector<8x160xf32>
    %c1_76 = arith.constant 1 : index
    %c0_77 = arith.constant 0 : index
    %c0_78 = arith.constant 0 : index
    %80 = vector.load %arg11[%c1_76, %c0_77, %c0_78] : memref<3x8x16xf32, #tpu.memory_space<vmem>>, vector<1x8x16xf32>
    %81 = vector.shape_cast %80 : vector<1x8x16xf32> to vector<8x16xf32>
    %cst_79 = arith.constant dense<0.000000e+00> : vector<8x160xf32>
    %82 = tpu.matmul %81, %74, %cst_79 {dimension_numbers = #tpu.dot_dimension_numbers<[1], [0], [0], [1], [0, 0, 1, 1], [], []>} : vector<8x16xf32>, vector<16x160xf32>, vector<8x160xf32> -> vector<8x160xf32>
    %83 = arith.addf %79, %82 : vector<8x160xf32>
    %c2_80 = arith.constant 2 : index
    %c0_81 = arith.constant 0 : index
    %c0_82 = arith.constant 0 : index
    %84 = vector.load %arg11[%c2_80, %c0_81, %c0_82] : memref<3x8x16xf32, #tpu.memory_space<vmem>>, vector<1x8x16xf32>
    %85 = vector.shape_cast %84 : vector<1x8x16xf32> to vector<8x16xf32>
    %cst_83 = arith.constant dense<0.000000e+00> : vector<8x160xf32>
    %86 = tpu.matmul %85, %76, %cst_83 {dimension_numbers = #tpu.dot_dimension_numbers<[1], [0], [0], [1], [0, 0, 1, 1], [], []>} : vector<8x16xf32>, vector<16x160xf32>, vector<8x160xf32> -> vector<8x160xf32>
    %87 = arith.addf %83, %86 : vector<8x160xf32>
    %c0_84 = arith.constant 0 : index
    %c0_85 = arith.constant 0 : index
    %88 = vector.load %arg12[%c0_84, %c0_85] : memref<8x1xf32, #tpu.memory_space<vmem>>, vector<8x1xf32>
    %89 = vector.broadcast %88 : vector<8x1xf32> to vector<8x160xf32>
    %90 = arith.addf %87, %89 : vector<8x160xf32>
    %cst_86 = arith.constant 0.000000e+00 : f32
    %91 = vector.broadcast %cst_86 : f32 to vector<8x160xf32>
    %92 = arith.maximumf %90, %91 : vector<8x160xf32>
    %c0_87 = arith.constant 0 : index
    %c0_88 = arith.constant 0 : index
    %93 = vector.load %arg14[%c0_87, %c0_88] : memref<1x512xf32, #tpu.memory_space<vmem>>, vector<1x512xf32>
    %cst_89 = arith.constant 0.000000e+00 : f32
    %94 = vector.broadcast %cst_89 : f32 to vector<1x512xf32>
    %95 = vector.extract_strided_slice %92 {offsets = [0, 0], sizes = [1, 160], strides = [1, 1]} : vector<8x160xf32> to vector<1x160xf32>
    %c0_90 = arith.constant 0 : index
    %c0_91 = arith.constant 0 : index
    %c0_92 = arith.constant 0 : index
    %96 = vector.load %arg13[%c0_90, %c0_91, %c0_92] : memref<4x160x512xf32, #tpu.memory_space<vmem>>, vector<1x160x512xf32>
    %97 = vector.shape_cast %96 : vector<1x160x512xf32> to vector<160x512xf32>
    %cst_93 = arith.constant dense<0.000000e+00> : vector<1x512xf32>
    %98 = tpu.matmul %95, %97, %cst_93 {dimension_numbers = #tpu.dot_dimension_numbers<[1], [0], [0], [1], [0, 0, 1, 1], [], []>} : vector<1x160xf32>, vector<160x512xf32>, vector<1x512xf32> -> vector<1x512xf32>
    %99 = arith.addf %94, %98 : vector<1x512xf32>
    %100 = vector.extract_strided_slice %92 {offsets = [1, 0], sizes = [1, 160], strides = [1, 1]} : vector<8x160xf32> to vector<1x160xf32>
    %c1_94 = arith.constant 1 : index
    %c0_95 = arith.constant 0 : index
    %c0_96 = arith.constant 0 : index
    %101 = vector.load %arg13[%c1_94, %c0_95, %c0_96] : memref<4x160x512xf32, #tpu.memory_space<vmem>>, vector<1x160x512xf32>
    %102 = vector.shape_cast %101 : vector<1x160x512xf32> to vector<160x512xf32>
    %cst_97 = arith.constant dense<0.000000e+00> : vector<1x512xf32>
    %103 = tpu.matmul %100, %102, %cst_97 {dimension_numbers = #tpu.dot_dimension_numbers<[1], [0], [0], [1], [0, 0, 1, 1], [], []>} : vector<1x160xf32>, vector<160x512xf32>, vector<1x512xf32> -> vector<1x512xf32>
    %104 = arith.addf %99, %103 : vector<1x512xf32>
    %105 = vector.extract_strided_slice %92 {offsets = [2, 0], sizes = [1, 160], strides = [1, 1]} : vector<8x160xf32> to vector<1x160xf32>
    %c2_98 = arith.constant 2 : index
    %c0_99 = arith.constant 0 : index
    %c0_100 = arith.constant 0 : index
    %106 = vector.load %arg13[%c2_98, %c0_99, %c0_100] : memref<4x160x512xf32, #tpu.memory_space<vmem>>, vector<1x160x512xf32>
    %107 = vector.shape_cast %106 : vector<1x160x512xf32> to vector<160x512xf32>
    %cst_101 = arith.constant dense<0.000000e+00> : vector<1x512xf32>
    %108 = tpu.matmul %105, %107, %cst_101 {dimension_numbers = #tpu.dot_dimension_numbers<[1], [0], [0], [1], [0, 0, 1, 1], [], []>} : vector<1x160xf32>, vector<160x512xf32>, vector<1x512xf32> -> vector<1x512xf32>
    %109 = arith.addf %104, %108 : vector<1x512xf32>
    %110 = vector.extract_strided_slice %92 {offsets = [3, 0], sizes = [1, 160], strides = [1, 1]} : vector<8x160xf32> to vector<1x160xf32>
    %c3 = arith.constant 3 : index
    %c0_102 = arith.constant 0 : index
    %c0_103 = arith.constant 0 : index
    %111 = vector.load %arg13[%c3, %c0_102, %c0_103] : memref<4x160x512xf32, #tpu.memory_space<vmem>>, vector<1x160x512xf32>
    %112 = vector.shape_cast %111 : vector<1x160x512xf32> to vector<160x512xf32>
    %cst_104 = arith.constant dense<0.000000e+00> : vector<1x512xf32>
    %113 = tpu.matmul %110, %112, %cst_104 {dimension_numbers = #tpu.dot_dimension_numbers<[1], [0], [0], [1], [0, 0, 1, 1], [], []>} : vector<1x160xf32>, vector<160x512xf32>, vector<1x512xf32> -> vector<1x512xf32>
    %114 = arith.addf %109, %113 : vector<1x512xf32>
    %115 = arith.addf %114, %93 : vector<1x512xf32>
    %c0_105 = arith.constant 0 : index
    %c0_106 = arith.constant 0 : index
    %116 = vector.load %arg15[%c0_105, %c0_106] : memref<2x512xf32, #tpu.memory_space<vmem>>, vector<1x512xf32>
    tpu.vector_store %arg15[%c0_105, %c0_106], %115 {strides = array<i32>} : memref<2x512xf32, #tpu.memory_space<vmem>>, vector<1x512xf32>,
    %cst_107 = arith.constant 0.000000e+00 : f32
    %117 = vector.broadcast %cst_107 : f32 to vector<1x512xf32>
    %118 = vector.extract_strided_slice %92 {offsets = [4, 0], sizes = [1, 160], strides = [1, 1]} : vector<8x160xf32> to vector<1x160xf32>
    %c0_108 = arith.constant 0 : index
    %c0_109 = arith.constant 0 : index
    %c0_110 = arith.constant 0 : index
    %119 = vector.load %arg13[%c0_108, %c0_109, %c0_110] : memref<4x160x512xf32, #tpu.memory_space<vmem>>, vector<1x160x512xf32>
    %120 = vector.shape_cast %119 : vector<1x160x512xf32> to vector<160x512xf32>
    %cst_111 = arith.constant dense<0.000000e+00> : vector<1x512xf32>
    %121 = tpu.matmul %118, %120, %cst_111 {dimension_numbers = #tpu.dot_dimension_numbers<[1], [0], [0], [1], [0, 0, 1, 1], [], []>} : vector<1x160xf32>, vector<160x512xf32>, vector<1x512xf32> -> vector<1x512xf32>
    %122 = arith.addf %117, %121 : vector<1x512xf32>
    %123 = vector.extract_strided_slice %92 {offsets = [5, 0], sizes = [1, 160], strides = [1, 1]} : vector<8x160xf32> to vector<1x160xf32>
    %c1_112 = arith.constant 1 : index
    %c0_113 = arith.constant 0 : index
    %c0_114 = arith.constant 0 : index
    %124 = vector.load %arg13[%c1_112, %c0_113, %c0_114] : memref<4x160x512xf32, #tpu.memory_space<vmem>>, vector<1x160x512xf32>
    %125 = vector.shape_cast %124 : vector<1x160x512xf32> to vector<160x512xf32>
    %cst_115 = arith.constant dense<0.000000e+00> : vector<1x512xf32>
    %126 = tpu.matmul %123, %125, %cst_115 {dimension_numbers = #tpu.dot_dimension_numbers<[1], [0], [0], [1], [0, 0, 1, 1], [], []>} : vector<1x160xf32>, vector<160x512xf32>, vector<1x512xf32> -> vector<1x512xf32>
    %127 = arith.addf %122, %126 : vector<1x512xf32>
    %128 = vector.extract_strided_slice %92 {offsets = [6, 0], sizes = [1, 160], strides = [1, 1]} : vector<8x160xf32> to vector<1x160xf32>
    %c2_116 = arith.constant 2 : index
    %c0_117 = arith.constant 0 : index
    %c0_118 = arith.constant 0 : index
    %129 = vector.load %arg13[%c2_116, %c0_117, %c0_118] : memref<4x160x512xf32, #tpu.memory_space<vmem>>, vector<1x160x512xf32>
    %130 = vector.shape_cast %129 : vector<1x160x512xf32> to vector<160x512xf32>
    %cst_119 = arith.constant dense<0.000000e+00> : vector<1x512xf32>
    %131 = tpu.matmul %128, %130, %cst_119 {dimension_numbers = #tpu.dot_dimension_numbers<[1], [0], [0], [1], [0, 0, 1, 1], [], []>} : vector<1x160xf32>, vector<160x512xf32>, vector<1x512xf32> -> vector<1x512xf32>
    %132 = arith.addf %127, %131 : vector<1x512xf32>
    %133 = vector.extract_strided_slice %92 {offsets = [7, 0], sizes = [1, 160], strides = [1, 1]} : vector<8x160xf32> to vector<1x160xf32>
    %c3_120 = arith.constant 3 : index
    %c0_121 = arith.constant 0 : index
    %c0_122 = arith.constant 0 : index
    %134 = vector.load %arg13[%c3_120, %c0_121, %c0_122] : memref<4x160x512xf32, #tpu.memory_space<vmem>>, vector<1x160x512xf32>
    %135 = vector.shape_cast %134 : vector<1x160x512xf32> to vector<160x512xf32>
    %cst_123 = arith.constant dense<0.000000e+00> : vector<1x512xf32>
    %136 = tpu.matmul %133, %135, %cst_123 {dimension_numbers = #tpu.dot_dimension_numbers<[1], [0], [0], [1], [0, 0, 1, 1], [], []>} : vector<1x160xf32>, vector<160x512xf32>, vector<1x512xf32> -> vector<1x512xf32>
    %137 = arith.addf %132, %136 : vector<1x512xf32>
    %138 = arith.addf %137, %93 : vector<1x512xf32>
    %c1_124 = arith.constant 1 : index
    %c0_125 = arith.constant 0 : index
    %139 = vector.load %arg15[%c1_124, %c0_125] : memref<2x512xf32, #tpu.memory_space<vmem>>, vector<1x512xf32>
    tpu.vector_store %arg15[%c1_124, %c0_125], %138 {strides = array<i32>} : memref<2x512xf32, #tpu.memory_space<vmem>>, vector<1x512xf32>,
    return
  }
}

</mosaic_0001>

<bundles_post_ra>
// kernel: n_vcnn_forward.1
= control target key start
LH: loop header
LB: loop body
LE: loop exit
PB: predicated region body
PF: predicated region fallthrough
CT: control target
= control target key end

     0   :  { %s8549_s0 = inlined_call_operand.vmem [shape: f32[8,160], index: 0, kind: input, shape index: {}]   ;;  %s8550_s1 = inlined_call_operand.hbm [shape: f32[160,160], index: 1, kind: input, shape index: {}]   ;;  %s8551_s2 = inlined_call_operand.hbm [shape: f32[160,160], index: 2, kind: input, shape index: {}]   ;;  %s8552_s3 = inlined_call_operand.vmem [shape: f32[3,128,8], index: 3, kind: input, shape index: {}]   ;;  %s8553_s4 = inlined_call_operand.vmem [shape: f32[128,1], index: 4, kind: input, shape index: {}]   ;;  %s8554_s5 = inlined_call_operand.hbm [shape: f32[3,64,128], index: 5, kind: input, shape index: {}]   ;;  %s8555_s6 = inlined_call_operand.vmem [shape: f32[64,1], index: 6, kind: input, shape index: {}]   ;;  %s8556_s7 = inlined_call_operand.hbm [shape: f32[3,32,64], index: 7, kind: input, shape index: {}]   ;;  %s8557_s8 = inlined_call_operand.vmem [shape: f32[32,1], index: 8, kind: input, shape index: {}]   ;;  %s8558_s9 = inlined_call_operand.hbm [shape: f32[3,16,32], index: 9, kind: input, shape index: {}]   ;;  %s8559_s10 = inlined_call_operand.vmem [shape: f32[16,1], index: 10, kind: input, shape index: {}]   ;;  %s8560_s11 = inlined_call_operand.hbm [shape: f32[3,8,16], index: 11, kind: input, shape index: {}]   ;;  %s8561_s12 = inlined_call_operand.vmem [shape: f32[8,1], index: 12, kind: input, shape index: {}]   ;;  %s8562_s13 = inlined_call_operand.hbm [shape: f32[4,160,512], index: 13, kind: input, shape index: {}]   ;;  %s8563_s14 = inlined_call_operand.hbm [shape: f32[1,512], index: 14, kind: input, shape index: {}]   ;;  %s8564_s15 = inlined_call_operand.hbm [shape: f32[2,512], index: 15, kind: output, shape index: {}]  }
   0x1   :  { %8608 = sst [smem:[#allocation43_spill]] %s8564_s15 }
   0x2   :  { %20 = vsyncpa [#allocation3], 0 }
   0x3   :  { %21 = vsyncpa [#allocation6], 0 }
   0x4   :  { %22 = vsyncpa [#allocation9], 0 }
   0x5   :  { %23 = vsyncpa [#allocation12], 0 }
   0x6   :  { %24 = vsyncpa [#allocation15], 0 }
   0x7   :  { %25 = vsyncpa [#allocation4], 0  ;;  %s7299_s18 = smov [#allocation5]   ;;  %s7089_s22 = scalar_lea.hbm %s8551_s2, 5120 }
   0x8   :  { %s45_s19 = sshll.u32 %s7299_s18, 4  ;;  %p7090_p0 = scmp.ne.s32.totalorder %s8551_s2, %s7089_s22  ;;  %s46_s19 = int_to_ptr.vmem [resolvable:$true] %s45_s19 }
   0x9   :  { %p7093_p1 = scmp.lt.u32.totalorder %s7089_s22, %s8551_s2 }
   0xb   :  { %p7095_p2 = pnand %p7093_p1, %p7090_p0 }
   0xd   :  { %7098 = shalt.err (!%p7095_p2)
}
   0xe   :  { %s7099_s27 = scalar_lea.vmem %s46_s19, 5120  ;;  %p7104_p4 = scmp.lt.s32.totalorder %s46_s19, %s46_s19 }
   0xf   :  { %p7100_p3 = scmp.ne.s32.totalorder %s46_s19, %s7099_s27  ;;  %p7105_p5 = scmp.lt.s32.totalorder %s7099_s27, %s7099_s27 }
  0x11   :  { %p7106_p6 = por %p7105_p5, %p7104_p4 }
  0x13   :  { %p7107_p7 = pnand %p7106_p6, %p7100_p3 }
  0x15   :  { %7110 = shalt.err (!%p7107_p7)
}
  0x16   :  { %s7300_s28 = smov 256   ;;  %s7301_s29 = smov 16  }
  0x17   :  { %51 = dma.hbm_to_vmem [thread:$0]  %s8551_s2, 5120, %s46_s19, [#allocation6], %s7300_s28, %s7300_s28, %s7301_s29  }
  0x18   :  { %s7302_s17 = smov [#allocation8]   ;;  %s7303_s20 = smov [#allocation11]  }
  0x19   :  { %s75_s18 = sshll.u32 %s7302_s17, 4  ;;  %s103_s21 = sshll.u32 %s7303_s20, 4  ;;  %s76_s18 = int_to_ptr.vmem [resolvable:$true] %s75_s18  ;;  %s104_s21 = int_to_ptr.vmem [resolvable:$true] %s103_s21 }
  0x1a   :  { %s7111_s24 = scalar_lea.hbm %s8556_s7, 1536 }
  0x1b   :  { %p7112_p8 = scmp.ne.s32.totalorder %s8556_s7, %s7111_s24  ;;  %p7115_p9 = scmp.lt.u32.totalorder %s7111_s24, %s8556_s7 }
  0x1d   :  { %p7117_p10 = pnand %p7115_p9, %p7112_p8 }
  0x1f   :  { %7120 = shalt.err (!%p7117_p10)
}
  0x20   :  { %s7121_s2 = scalar_lea.vmem %s76_s18, 1536  ;;  %p7126_p12 = scmp.lt.s32.totalorder %s76_s18, %s76_s18 }
  0x21   :  { %p7122_p11 = scmp.ne.s32.totalorder %s76_s18, %s7121_s2  ;;  %p7127_p13 = scmp.lt.s32.totalorder %s7121_s2, %s7121_s2 }
  0x23   :  { %p7128_p0 = por %p7127_p13, %p7126_p12 }
  0x25   :  { %p7129_p1 = pnand %p7128_p0, %p7122_p11 }
  0x27   :  { %7132 = shalt.err (!%p7129_p1)
}
  0x28   :  { %s7304_s19 = smov 128   ;;  %s7305_s30 = smov 8  }
  0x29   :  { %81 = dma.hbm_to_vmem [thread:$0]  %s8556_s7, 1536, %s76_s18, [#allocation9], %s7304_s19, %s7304_s19, %s7305_s30  }
  0x2a   :  { %s7133_s22 = scalar_lea.hbm %s8560_s11, 384 }
  0x2b   :  { %p7134_p2 = scmp.ne.s32.totalorder %s8560_s11, %s7133_s22  ;;  %p7137_p3 = scmp.lt.u32.totalorder %s7133_s22, %s8560_s11 }
  0x2d   :  { %p7139_p4 = pnand %p7137_p3, %p7134_p2 }
  0x2f   :  { %7142 = shalt.err (!%p7139_p4)
}
  0x30   :  { %s7143_s27 = scalar_lea.vmem %s104_s21, 384  ;;  %p7148_p6 = scmp.lt.s32.totalorder %s104_s21, %s104_s21 }
  0x31   :  { %p7144_p5 = scmp.ne.s32.totalorder %s104_s21, %s7143_s27  ;;  %p7149_p7 = scmp.lt.s32.totalorder %s7143_s27, %s7143_s27 }
  0x33   :  { %p7150_p8 = por %p7149_p7, %p7148_p6 }
  0x35   :  { %p7151_p9 = pnand %p7150_p8, %p7144_p5 }
  0x37   :  { %7154 = shalt.err (!%p7151_p9)
}
  0x38   :  { %109 = dma.hbm_to_vmem [thread:$0]  %s8560_s11, 384, %s104_s21, [#allocation12], %s7304_s19, %s7304_s19, %s7305_s30  }
  0x39   :  { %s7306_s2 = smov [#allocation2]   ;;  %s7307_s17 = smov [#allocation7]  }
  0x3a   :  { %s33_s16 = sshll.u32 %s7306_s2, 4  ;;  %s61_s15 = sshll.u32 %s7307_s17, 4  ;;  %s34_s16 = int_to_ptr.vmem [resolvable:$true] %s33_s16  ;;  %s62_s15 = int_to_ptr.vmem [resolvable:$true] %s61_s15 }
  0x3b   :  { %s7155_s23 = scalar_lea.hbm %s8550_s1, 5120 }
  0x3c   :  { %p7156_p10 = scmp.ne.s32.totalorder %s8550_s1, %s7155_s23  ;;  %p7159_p11 = scmp.lt.u32.totalorder %s7155_s23, %s8550_s1 }
  0x3e   :  { %p7161_p12 = pnand %p7159_p11, %p7156_p10 }
  0x40   :  { %7164 = shalt.err (!%p7161_p12)
}
  0x41   :  { %s7165_s11 = scalar_lea.vmem %s34_s16, 5120  ;;  %p7170_p0 = scmp.lt.s32.totalorder %s34_s16, %s34_s16 }
  0x42   :  { %p7166_p13 = scmp.ne.s32.totalorder %s34_s16, %s7165_s11  ;;  %p7171_p1 = scmp.lt.s32.totalorder %s7165_s11, %s7165_s11 }
  0x44   :  { %p7172_p2 = por %p7171_p1, %p7170_p0 }
  0x46   :  { %p7173_p3 = pnand %p7172_p2, %p7166_p13 }
  0x48   :  { %7176 = shalt.err (!%p7173_p3)
}
  0x49   :  { %39 = dma.hbm_to_vmem [thread:$0]  %s8550_s1, 5120, %s34_s16, [#allocation3], %s7300_s28, %s7300_s28, %s7301_s29  }
  0x4a   :  { %s7177_s17 = scalar_lea.hbm %s8554_s5, 3072 }
  0x4b   :  { %p7178_p4 = scmp.ne.s32.totalorder %s8554_s5, %s7177_s17  ;;  %p7181_p5 = scmp.lt.u32.totalorder %s7177_s17, %s8554_s5 }
  0x4d   :  { %p7183_p6 = pnand %p7181_p5, %p7178_p4 }
  0x4f   :  { %7186 = shalt.err (!%p7183_p6)
}
  0x50   :  { %s7187_s25 = scalar_lea.vmem %s62_s15, 3072  ;;  %p7192_p8 = scmp.lt.s32.totalorder %s62_s15, %s62_s15 }
  0x51   :  { %p7188_p7 = scmp.ne.s32.totalorder %s62_s15, %s7187_s25  ;;  %p7193_p9 = scmp.lt.s32.totalorder %s7187_s25, %s7187_s25 }
  0x53   :  { %p7194_p10 = por %p7193_p9, %p7192_p8 }
  0x55   :  { %p7195_p11 = pnand %p7194_p10, %p7188_p7 }
  0x57   :  { %7198 = shalt.err (!%p7195_p11)
}
  0x58   :  { %67 = dma.hbm_to_vmem [thread:$0]  %s8554_s5, 3072, %s62_s15, [#allocation6], %s7304_s19, %s7304_s19, %s7305_s30  }
  0x59   :  { %s7308_s29 = smov [#allocation10]   ;;  %s7309_s26 = smov [#allocation13]  }
  0x5a   :  { %s89_s16 = sshll.u32 %s7308_s29, 4  ;;  %s117_s27 = sshll.u32 %s7309_s26, 4  ;;  %s90_s16 = int_to_ptr.vmem [resolvable:$true] %s89_s16  ;;  %s118_s27 = int_to_ptr.vmem [resolvable:$true] %s117_s27 }
  0x5b   :  { %s7199_s7 = scalar_lea.hbm %s8558_s9, 768 }
  0x5c   :  { %p7200_p12 = scmp.ne.s32.totalorder %s8558_s9, %s7199_s7  ;;  %p7203_p13 = scmp.lt.u32.totalorder %s7199_s7, %s8558_s9 }
  0x5e   :  { %p7205_p0 = pnand %p7203_p13, %p7200_p12 }
  0x60   :  { %7208 = shalt.err (!%p7205_p0)
}
  0x61   :  { %s7209_s5 = scalar_lea.vmem %s90_s16, 768  ;;  %p7214_p2 = scmp.lt.s32.totalorder %s90_s16, %s90_s16 }
  0x62   :  { %p7210_p1 = scmp.ne.s32.totalorder %s90_s16, %s7209_s5  ;;  %p7215_p3 = scmp.lt.s32.totalorder %s7209_s5, %s7209_s5 }
  0x64   :  { %p7216_p4 = por %p7215_p3, %p7214_p2 }
  0x66   :  { %p7217_p5 = pnand %p7216_p4, %p7210_p1 }
  0x68   :  { %7220 = shalt.err (!%p7217_p5)
}
  0x69   :  { %95 = dma.hbm_to_vmem [thread:$0]  %s8558_s9, 768, %s90_s16, [#allocation9], %s7304_s19, %s7304_s19, %s7305_s30  }
  0x6a   :  { %s7221_s25 = scalar_lea.hbm %s8562_s13, 40960 }
  0x6b   :  { %p7222_p6 = scmp.ne.s32.totalorder %s8562_s13, %s7221_s25  ;;  %p7225_p7 = scmp.lt.u32.totalorder %s7221_s25, %s8562_s13 }
  0x6d   :  { %p7227_p8 = pnand %p7225_p7, %p7222_p6 }
  0x6f   :  { %7230 = shalt.err (!%p7227_p8)
}
  0x70   :  { %s7231_s11 = scalar_lea.vmem %s118_s27, 40960  ;;  %p7236_p10 = scmp.lt.s32.totalorder %s118_s27, %s118_s27 }
  0x71   :  { %p7232_p9 = scmp.ne.s32.totalorder %s118_s27, %s7231_s11  ;;  %p7237_p11 = scmp.lt.s32.totalorder %s7231_s11, %s7231_s11 }
  0x73   :  { %p7238_p12 = por %p7237_p11, %p7236_p10 }
  0x75   :  { %p7239_p13 = pnand %p7238_p12, %p7232_p9 }
  0x77   :  { %7242 = shalt.err (!%p7239_p13)
}
  0x78   :  { %s7310_s9 = smov 512   ;;  %s7311_s19 = smov 32  }
  0x79   :  { %123 = dma.hbm_to_vmem [thread:$0]  %s8562_s13, 40960, %s118_s27, [#allocation12], %s7310_s9, %s7310_s9, %s7311_s19  }
  0x7a   :  { %s7312_s21 = smov [#allocation14]   ;;  %s7243_s17 = scalar_lea.hbm %s8563_s14, 64 }
  0x7b   :  { %s130_s7 = sshll.u32 %s7312_s21, 4  ;;  %p7244_p0 = scmp.ne.s32.totalorder %s8563_s14, %s7243_s17  ;;  %s131_s7 = int_to_ptr.vmem [resolvable:$true] %s130_s7 }
  0x7c   :  { %p7247_p1 = scmp.lt.u32.totalorder %s7243_s17, %s8563_s14 }
  0x7e   :  { %p7249_p2 = pnand %p7247_p1, %p7244_p0 }
  0x80   :  { %7252 = shalt.err (!%p7249_p2)
}
  0x81   :  { %s7253_s23 = scalar_lea.vmem %s131_s7, 64  ;;  %p7258_p4 = scmp.lt.s32.totalorder %s131_s7, %s131_s7 }
  0x82   :  { %p7254_p3 = scmp.ne.s32.totalorder %s131_s7, %s7253_s23  ;;  %p7259_p5 = scmp.lt.s32.totalorder %s7253_s23, %s7253_s23 }
  0x84   :  { %p7260_p6 = por %p7259_p5, %p7258_p4 }
  0x86   :  { %p7261_p7 = pnand %p7260_p6, %p7254_p3 }
  0x88   :  { %7264 = shalt.err (!%p7261_p7)
}
  0x89   :  { %133 = dma.hbm_to_vmem [thread:$0]  %s8563_s14, 64, %s131_s7, [#allocation15]  }
  0x8a   :  { %7287 = dma.done.wait [#allocation3], 5120  }
  0x8b   :  { %7288 = vsyncadd [#allocation3], 4294962176 }
  0x8c   :  { %7289 = dma.done.wait [#allocation6], 8192  }
  0x8d   :  { %7290 = vsyncadd [#allocation6], 4294959104 }
  0x8e   :  { %7291 = dma.done.wait [#allocation9], 2304  }
  0x8f   :  { %7292 = vsyncadd [#allocation9], 4294964992 }
  0x90   :  { %7293 = dma.done.wait [#allocation12], 41344  }
  0x91   :  { %7294 = vsyncadd [#allocation12], 4294925952 }
  0x92   :  { %7295 = dma.done.wait [#allocation15], 64  }
  0x93   :  { %7296 = vsyncadd [#allocation15], 4294967232  ;;  %v159_v0 = vld [vmem:[#allocation2 + $0x8] sm:$0xff]  ;;  %v161_v1 = vld [vmem:[#allocation2 + $0x18] sm:$0xff]  ;;  %vm240_vm0 = vcmask 261120   ;;  %vm419_vm1 = vcmask 64512  }
  0x94   :  { %v158_v2 = vld [vmem:[#allocation2] sm:$0xff]  ;;  %v7511_v3 = vpack.c.bf16 %v161_v1, %v159_v0  ;;  %v160_v4 = vld [vmem:[#allocation2 + $0x10] sm:$0xff]  ;;  %v163_v5 = vld [vmem:[#allocation2 + $0x28] sm:$0xff]  ;;  %vm2346_vm2 = vcmask 523264   ;;  %vm3337_vm3 = vcmask 130048  }
  0x95   :  { %v165_v6 = vld [vmem:[#allocation2 + $0x38] sm:$0xff]  ;;  %v7513_v7 = vpack.c.bf16 %v160_v4, %v158_v2  ;;  %v162_v9 = vld [vmem:[#allocation2 + $0x20] sm:$0xff]  ;;  %v164_v10 = vld [vmem:[#allocation2 + $0x30] sm:$0xff] }
  0x96   :  { %v7515_v8 = vpack.c.bf16 %v165_v6, %v163_v5  ;;  %v167_v11 = vld [vmem:[#allocation2 + $0x48] sm:$0xff]  ;;  %5702 = vmatprep.subr.bf16.mxu0 %v7511_v3  ;;  %v169_v12 = vld [vmem:[#allocation2 + $0x58] sm:$0xff]  ;;  %v7519_v13 = vpack.c.bf16 %v164_v10, %v162_v9  ;;  %v166_v15 = vld [vmem:[#allocation2 + $0x40] sm:$0xff] }
  0x97   :  { %8609 = vst [vmem:[#allocation23_spill] sm:$0xff] %v7513_v7  ;;  %5704 = vmatpush1.bf16.msra.mxu0 %v7513_v7  ;;  %v7522_v14 = vpack.c.bf16 %v169_v12, %v167_v11  ;;  %v168_v16 = vld [vmem:[#allocation2 + $0x50] sm:$0xff]  ;;  %v171_v17 = vld [vmem:[#allocation2 + $0x68] sm:$0xff]  ;;  %v173_v18 = vld [vmem:[#allocation2 + $0x78] sm:$0xff] }
  0x98   :  { %8610 = vst [vmem:[#allocation24_spill] sm:$0xff] %v7515_v8  ;;  %8611 = vst [vmem:[#allocation25_spill] sm:$0xff] %v7519_v13  ;;  %5706 = vmatprep.subr.bf16.mxu0 %v7515_v8  ;;  %v7525_v19 = vpack.c.bf16 %v168_v16, %v166_v15  ;;  %v7528_v20 = vpack.c.bf16 %v173_v18, %v171_v17  ;;  %v170_v21 = vld [vmem:[#allocation2 + $0x60] sm:$0xff]  ;;  %v172_v22 = vld [vmem:[#allocation2 + $0x70] sm:$0xff] }
  0x99   :  { %8612 = vst [vmem:[#allocation26_spill] sm:$0xff] %v7522_v14  ;;  %v175_v23 = vld [vmem:[#allocation2 + $0x88] sm:$0xff]  ;;  %v177_v24 = vld [vmem:[#allocation2 + $0x98] sm:$0xff]  ;;  %v7531_v25 = vpack.c.bf16 %v172_v22, %v170_v21  ;;  %v174_v26 = vld [vmem:[#allocation2 + $0x80] sm:$0xff] }
  0x9a   :  { %8613 = vst [vmem:[#allocation27_spill] sm:$0xff] %v7525_v19  ;;  %8614 = vst [vmem:[#allocation28_spill] sm:$0xff] %v7528_v20  ;;  %v176_v27 = vld [vmem:[#allocation2 + $0x90] sm:$0xff]  ;;  %v7534_v28 = vpack.c.bf16 %v177_v24, %v175_v23  ;;  %v179_v29 = vld [vmem:[#allocation2 + $0xa8] sm:$0xff] }
  0x9b   :  { %5708 = vmatpush1.bf16.msra.mxu0 %v7519_v13  ;;  %8615 = vst [vmem:[#allocation29_spill] sm:$0xff] %v7531_v25  ;;  %v181_v30 = vld [vmem:[#allocation2 + $0xb8] sm:$0xff]  ;;  %v7539_v31 = vld [vmem:[%s8549_s0 + $0x8] sm:$0xff]  ;;  %v198_v34 = vld [vmem:[#allocation5] sm:$0xff]  ;;  %v7548_v39 = vpack.c.bf16 %v176_v27, %v174_v26 }
  0x9c   :  { %5710 = vmatprep.subr.bf16.mxu0 %v7522_v14  ;;  %8616 = vst [vmem:[#allocation30_spill] sm:$0xff] %v7534_v28  ;;  %5522 = vmatprep.mubr.msk.f32.mxu0 %vm240_vm0, %v7539_v31  ;;  %v199_v32 = vld [vmem:[#allocation5 + $0x8] sm:$0xff]  ;;  %v201_v33 = vld [vmem:[#allocation5 + $0x18] sm:$0xff]  ;;  %v200_v36 = vld [vmem:[#allocation5 + $0x10] sm:$0xff]  ;;  %v7555_v45 = vpack.c.bf16 %v181_v30, %v179_v29 }
  0x9d   :  { %5523 = vmatprep.mubr.msk.f32.mxu1 %vm240_vm0, %v7539_v31  ;;  %v7545_v35 = vpack.c.bf16 %v201_v33, %v199_v32  ;;  %v203_v37 = vld [vmem:[#allocation5 + $0x28] sm:$0xff]  ;;  %v205_v38 = vld [vmem:[#allocation5 + $0x38] sm:$0xff]  ;;  %8618 = vst [vmem:[#allocation32_spill] sm:$0xff] %v7548_v39  ;;  %v7550_v40 = vpack.c.bf16 %v200_v36, %v198_v34  ;;  %v202_v42 = vld [vmem:[#allocation5 + $0x20] sm:$0xff] }
  0x9e   :  { %v7552_v41 = vpack.c.bf16 %v205_v38, %v203_v37  ;;  %v204_v43 = vld [vmem:[#allocation5 + $0x30] sm:$0xff]  ;;  %v207_v44 = vld [vmem:[#allocation5 + $0x48] sm:$0xff]  ;;  %8619 = vst [vmem:[#allocation33_spill] sm:$0xff] %v7555_v45  ;;  %v178_v46 = vld [vmem:[#allocation2 + $0xa0] sm:$0xff] }
  0x9f   :  { %5712 = vmatpush1.bf16.msra.mxu0 %v7525_v19  ;;  %8617 = vst [vmem:[#allocation31_spill] sm:$0xff] %v7545_v35  ;;  %v180_v47 = vld [vmem:[#allocation2 + $0xb0] sm:$0xff]  ;;  %5742 = vmatprep.subr.bf16.mxu1 %v7545_v35  ;;  %v209_v48 = vld [vmem:[#allocation5 + $0x58] sm:$0xff]  ;;  %v183_v49 = vld [vmem:[#allocation2 + $0xc8] sm:$0xff]  ;;  %v7559_v51 = vpack.c.bf16 %v204_v43, %v202_v42 }
  0xa0   :  { %5714 = vmatprep.subr.bf16.mxu0 %v7528_v20  ;;  %v185_v50 = vld [vmem:[#allocation2 + $0xd8] sm:$0xff]  ;;  %5744 = vmatpush1.bf16.msra.mxu1 %v7550_v40  ;;  %v7562_v52 = vpack.c.bf16 %v209_v48, %v207_v44  ;;  %v206_v53 = vld [vmem:[#allocation5 + $0x40] sm:$0xff]  ;;  %v208_v54 = vld [vmem:[#allocation5 + $0x50] sm:$0xff]  ;;  %v7565_v55 = vpack.c.bf16 %v180_v47, %v178_v46 }
  0xa1   :  { %5746 = vmatprep.subr.bf16.mxu1 %v7552_v41  ;;  %v211_v56 = vld [vmem:[#allocation5 + $0x68] sm:$0xff]  ;;  %v213_v57 = vld [vmem:[#allocation5 + $0x78] sm:$0xff]  ;;  %v7568_v58 = vpack.c.bf16 %v185_v50, %v183_v49  ;;  %v182_v59 = vld [vmem:[#allocation2 + $0xc0] sm:$0xff]  ;;  %v7571_v63 = vpack.c.bf16 %v208_v54, %v206_v53 }
  0xa2   :  { %8620 = vst [vmem:[#allocation34_spill] sm:$0xff] %v7565_v55  ;;  %v184_v60 = vld [vmem:[#allocation2 + $0xd0] sm:$0xff]  ;;  %v187_v61 = vld [vmem:[#allocation2 + $0xe8] sm:$0xff]  ;;  %v189_v62 = vld [vmem:[#allocation2 + $0xf8] sm:$0xff]  ;;  %v7574_v0 = vpack.c.bf16 %v213_v57, %v211_v56 }
  0xa3   :  { %5716 = vmatpush1.bf16.msra.mxu0 %v7531_v25  ;;  %8621 = vst [vmem:[#allocation35_spill] sm:$0xff] %v7568_v58  ;;  %v210_v1 = vld [vmem:[#allocation5 + $0x60] sm:$0xff]  ;;  %v212_v2 = vld [vmem:[#allocation5 + $0x70] sm:$0xff]  ;;  %v7577_v4 = vpack.c.bf16 %v184_v60, %v182_v59  ;;  %v215_v5 = vld [vmem:[#allocation5 + $0x88] sm:$0xff]  ;;  %v7580_v9 = vpack.c.bf16 %v189_v62, %v187_v61 }
  0xa4   :  { %5718 = vmatprep.subr.bf16.mxu0 %v7534_v28  ;;  %5748 = vmatpush1.bf16.msra.mxu1 %v7559_v51  ;;  %v217_v6 = vld [vmem:[#allocation5 + $0x98] sm:$0xff]  ;;  %v186_v10 = vld [vmem:[#allocation2 + $0xe0] sm:$0xff]  ;;  %v188_v11 = vld [vmem:[#allocation2 + $0xf0] sm:$0xff]  ;;  %v7583_v16 = vpack.c.bf16 %v212_v2, %v210_v1 }
  0xa5   :  { %5750 = vmatprep.subr.bf16.mxu1 %v7562_v52  ;;  %8622 = vst [vmem:[#allocation36_spill] sm:$0xff] %v7577_v4  ;;  %8623 = vst [vmem:[#allocation37_spill] sm:$0xff] %v7580_v9  ;;  %v191_v12 = vld [vmem:[#allocation2 + $0x108] sm:$0xff]  ;;  %v193_v15 = vld [vmem:[#allocation2 + $0x118] sm:$0xff]  ;;  %v7586_v17 = vpack.c.bf16 %v217_v6, %v215_v5  ;;  %v7589_v22 = vpack.c.bf16 %v188_v11, %v186_v10 }
  0xa6   :  { %v214_v18 = vld [vmem:[#allocation5 + $0x80] sm:$0xff]  ;;  %v216_v21 = vld [vmem:[#allocation5 + $0x90] sm:$0xff]  ;;  %v219_v23 = vld [vmem:[#allocation5 + $0xa8] sm:$0xff]  ;;  %v7592_v26 = vpack.c.bf16 %v193_v15, %v191_v12 }
  0xa7   :  { %5720 = vmatpush1.bf16.msra.mxu0 %v7548_v39  ;;  %8624 = vst [vmem:[#allocation38_spill] sm:$0xff] %v7589_v22  ;;  %v221_v24 = vld [vmem:[#allocation5 + $0xb8] sm:$0xff]  ;;  %v190_v27 = vld [vmem:[#allocation2 + $0x100] sm:$0xff]  ;;  %v192_v29 = vld [vmem:[#allocation2 + $0x110] sm:$0xff]  ;;  %v7595_v33 = vpack.c.bf16 %v216_v21, %v214_v18  ;;  %v8566_v21 = vmov 0.0  }
  0xa8   :  { %5722 = vmatprep.subr.bf16.mxu0 %v7555_v45  ;;  %5752 = vmatpush1.bf16.msra.mxu1 %v7571_v63  ;;  %8625 = vst [vmem:[#allocation39_spill] sm:$0xff] %v7592_v26  ;;  %v195_v30 = vld [vmem:[#allocation2 + $0x128] sm:$0xff]  ;;  %v197_v32 = vld [vmem:[#allocation2 + $0x138] sm:$0xff]  ;;  %v7598_v34 = vpack.c.bf16 %v221_v24, %v219_v23  ;;  %v218_v36 = vld [vmem:[#allocation5 + $0xa0] sm:$0xff]  ;;  %v7601_v38 = vpack.c.bf16 %v192_v29, %v190_v27 }
  0xa9   :  { %5754 = vmatprep.subr.bf16.mxu1 %v7574_v0  ;;  %v220_v37 = vld [vmem:[#allocation5 + $0xb0] sm:$0xff]  ;;  %v223_v42 = vld [vmem:[#allocation5 + $0xc8] sm:$0xff]  ;;  %v225_v43 = vld [vmem:[#allocation5 + $0xd8] sm:$0xff]  ;;  %v7604_v44 = vpack.c.bf16 %v197_v32, %v195_v30 }
  0xaa   :  { %8626 = vst [vmem:[#allocation40_spill] sm:$0xff] %v7601_v38  ;;  %v194_v46 = vld [vmem:[#allocation2 + $0x120] sm:$0xff]  ;;  %v196_v47 = vld [vmem:[#allocation2 + $0x130] sm:$0xff]  ;;  %v7607_v48 = vpack.c.bf16 %v220_v37, %v218_v36  ;;  %v7610_v49 = vpack.c.bf16 %v225_v43, %v223_v42  ;;  %v227_v56 = vld [vmem:[#allocation5 + $0xe8] sm:$0xff] }
  0xab   :  { %5724 = vmatpush1.bf16.msra.mxu0 %v7565_v55  ;;  %8627 = vst [vmem:[#allocation41_spill] sm:$0xff] %v7604_v44  ;;  %v222_v50 = vld [vmem:[#allocation5 + $0xc0] sm:$0xff]  ;;  %v224_v53 = vld [vmem:[#allocation5 + $0xd0] sm:$0xff]  ;;  %v7613_v54 = vpack.c.bf16 %v196_v47, %v194_v46  ;;  %v229_v57 = vld [vmem:[#allocation5 + $0xf8] sm:$0xff] }
  0xac   :  { %5726 = vmatprep.subr.bf16.mxu0 %v7568_v58  ;;  %5756 = vmatpush1.bf16.msra.mxu1 %v7583_v16  ;;  %v7617_v59 = vpack.c.bf16 %v224_v53, %v222_v50  ;;  %v7620_v60 = vpack.c.bf16 %v229_v57, %v227_v56  ;;  %v226_v61 = vld [vmem:[#allocation5 + $0xe0] sm:$0xff]  ;;  %v228_v62 = vld [vmem:[#allocation5 + $0xf0] sm:$0xff]  ;;  %v231_v2 = vld [vmem:[#allocation5 + $0x108] sm:$0xff] }
  0xad   :  { %5758 = vmatprep.subr.bf16.mxu1 %v7586_v17  ;;  %8628 = vst [vmem:[#allocation42_spill] sm:$0xff] %v7613_v54  ;;  %v238_v1 = vld [vmem:[%s8549_s0] sm:$0xff]  ;;  %v233_v5 = vld [vmem:[#allocation5 + $0x118] sm:$0xff]  ;;  %v7628_v6 = vpack.c.bf16 %v228_v62, %v226_v61  ;;  %v232_v12 = vld [vmem:[#allocation5 + $0x110] sm:$0xff] }
  0xae   :  { %v7631_v10 = vpack.c.bf16 %v233_v5, %v231_v2  ;;  %v230_v11 = vld [vmem:[#allocation5 + $0x100] sm:$0xff]  ;;  %v235_v15 = vld [vmem:[#allocation5 + $0x128] sm:$0xff]  ;;  %v237_v18 = vld [vmem:[#allocation5 + $0x138] sm:$0xff]  ;;  %v7314_v5 = vmov 0  }
  0xaf   :  { %5728 = vmatpush1.bf16.msra.mxu0 %v7577_v4  ;;  %v7638_v23 = vpack.c.bf16 %v232_v12, %v230_v11  ;;  %v7641_v24 = vpack.c.bf16 %v237_v18, %v235_v15  ;;  %v234_v27 = vld [vmem:[#allocation5 + $0x120] sm:$0xff]  ;;  %v236_v29 = vld [vmem:[#allocation5 + $0x130] sm:$0xff]  ;;  %v5525_v30 = vld [vmem:[%s8552_s3 + $0x88] sm:$0xff]  ;;  %7087 = vset.pattern.permute.xlu0 %v7314_v5 }
  0xb0   :  { %5730 = vmatprep.subr.bf16.mxu0 %v7580_v9  ;;  %5760 = vmatpush1.bf16.msra.mxu1 %v7595_v33  ;;  %v7649_v32 = vpack.c.bf16 %v236_v29, %v234_v27  ;;  %v5526_v36 = vld [vmem:[%s8552_s3 + $0x90] sm:$0xff]  ;;  %v5527_v37 = vld [vmem:[%s8552_s3 + $0x98] sm:$0xff]  ;;  %v5528_v42 = vld [vmem:[%s8552_s3 + $0xa0] sm:$0xff] }
  0xb1   :  { %5762 = vmatprep.subr.bf16.mxu1 %v7598_v34  ;;  %v5529_v43 = vld [vmem:[%s8552_s3 + $0xa8] sm:$0xff]  ;;  %v5530_v46 = vld [vmem:[%s8552_s3 + $0xb0] sm:$0xff]  ;;  %v5531_v47 = vld [vmem:[%s8552_s3 + $0xb8] sm:$0xff]  ;;  %7088 = vset.pattern.permute.xlu1 %v7314_v5 }
  0xb2   :  { %v5532_v50 = vld [vmem:[%s8552_s3 + $0xc0] sm:$0xff]  ;;  %v5533_v53 = vld [vmem:[%s8552_s3 + $0xc8] sm:$0xff]  ;;  %v5534_v56 = vld [vmem:[%s8552_s3 + $0xd0] sm:$0xff] }
  0xb3   :  { %5732 = vmatpush1.bf16.msra.mxu0 %v7589_v22  ;;  %v5535_v57 = vld [vmem:[%s8552_s3 + $0xd8] sm:$0xff]  ;;  %v5536_v61 = vld [vmem:[%s8552_s3 + $0xe0] sm:$0xff]  ;;  %v5537_v62 = vld [vmem:[%s8552_s3 + $0xe8] sm:$0xff] }
  0xb4   :  { %5734 = vmatprep.subr.bf16.mxu0 %v7592_v26  ;;  %5764 = vmatpush1.bf16.msra.mxu1 %v7607_v48  ;;  %v5539_v2 = vld [vmem:[%s8552_s3 + $0xf8] sm:$0xff]  ;;  %v1096_v11 = vld [vmem:[%s8553_s4] sm:$0xff]  ;;  %v1097_v12 = vld [vmem:[%s8553_s4 + $0x8] sm:$0xff] }
  0xb5   :  { %5766 = vmatprep.subr.bf16.mxu1 %v7610_v49  ;;  %1114 = vperm.xlu0 %7087, %v1096_v11   ;;  %v1100_v15 = vld [vmem:[%s8553_s4 + $0x20] sm:$0xff]  ;;  %v1098_v18 = vld [vmem:[%s8553_s4 + $0x10] sm:$0xff]  ;;  %v1099_v27 = vld [vmem:[%s8553_s4 + $0x18] sm:$0xff] }
  0xb6   :  { %1124 = vperm.xlu1 %7088, %v1098_v18   ;;  %v1104_v29 = vld [vmem:[%s8553_s4 + $0x40] sm:$0xff]  ;;  %v387_v5 = vld [vmem:[%s8552_s3 + $0x8] sm:$0xff]  ;;  %v2010_v18 = vld [vmem:[%s8555_s6 + $0x18] sm:$0xff] }
  0xb7   :  { %5736 = vmatpush1.bf16.msra.mxu0 %v7601_v38  ;;  %v2008_v11 = vld [vmem:[%s8555_s6 + $0x8] sm:$0xff] }
  0xb8   :  { %5738 = vmatprep.subr.bf16.mxu0 %v7604_v44  ;;  %5768 = vmatpush1.bf16.msra.mxu1 %v7617_v59 }
  0xb9   :  { %5770 = vmatprep.subr.bf16.mxu1 %v7620_v60  ;;  %1119 = vperm.xlu0 %7087, %v1097_v12   ;;  %v2013_v12 = vld [vmem:[%s8555_s6 + $0x30] sm:$0xff] }
  0xba   :  { %1129 = vperm.xlu1 %7088, %v1099_v27   ;;  %v389_v27 = vld [vmem:[%s8552_s3 + $0x18] sm:$0xff] }
  0xbb   :  { %5740 = vmatpush1.bf16.msra.mxu0 %v7613_v54 }
  0xbc   :  { %468 = vmatprep.subr.mxu0 %v7539_v31  ;;  %v5524_v31 = vld [vmem:[%s8552_s3 + $0x80] sm:$0xff]  ;;  %5772 = vmatpush1.bf16.msra.mxu1 %v7628_v6 }
  0xbd   :  { %5774 = vmatprep.subr.bf16.mxu1 %v7631_v10  ;;  %1134 = vperm.xlu0 %7087, %v1100_v15   ;;  %v388_v15 = vld [vmem:[%s8552_s3 + $0x10] sm:$0xff] }
  0xbe   :  { %309 = vmatmul.mubr.f32.vlgmr.msra.gmra.mrb[0].mxu0 %v238_v1 }
  0xbf   :  { %469 = vmatpush1.msra.mxu0 %v238_v1  ;;  %532 = vmatprep.mubr.f32.mxu0 %v8566_v21 }
  0xc0   :  { %5776 = vmatpush1.bf16.msra.mxu1 %v7638_v23 }
  0xc1   :  { %5778 = vmatprep.subr.bf16.mxu1 %v7641_v24 }
  0xc2   :  { %5540 = vmatmul.mubr.msk.f32.vlgmr.msra.gmra.mrb[2].mxu0 %vm419_vm1, %v5524_v31  ;;  %v1102_v31 = vld [vmem:[%s8553_s4 + $0x30] sm:$0xff] }
  0xc3   :  { %538 = vmatprep.mubr.f32.mxu0 %v8566_v21  ;;  %1144 = vperm.xlu0 %7087, %v1102_v31   ;;  %v2663_v31 = vld [vmem:[%s8557_s8] sm:$0xff] }
  0xc4   :  { %5780 = vmatpush1.bf16.msra.mxu1 %v7649_v32 }
  0xc5   :  { %5782 = vmatprep.subr.bf16.mxu1 %v7511_v3 }
  0xc6   :  { %5541 = vmatmul.mubr.msk.f32.gmra.mrb[4].mxu0 %vm419_vm1, %v5525_v30  ;;  %v1101_v30 = vld [vmem:[%s8553_s4 + $0x28] sm:$0xff] }
  0xc7   :  { %544 = vmatprep.mubr.f32.mxu0 %v8566_v21  ;;  %380 = vmatmul.mubr.f32.vlgmr.msra.gmra.mrb[0].mxu1 %v238_v1  ;;  %v5538_v1 = vld [vmem:[%s8552_s3 + $0xf0] sm:$0xff] }
  0xc8   :  { %5784 = vmatpush1.bf16.msra.mxu1 %v7513_v7  ;;  %1154 = vperm.xlu0 %7087, %v1104_v29  }
  0xc9   :  { %5786 = vmatprep.subr.bf16.mxu1 %v7515_v8  ;;  %1139 = vperm.xlu1 %7088, %v1101_v30  }
  0xca   :  { %5542 = vmatmul.mubr.msk.f32.gmra.mrb[6].mxu0 %vm419_vm1, %v5526_v36  ;;  %v1106_v36 = vld [vmem:[%s8553_s4 + $0x50] sm:$0xff] }
  0xcb   :  { %550 = vmatprep.mubr.f32.mxu0 %v8566_v21 }
  0xcc   :  { %5788 = vmatpush1.bf16.msra.mxu1 %v7519_v13  ;;  %1164 = vperm.xlu0 %7087, %v1106_v36   ;;  %v2012_v36 = vld [vmem:[%s8555_s6 + $0x28] sm:$0xff] }
  0xcd   :  { %5790 = vmatprep.subr.bf16.mxu1 %v7522_v14 }
  0xce   :  { %5543 = vmatmul.mubr.msk.f32.gmra.mrb[8].mxu0 %vm419_vm1, %v5527_v37  ;;  %v1103_v37 = vld [vmem:[%s8553_s4 + $0x38] sm:$0xff] }
  0xcf   :  { %556 = vmatprep.mubr.f32.mxu0 %v8566_v21  ;;  %1149 = vperm.xlu1 %7088, %v1103_v37   ;;  %v2665_v37 = vld [vmem:[%s8557_s8 + $0x10] sm:$0xff] }
  0xd0   :  { %5792 = vmatpush1.bf16.msra.mxu1 %v7525_v19 }
  0xd1   :  { %5794 = vmatprep.subr.bf16.mxu1 %v7528_v20 }
  0xd2   :  { %5544 = vmatmul.mubr.msk.f32.gmra.mrb[10].mxu0 %vm419_vm1, %v5528_v42  ;;  %v1108_v42 = vld [vmem:[%s8553_s4 + $0x60] sm:$0xff] }
  0xd3   :  { %562 = vmatprep.mubr.f32.mxu0 %v8566_v21  ;;  %1174 = vperm.xlu0 %7087, %v1108_v42   ;;  %v390_v42 = vld [vmem:[%s8552_s3 + $0x20] sm:$0xff] }
  0xd4   :  { %5796 = vmatpush1.bf16.msra.mxu1 %v7531_v25 }
  0xd5   :  { %5798 = vmatprep.subr.bf16.mxu1 %v7534_v28 }
  0xd6   :  { %5545 = vmatmul.mubr.msk.f32.gmra.mrb[12].mxu0 %vm419_vm1, %v5529_v43  ;;  %v1105_v43 = vld [vmem:[%s8553_s4 + $0x48] sm:$0xff] }
  0xd7   :  { %568 = vmatprep.mubr.f32.mxu0 %v8566_v21  ;;  %1159 = vperm.xlu1 %7088, %v1105_v43   ;;  %v2014_v43 = vld [vmem:[%s8555_s6 + $0x38] sm:$0xff] }
  0xd8   :  { %5800 = vmatpush1.bf16.msra.mxu1 %v7548_v39 }
  0xd9   :  { %5802 = vmatprep.subr.bf16.mxu1 %v7555_v45 }
  0xda   :  { %5546 = vmatmul.mubr.msk.f32.gmra.mrb[14].mxu0 %vm419_vm1, %v5530_v46  ;;  %v1110_v46 = vld [vmem:[%s8553_s4 + $0x70] sm:$0xff] }
  0xdb   :  { %574 = vmatprep.mubr.f32.mxu0 %v8566_v21  ;;  %1184 = vperm.xlu0 %7087, %v1110_v46   ;;  %v3154_v46 = vld [vmem:[%s8559_s10] sm:$0xff] }
  0xdc   :  { %5804 = vmatpush1.bf16.msra.mxu1 %v7565_v55 }
  0xdd   :  { %5806 = vmatprep.subr.bf16.mxu1 %v7568_v58 }
  0xde   :  { %5547 = vmatmul.mubr.msk.f32.gmra.mrb[16].mxu0 %vm419_vm1, %v5531_v47  ;;  %v1107_v47 = vld [vmem:[%s8553_s4 + $0x58] sm:$0xff] }
  0xdf   :  { %580 = vmatprep.mubr.f32.mxu0 %v8566_v21  ;;  %1169 = vperm.xlu1 %7088, %v1107_v47   ;;  %v391_v47 = vld [vmem:[%s8552_s3 + $0x28] sm:$0xff] }
  0xe0   :  { %5808 = vmatpush1.bf16.msra.mxu1 %v7577_v4 }
  0xe1   :  { %5810 = vmatprep.subr.bf16.mxu1 %v7580_v9 }
  0xe2   :  { %5548 = vmatmul.mubr.msk.f32.gmra.mrb[18].mxu0 %vm419_vm1, %v5532_v50  ;;  %v2007_v50 = vld [vmem:[%s8555_s6] sm:$0xff] }
  0xe3   :  { %586 = vmatprep.mubr.f32.mxu0 %v8566_v21  ;;  %2017 = vperm.xlu0 %7087, %v2007_v50   ;;  %v2664_v50 = vld [vmem:[%s8557_s8 + $0x8] sm:$0xff] }
  0xe4   :  { %5812 = vmatpush1.bf16.msra.mxu1 %v7589_v22 }
  0xe5   :  { %5814 = vmatprep.subr.bf16.mxu1 %v7592_v26 }
  0xe6   :  { %5549 = vmatmul.mubr.msk.f32.gmra.mrb[20].mxu0 %vm419_vm1, %v5533_v53 }
  0xe7   :  { %592 = vmatprep.mubr.f32.mxu0 %v8566_v21 }
  0xe8   :  { %5816 = vmatpush1.bf16.msra.mxu1 %v7601_v38 }
  0xe9   :  { %5818 = vmatprep.subr.bf16.mxu1 %v7604_v44 }
  0xea   :  { %5550 = vmatmul.mubr.msk.f32.gmra.mrb[22].mxu0 %vm419_vm1, %v5534_v56  ;;  %v1109_v56 = vld [vmem:[%s8553_s4 + $0x68] sm:$0xff] }
  0xeb   :  { %598 = vmatprep.mubr.f32.mxu0 %v8566_v21  ;;  %1179 = vperm.xlu1 %7088, %v1109_v56   ;;  %v392_v56 = vld [vmem:[%s8552_s3 + $0x30] sm:$0xff] }
  0xec   :  { %5820 = vmatpush1.bf16.msra.mxu1 %v7613_v54 }
  0xed   :  { %5822 = vmatprep.subr.bf16.mxu1 %v7545_v35 }
  0xee   :  { %5551 = vmatmul.mubr.msk.f32.gmra.mrb[24].mxu0 %vm419_vm1, %v5535_v57  ;;  %v2009_v57 = vld [vmem:[%s8555_s6 + $0x10] sm:$0xff] }
  0xef   :  { %604 = vmatprep.mubr.f32.mxu0 %v8566_v21  ;;  %2027 = vperm.xlu0 %7087, %v2009_v57   ;;  %v2666_v57 = vld [vmem:[%s8557_s8 + $0x18] sm:$0xff] }
  0xf2   :  { %5552 = vmatmul.mubr.msk.f32.gmra.mrb[26].mxu0 %vm419_vm1, %v5536_v61 }
  0xf3   :  { %610 = vmatprep.mubr.f32.mxu0 %v8566_v21 }
  0xf6   :  { %5553 = vmatmul.mubr.msk.f32.gmra.mrb[28].mxu0 %vm419_vm1, %v5537_v62  ;;  %v386_v62 = vld [vmem:[%s8552_s3] sm:$0xff] }
  0xf7   :  { %616 = vmatprep.mubr.f32.mxu0 %v8566_v21 }
  0xfa   :  { %5554 = vmatmul.mubr.msk.f32.gmra.mrb[30].mxu0 %vm419_vm1, %v5538_v1  ;;  %v1111_v1 = vld [vmem:[%s8553_s4 + $0x78] sm:$0xff] }
  0xfb   :  { %622 = vmatprep.mubr.f32.mxu0 %v8566_v21  ;;  %1189 = vperm.xlu1 %7088, %v1111_v1   ;;  %v394_v1 = vld [vmem:[%s8552_s3 + $0x40] sm:$0xff] }
  0xfe   :  { %5555 = vmatmul.mubr.msk.f32.gmra.mrb[32].mxu0 %vm419_vm1, %v5539_v2  ;;  %v2011_v2 = vld [vmem:[%s8555_s6 + $0x20] sm:$0xff] }
  0xff   :  { %741 = vmatprep.mubr.f32.mxu0 %v8566_v21  ;;  %2037 = vperm.xlu0 %7087, %v2011_v2   ;;  %v395_v2 = vld [vmem:[%s8552_s3 + $0x48] sm:$0xff] }
 0x100   :  { %2022 = vperm.xlu1 %7088, %v2008_v11   ;;  %v397_v11 = vld [vmem:[%s8552_s3 + $0x58] sm:$0xff] }
 0x103   :  { %2047 = vperm.xlu0 %7087, %v2013_v12   ;;  %v398_v12 = vld [vmem:[%s8552_s3 + $0x60] sm:$0xff] }
 0x104   :  { %2032 = vperm.xlu1 %7088, %v2010_v18   ;;  %v400_v18 = vld [vmem:[%s8552_s3 + $0x70] sm:$0xff] }
 0x107   :  { %2669 = vperm.xlu0 %7087, %v2663_v31   ;;  %v401_v31 = vld [vmem:[%s8552_s3 + $0x78] sm:$0xff] }
 0x108   :  { %2042 = vperm.xlu1 %7088, %v2012_v36   ;;  %v5575_v36 = vld [vmem:[%s8552_s3 + $0x118] sm:$0xff] }
 0x10b   :  { %2679 = vperm.xlu0 %7087, %v2665_v37   ;;  %v5576_v37 = vld [vmem:[%s8552_s3 + $0x120] sm:$0xff] }
 0x10c   :  { %2052 = vperm.xlu1 %7088, %v2014_v43   ;;  %v5578_v43 = vld [vmem:[%s8552_s3 + $0x130] sm:$0xff] }
 0x10f   :  { %3158 = vperm.xlu0 %7087, %v3154_v46   ;;  %v5579_v46 = vld [vmem:[%s8552_s3 + $0x138] sm:$0xff] }
 0x110   :  { %2674 = vperm.xlu1 %7088, %v2664_v50   ;;  %v5581_v50 = vld [vmem:[%s8552_s3 + $0x148] sm:$0xff] }
 0x114   :  { %2684 = vperm.xlu1 %7088, %v2666_v57   ;;  %v5584_v57 = vld [vmem:[%s8552_s3 + $0x160] sm:$0xff] }
 0x191   :  { %v310_v53 = vpop.f32.mrb[0].mxu0 }
 0x192   :  { %v312_v61 = vpop.f32.mrb[1].mxu0 }
 0x193   :  { %677 = vmatprep.subr.mxu0 %v312_v61  ;;  %v393_v61 = vld [vmem:[%s8552_s3 + $0x38] sm:$0xff] }
 0x194   :  { %678 = vmatpush1.msra.mxu0 %v310_v53  ;;  %v3564_v53 = vld [vmem:[%s8561_s12] sm:$0xff] }
 0x195   :  { %5556 = vmatmul.mubr.msk.f32.vlgmr.msra.gmra.mrb[2].mxu0 %vm419_vm1, %v386_v62  ;;  %3567 = vperm.xlu0 %7087, %v3564_v53   ;;  %v3155_v62 = vld [vmem:[%s8559_s10 + $0x8] sm:$0xff]  ;;  %v5582_v53 = vld [vmem:[%s8552_s3 + $0x150] sm:$0xff] }
 0x196   :  { %747 = vmatprep.mubr.f32.mxu0 %v8566_v21  ;;  %3163 = vperm.xlu1 %7088, %v3155_v62   ;;  %v5586_v62 = vld [vmem:[%s8552_s3 + $0x170] sm:$0xff] }
 0x199   :  { %5557 = vmatmul.mubr.msk.f32.gmra.mrb[4].mxu0 %vm419_vm1, %v387_v5  ;;  %v396_v5 = vld [vmem:[%s8552_s3 + $0x50] sm:$0xff] }
 0x19a   :  { %753 = vmatprep.mubr.f32.mxu0 %v8566_v21  ;;  %v381_v29 = vpop.f32.mrb[0].mxu1 }
 0x19b   :  { %v383_v30 = vpop.f32.mrb[1].mxu1 }
 0x19c   :  { %903 = vmatprep.subr.mxu0 %v383_v30  ;;  %v5574_v30 = vld [vmem:[%s8552_s3 + $0x110] sm:$0xff] }
 0x19d   :  { %5558 = vmatmul.mubr.msk.f32.gmra.mrb[6].mxu0 %vm419_vm1, %v388_v15  ;;  %v399_v15 = vld [vmem:[%s8552_s3 + $0x68] sm:$0xff] }
 0x19e   :  { %759 = vmatprep.mubr.f32.mxu0 %v8566_v21  ;;  %904 = vmatpush1.msra.mxu0 %v381_v29  ;;  %v5573_v29 = vld [vmem:[%s8552_s3 + $0x108] sm:$0xff] }
 0x19f   :  { %5958 = vmatprep.subr.bf16.mxu0 %v7511_v3 }
 0x1a1   :  { %5559 = vmatmul.mubr.msk.f32.gmra.mrb[8].mxu0 %vm419_vm1, %v389_v27  ;;  %v5572_v27 = vld [vmem:[%s8552_s3 + $0x100] sm:$0xff] }
 0x1a2   :  { %765 = vmatprep.mubr.f32.mxu0 %v8566_v21 }
 0x1a5   :  { %5560 = vmatmul.mubr.msk.f32.gmra.mrb[10].mxu0 %vm419_vm1, %v390_v42  ;;  %v5577_v42 = vld [vmem:[%s8552_s3 + $0x128] sm:$0xff] }
 0x1a6   :  { %771 = vmatprep.mubr.f32.mxu0 %v8566_v21 }
 0x1a9   :  { %5561 = vmatmul.mubr.msk.f32.gmra.mrb[12].mxu0 %vm419_vm1, %v391_v47  ;;  %v5580_v47 = vld [vmem:[%s8552_s3 + $0x140] sm:$0xff] }
 0x1aa   :  { %777 = vmatprep.mubr.f32.mxu0 %v8566_v21 }
 0x1ad   :  { %5562 = vmatmul.mubr.msk.f32.gmra.mrb[14].mxu0 %vm419_vm1, %v392_v56  ;;  %v5583_v56 = vld [vmem:[%s8552_s3 + $0x158] sm:$0xff] }
 0x1ae   :  { %783 = vmatprep.mubr.f32.mxu0 %v8566_v21 }
 0x1b1   :  { %5563 = vmatmul.mubr.msk.f32.gmra.mrb[16].mxu0 %vm419_vm1, %v393_v61  ;;  %v5585_v61 = vld [vmem:[%s8552_s3 + $0x168] sm:$0xff] }
 0x1b2   :  { %789 = vmatprep.mubr.f32.mxu0 %v8566_v21 }
 0x1b5   :  { %5564 = vmatmul.mubr.msk.f32.gmra.mrb[18].mxu0 %vm419_vm1, %v394_v1  ;;  %v5587_v1 = vld [vmem:[%s8552_s3 + $0x178] sm:$0xff]  ;;  %s7316_s3 = smov [#allocation16]  }
 0x1b6   :  { %795 = vmatprep.mubr.f32.mxu0 %v8566_v21  ;;  %s5509_s24 = sshll.u32 %s7316_s3, 4  ;;  %s5510_s24 = int_to_ptr.vmem [resolvable:$true] %s5509_s24 }
 0x1b7   :  { %s7265_s25 = scalar_lea.vmem %s5510_s24, 128  ;;  %p7270_p9 = scmp.lt.s32.totalorder %s5510_s24, %s5510_s24 }
 0x1b8   :  { %p7266_p8 = scmp.ne.s32.totalorder %s5510_s24, %s7265_s25  ;;  %p7271_p10 = scmp.lt.s32.totalorder %s7265_s25, %s7265_s25 }
 0x1b9   :  { %5565 = vmatmul.mubr.msk.f32.gmra.mrb[20].mxu0 %vm419_vm1, %v395_v2  ;;  %v1115_v2 = vpop.permute.xlu0 %1114 }
 0x1ba   :  { %801 = vmatprep.mubr.f32.mxu0 %v8566_v21  ;;  %p7272_p11 = por %p7271_p10, %p7270_p9 }
 0x1bc   :  { %p7273_p12 = pnand %p7272_p11, %p7266_p8 }
 0x1bd   :  { %5566 = vmatmul.mubr.msk.f32.gmra.mrb[22].mxu0 %vm419_vm1, %v396_v5 }
 0x1be   :  { %807 = vmatprep.mubr.f32.mxu0 %v8566_v21 }
 0x1c1   :  { %5567 = vmatmul.mubr.msk.f32.gmra.mrb[24].mxu0 %vm419_vm1, %v397_v11 }
 0x1c2   :  { %813 = vmatprep.mubr.f32.mxu0 %v8566_v21 }
 0x1c5   :  { %5568 = vmatmul.mubr.msk.f32.gmra.mrb[26].mxu0 %vm419_vm1, %v398_v12 }
 0x1c6   :  { %819 = vmatprep.mubr.f32.mxu0 %v8566_v21 }
 0x1c9   :  { %5569 = vmatmul.mubr.msk.f32.gmra.mrb[28].mxu0 %vm419_vm1, %v399_v15 }
 0x1ca   :  { %825 = vmatprep.mubr.f32.mxu0 %v8566_v21 }
 0x1cd   :  { %5570 = vmatmul.mubr.msk.f32.gmra.mrb[30].mxu0 %vm419_vm1, %v400_v18 }
 0x1ce   :  { %831 = vmatprep.mubr.f32.mxu0 %v8566_v21 }
 0x1d1   :  { %5571 = vmatmul.mubr.msk.f32.gmra.mrb[32].mxu0 %vm419_vm1, %v401_v31  ;;  %v1120_v31 = vpop.permute.xlu0 %1119 }
 0x1d2   :  { %967 = vmatprep.mubr.f32.mxu0 %v8566_v21 }
 0x1d5   :  { %5588 = vmatmul.mubr.msk.f32.vlgmr.msra.gmra.mrb[2].mxu0 %vm419_vm1, %v5572_v27 }
 0x1d6   :  { %973 = vmatprep.mubr.f32.mxu0 %v8566_v21  ;;  %5960 = vmatpush1.bf16.msra.mxu0 %v7513_v7 }
 0x1d7   :  { %5962 = vmatprep.subr.bf16.mxu0 %v7515_v8 }
 0x1d9   :  { %5589 = vmatmul.mubr.msk.f32.gmra.mrb[4].mxu0 %vm419_vm1, %v5573_v29 }
 0x1da   :  { %979 = vmatprep.mubr.f32.mxu0 %v8566_v21  ;;  %5964 = vmatpush1.bf16.msra.mxu0 %v7519_v13 }
 0x1db   :  { %5966 = vmatprep.subr.bf16.mxu0 %v7522_v14 }
 0x1dd   :  { %5590 = vmatmul.mubr.msk.f32.gmra.mrb[6].mxu0 %vm419_vm1, %v5574_v30 }
 0x1de   :  { %985 = vmatprep.mubr.f32.mxu0 %v8566_v21  ;;  %5968 = vmatpush1.bf16.msra.mxu0 %v7525_v19 }
 0x1df   :  { %5970 = vmatprep.subr.bf16.mxu0 %v7528_v20 }
 0x1e1   :  { %5591 = vmatmul.mubr.msk.f32.gmra.mrb[8].mxu0 %vm419_vm1, %v5575_v36 }
 0x1e2   :  { %991 = vmatprep.mubr.f32.mxu0 %v8566_v21  ;;  %5972 = vmatpush1.bf16.msra.mxu0 %v7531_v25 }
 0x1e3   :  { %5974 = vmatprep.subr.bf16.mxu0 %v7534_v28 }
 0x1e5   :  { %5592 = vmatmul.mubr.msk.f32.gmra.mrb[10].mxu0 %vm419_vm1, %v5576_v37 }
 0x1e6   :  { %997 = vmatprep.mubr.f32.mxu0 %v8566_v21  ;;  %5976 = vmatpush1.bf16.msra.mxu0 %v7548_v39 }
 0x1e7   :  { %5978 = vmatprep.subr.bf16.mxu0 %v7555_v45 }
 0x1e9   :  { %5593 = vmatmul.mubr.msk.f32.gmra.mrb[12].mxu0 %vm419_vm1, %v5577_v42  ;;  %v1125_v42 = vpop.permute.xlu1 %1124 }
 0x1ea   :  { %1003 = vmatprep.mubr.f32.mxu0 %v8566_v21  ;;  %5980 = vmatpush1.bf16.msra.mxu0 %v7565_v55 }
 0x1eb   :  { %5982 = vmatprep.subr.bf16.mxu0 %v7568_v58 }
 0x1ed   :  { %5594 = vmatmul.mubr.msk.f32.gmra.mrb[14].mxu0 %vm419_vm1, %v5578_v43 }
 0x1ee   :  { %1009 = vmatprep.mubr.f32.mxu0 %v8566_v21  ;;  %5984 = vmatpush1.bf16.msra.mxu0 %v7577_v4 }
 0x1ef   :  { %5986 = vmatprep.subr.bf16.mxu0 %v7580_v9 }
 0x1f1   :  { %5595 = vmatmul.mubr.msk.f32.gmra.mrb[16].mxu0 %vm419_vm1, %v5579_v46 }
 0x1f2   :  { %1015 = vmatprep.mubr.f32.mxu0 %v8566_v21  ;;  %5988 = vmatpush1.bf16.msra.mxu0 %v7589_v22 }
 0x1f3   :  { %5990 = vmatprep.subr.bf16.mxu0 %v7592_v26 }
 0x1f5   :  { %5596 = vmatmul.mubr.msk.f32.gmra.mrb[18].mxu0 %vm419_vm1, %v5580_v47 }
 0x1f6   :  { %1021 = vmatprep.mubr.f32.mxu0 %v8566_v21  ;;  %5992 = vmatpush1.bf16.msra.mxu0 %v7601_v38 }
 0x1f7   :  { %5994 = vmatprep.subr.bf16.mxu0 %v7604_v44 }
 0x1f9   :  { %5597 = vmatmul.mubr.msk.f32.gmra.mrb[20].mxu0 %vm419_vm1, %v5581_v50 }
 0x1fa   :  { %1027 = vmatprep.mubr.f32.mxu0 %v8566_v21  ;;  %5996 = vmatpush1.bf16.msra.mxu0 %v7613_v54 }
 0x1fb   :  { %5998 = vmatprep.subr.bf16.mxu0 %v7545_v35 }
 0x1fd   :  { %5598 = vmatmul.mubr.msk.f32.gmra.mrb[22].mxu0 %vm419_vm1, %v5582_v53 }
 0x1fe   :  { %1033 = vmatprep.mubr.f32.mxu0 %v8566_v21 }
 0x201   :  { %5599 = vmatmul.mubr.msk.f32.gmra.mrb[24].mxu0 %vm419_vm1, %v5583_v56 }
 0x202   :  { %1039 = vmatprep.mubr.f32.mxu0 %v8566_v21 }
 0x205   :  { %5600 = vmatmul.mubr.msk.f32.gmra.mrb[26].mxu0 %vm419_vm1, %v5584_v57 }
 0x206   :  { %1045 = vmatprep.mubr.f32.mxu0 %v8566_v21 }
 0x209   :  { %5601 = vmatmul.mubr.msk.f32.gmra.mrb[28].mxu0 %vm419_vm1, %v5585_v61 }
 0x20a   :  { %1051 = vmatprep.mubr.f32.mxu0 %v8566_v21 }
 0x20d   :  { %5602 = vmatmul.mubr.msk.f32.gmra.mrb[30].mxu0 %vm419_vm1, %v5586_v62 }
 0x20e   :  { %1057 = vmatprep.mubr.f32.mxu0 %v8566_v21 }
 0x211   :  { %5603 = vmatmul.mubr.msk.f32.gmra.mrb[32].mxu0 %vm419_vm1, %v5587_v1  ;;  %v1130_v1 = vpop.permute.xlu1 %1129 }
 0x2a8   :  { %v969_v5 = vpop.f32.mrb[2].mxu0 }
 0x2a9   :  { %v1192_v11 = vadd.f32 %v1115_v2, %v969_v5  ;;  %v971_v12 = vpop.f32.mrb[3].mxu0 }
 0x2aa   :  { %v1193_v15 = vadd.f32 %v1115_v2, %v971_v12 }
 0x2ab   :  { %v8021_v29 = vmax.f32 %v1192_v11, 0.0 }
 0x2ac   :  { %v8019_v18 = vmax.f32 %v1193_v15, 0.0  ;;  %v975_v27 = vpop.f32.mrb[4].mxu0 }
 0x2ad   :  { %v1194_v30 = vadd.f32 %v1120_v31, %v975_v27  ;;  %v977_v36 = vpop.f32.mrb[5].mxu0  ;;  %v1135_v27 = vpop.permute.xlu0 %1134 }
 0x2ae   :  { %v1195_v37 = vadd.f32 %v1120_v31, %v977_v36  ;;  %5604 = vmatprep.mubr.msk.f32.mxu1 %vm240_vm0, %v8019_v18 }
 0x2af   :  { %v8025_v43 = vmax.f32 %v1194_v30, 0.0  ;;  %1369 = vmatmul.mubr.f32.vlgmr.msra.gmra.mrb[2].mxu1 %v8021_v29 }
 0x2b0   :  { %v8028_v46 = vmax.f32 %v1195_v37, 0.0  ;;  %5824 = vmatpush1.bf16.msra.mxu1 %v7550_v40  ;;  %v981_v47 = vpop.f32.mrb[6].mxu0 }
 0x2b1   :  { %v1196_v53 = vadd.f32 %v1125_v42, %v981_v47  ;;  %v983_v56 = vpop.f32.mrb[7].mxu0  ;;  %5826 = vmatprep.subr.bf16.mxu1 %v7552_v41 }
 0x2b2   :  { %v1197_v57 = vadd.f32 %v1125_v42, %v983_v56  ;;  %5605 = vmatprep.mubr.msk.f32.mxu1 %vm240_vm0, %v8028_v46 }
 0x2b3   :  { %1375 = vmatmul.mubr.f32.gmra.mrb[4].mxu1 %v8025_v43  ;;  %v8042_v5 = vmax.f32 %v1196_v53, 0.0 }
 0x2b4   :  { %v8039_v62 = vmax.f32 %v1197_v57, 0.0  ;;  %5828 = vmatpush1.bf16.msra.mxu1 %v7559_v51  ;;  %v987_v2 = vpop.f32.mrb[8].mxu0 }
 0x2b5   :  { %v1198_v11 = vadd.f32 %v1130_v1, %v987_v2  ;;  %v989_v12 = vpop.f32.mrb[9].mxu0  ;;  %5830 = vmatprep.subr.bf16.mxu1 %v7562_v52 }
 0x2b6   :  { %v1199_v15 = vadd.f32 %v1130_v1, %v989_v12  ;;  %5606 = vmatprep.mubr.msk.f32.mxu1 %vm240_vm0, %v8039_v62  ;;  %v1140_v1 = vpop.permute.xlu1 %1139 }
 0x2b7   :  { %v8047_v31 = vmax.f32 %v1198_v11, 0.0  ;;  %1381 = vmatmul.mubr.f32.gmra.mrb[6].mxu1 %v8042_v5 }
 0x2b8   :  { %v8050_v30 = vmax.f32 %v1199_v15, 0.0  ;;  %5832 = vmatpush1.bf16.msra.mxu1 %v7571_v63  ;;  %v993_v36 = vpop.f32.mrb[10].mxu0 }
 0x2b9   :  { %v1200_v42 = vadd.f32 %v1135_v27, %v993_v36  ;;  %v995_v47 = vpop.f32.mrb[11].mxu0  ;;  %5834 = vmatprep.subr.bf16.mxu1 %v7574_v0 }
 0x2ba   :  { %v1201_v53 = vadd.f32 %v1135_v27, %v995_v47  ;;  %5607 = vmatprep.mubr.msk.f32.mxu1 %vm240_vm0, %v8050_v30  ;;  %v1145_v47 = vpop.permute.xlu0 %1144 }
 0x2bb   :  { %1387 = vmatmul.mubr.f32.gmra.mrb[8].mxu1 %v8047_v31  ;;  %v8064_v11 = vmax.f32 %v1200_v42, 0.0 }
 0x2bc   :  { %v8061_v57 = vmax.f32 %v1201_v53, 0.0  ;;  %5836 = vmatpush1.bf16.msra.mxu1 %v7583_v16  ;;  %v999_v2 = vpop.f32.mrb[12].mxu0 }
 0x2bd   :  { %v1202_v12 = vadd.f32 %v1140_v1, %v999_v2  ;;  %v1001_v15 = vpop.f32.mrb[13].mxu0  ;;  %5838 = vmatprep.subr.bf16.mxu1 %v7586_v17 }
 0x2be   :  { %v1203_v27 = vadd.f32 %v1140_v1, %v1001_v15  ;;  %5608 = vmatprep.mubr.msk.f32.mxu1 %vm240_vm0, %v8061_v57  ;;  %v1150_v15 = vpop.permute.xlu1 %1149 }
 0x2bf   :  { %v8069_v36 = vmax.f32 %v1202_v12, 0.0  ;;  %1393 = vmatmul.mubr.f32.gmra.mrb[10].mxu1 %v8064_v11  ;;  %v1155_v12 = vpop.permute.xlu0 %1154 }
 0x2c0   :  { %v8072_v53 = vmax.f32 %v1203_v27, 0.0  ;;  %5840 = vmatpush1.bf16.msra.mxu1 %v7595_v33  ;;  %v1005_v21 = vpop.f32.mrb[14].mxu0 }
 0x2c1   :  { %v1204_v2 = vadd.f32 %v1145_v47, %v1005_v21  ;;  %v1007_v37 = vpop.f32.mrb[15].mxu0  ;;  %5842 = vmatprep.subr.bf16.mxu1 %v7598_v34 }
 0x2c2   :  { %v1205_v1 = vadd.f32 %v1145_v47, %v1007_v37  ;;  %5609 = vmatprep.mubr.msk.f32.mxu1 %vm240_vm0, %v8072_v53 }
 0x2c3   :  { %1399 = vmatmul.mubr.f32.gmra.mrb[12].mxu1 %v8069_v36  ;;  %v8086_v42 = vmax.f32 %v1204_v2, 0.0 }
 0x2c4   :  { %v8083_v27 = vmax.f32 %v1205_v1, 0.0  ;;  %5844 = vmatpush1.bf16.msra.mxu1 %v7607_v48  ;;  %v1011_v56 = vpop.f32.mrb[16].mxu0 }
 0x2c5   :  { %v1206_v21 = vadd.f32 %v1150_v15, %v1011_v56  ;;  %v1013_v50 = vpop.f32.mrb[17].mxu0  ;;  %5846 = vmatprep.subr.bf16.mxu1 %v7610_v49 }
 0x2c6   :  { %v1207_v37 = vadd.f32 %v1150_v15, %v1013_v50  ;;  %5610 = vmatprep.mubr.msk.f32.mxu1 %vm240_vm0, %v8083_v27  ;;  %v1165_v15 = vpop.permute.xlu0 %1164 }
 0x2c7   :  { %v8091_v47 = vmax.f32 %v1206_v21, 0.0  ;;  %1405 = vmatmul.mubr.f32.gmra.mrb[14].mxu1 %v8086_v42  ;;  %v1160_v21 = vpop.permute.xlu1 %1159 }
 0x2c8   :  { %v8094_v1 = vmax.f32 %v1207_v37, 0.0  ;;  %5848 = vmatpush1.bf16.msra.mxu1 %v7617_v59  ;;  %v1017_v61 = vpop.f32.mrb[18].mxu0 }
 0x2c9   :  { %v1208_v2 = vadd.f32 %v1155_v12, %v1017_v61  ;;  %v1019_v35 = vpop.f32.mrb[19].mxu0  ;;  %5850 = vmatprep.subr.bf16.mxu1 %v7620_v60 }
 0x2ca   :  { %v1209_v50 = vadd.f32 %v1155_v12, %v1019_v35  ;;  %5611 = vmatprep.mubr.msk.f32.mxu1 %vm240_vm0, %v8094_v1 }
 0x2cb   :  { %1411 = vmatmul.mubr.f32.gmra.mrb[16].mxu1 %v8091_v47  ;;  %v8108_v56 = vmax.f32 %v1208_v2, 0.0 }
 0x2cc   :  { %v8105_v37 = vmax.f32 %v1209_v50, 0.0  ;;  %5852 = vmatpush1.bf16.msra.mxu1 %v7628_v6  ;;  %v1023_v54 = vpop.f32.mrb[20].mxu0 }
 0x2cd   :  { %v1210_v61 = vadd.f32 %v1160_v21, %v1023_v54  ;;  %v1025_v44 = vpop.f32.mrb[21].mxu0  ;;  %5854 = vmatprep.subr.bf16.mxu1 %v7631_v10 }
 0x2ce   :  { %v1211_v35 = vadd.f32 %v1160_v21, %v1025_v44  ;;  %5612 = vmatprep.mubr.msk.f32.mxu1 %vm240_vm0, %v8105_v37 }
 0x2cf   :  { %v8113_v12 = vmax.f32 %v1210_v61, 0.0  ;;  %1417 = vmatmul.mubr.f32.gmra.mrb[18].mxu1 %v8108_v56  ;;  %v1170_v61 = vpop.permute.xlu1 %1169 }
 0x2d0   :  { %v8116_v50 = vmax.f32 %v1211_v35, 0.0  ;;  %5856 = vmatpush1.bf16.msra.mxu1 %v7638_v23  ;;  %v1029_v38 = vpop.f32.mrb[22].mxu0 }
 0x2d1   :  { %v1212_v2 = vadd.f32 %v1165_v15, %v1029_v38  ;;  %v1031_v26 = vpop.f32.mrb[23].mxu0  ;;  %5858 = vmatprep.subr.bf16.mxu1 %v7641_v24 }
 0x2d2   :  { %v1213_v44 = vadd.f32 %v1165_v15, %v1031_v26  ;;  %5613 = vmatprep.mubr.msk.f32.mxu1 %vm240_vm0, %v8116_v50  ;;  %v8629_v26 = vpack.c.bf16 %v8028_v46, %v8019_v18 }
 0x2d3   :  { %1423 = vmatmul.mubr.f32.gmra.mrb[20].mxu1 %v8113_v12  ;;  %v8130_v54 = vmax.f32 %v1212_v2, 0.0 }
 0x2d4   :  { %v8127_v35 = vmax.f32 %v1213_v44, 0.0  ;;  %5860 = vmatpush1.bf16.msra.mxu1 %v7649_v32  ;;  %v1035_v22 = vpop.f32.mrb[24].mxu0  ;;  %v1175_v44 = vpop.permute.xlu0 %1174 }
 0x2d5   :  { %v1214_v38 = vadd.f32 %v1170_v61, %v1035_v22  ;;  %5862 = vmatprep.subr.bf16.mxu1 %v8629_v26  ;;  %v1037_v15 = vpop.f32.mrb[25].mxu0 }
 0x2d6   :  { %v1215_v9 = vadd.f32 %v1170_v61, %v1037_v15  ;;  %5614 = vmatprep.mubr.msk.f32.mxu1 %vm240_vm0, %v8127_v35 }
 0x2d7   :  { %v8137_v21 = vmax.f32 %v1214_v38, 0.0  ;;  %1429 = vmatmul.mubr.f32.gmra.mrb[22].mxu1 %v8130_v54  ;;  %v1180_v38 = vpop.permute.xlu1 %1179 }
 0x2d8   :  { %v8140_v4 = vmax.f32 %v1215_v9, 0.0  ;;  %v1041_v58 = vpop.f32.mrb[26].mxu0 }
 0x2d9   :  { %v1216_v2 = vadd.f32 %v1175_v44, %v1041_v58  ;;  %v1043_v55 = vpop.f32.mrb[27].mxu0  ;;  %v1185_v58 = vpop.permute.xlu0 %1184 }
 0x2da   :  { %v1217_v45 = vadd.f32 %v1175_v44, %v1043_v55  ;;  %5615 = vmatprep.mubr.msk.f32.mxu1 %vm240_vm0, %v8140_v4  ;;  %v5881_v61 = vpack.c.bf16 %v8140_v4, %v8127_v35 }
 0x2db   :  { %1435 = vmatmul.mubr.f32.gmra.mrb[24].mxu1 %v8137_v21  ;;  %v8151_v15 = vmax.f32 %v1216_v2, 0.0 }
 0x2dc   :  { %v8149_v26 = vmax.f32 %v1217_v45, 0.0  ;;  %v1047_v9 = vpop.f32.mrb[28].mxu0 }
 0x2dd   :  { %v1218_v39 = vadd.f32 %v1180_v38, %v1047_v9  ;;  %v1049_v28 = vpop.f32.mrb[29].mxu0 }
 0x2de   :  { %v1219_v22 = vadd.f32 %v1180_v38, %v1049_v28  ;;  %5616 = vmatprep.mubr.msk.f32.mxu1 %vm240_vm0, %v8149_v26 }
 0x2df   :  { %v8155_v55 = vmax.f32 %v1218_v39, 0.0  ;;  %1441 = vmatmul.mubr.f32.gmra.mrb[26].mxu1 %v8151_v15  ;;  %v1190_v39 = vpop.permute.xlu1 %1189 }
 0x2e0   :  { %v8158_v44 = vmax.f32 %v1219_v22, 0.0  ;;  %v1053_v25 = vpop.f32.mrb[30].mxu0 }
 0x2e1   :  { %v5887_v45 = vpack.c.bf16 %v8155_v55, %v8151_v15  ;;  %v1220_v20 = vadd.f32 %v1185_v58, %v1053_v25  ;;  %v1055_v2 = vpop.f32.mrb[31].mxu0 }
 0x2e2   :  { %v1221_v19 = vadd.f32 %v1185_v58, %v1055_v2  ;;  %5617 = vmatprep.mubr.msk.f32.mxu1 %vm240_vm0, %v8158_v44  ;;  %v5885_v28 = vpack.c.bf16 %v8158_v44, %v8149_v26 }
 0x2e3   :  { %1447 = vmatmul.mubr.f32.gmra.mrb[28].mxu1 %v8155_v55  ;;  %v1252_v22 = vmax.f32 %v1220_v20, 0.0  ;;  %v8634_v20 = vpack.c.bf16 %v8069_v36, %v8064_v11 }
 0x2e4   :  { %v1253_v38 = vmax.f32 %v1221_v19, 0.0  ;;  %v1059_v9 = vpop.f32.mrb[32].mxu0  ;;  %v8630_v19 = vpack.c.bf16 %v8025_v43, %v8021_v29 }
 0x2e5   :  { %v1222_v14 = vadd.f32 %v1190_v39, %v1059_v9  ;;  %v1061_v13 = vpop.f32.mrb[33].mxu0 }
 0x2e6   :  { %v1223_v8 = vadd.f32 %v1190_v39, %v1061_v13  ;;  %5618 = vmatprep.mubr.msk.f32.mxu1 %vm240_vm0, %v1253_v38  ;;  %v8632_v13 = vpack.c.bf16 %v8047_v31, %v8042_v5 }
 0x2e7   :  { %v1254_v25 = vmax.f32 %v1222_v14, 0.0  ;;  %1453 = vmatmul.mubr.f32.gmra.mrb[30].mxu1 %v1252_v22  ;;  %v8633_v14 = vpack.c.bf16 %v8072_v53, %v8061_v57 }
 0x2e8   :  { %v1255_v58 = vmax.f32 %v1223_v8, 0.0  ;;  %v8631_v8 = vpack.c.bf16 %v8050_v30, %v8039_v62 }
 0x2e9   :  { %v5891_v2 = vpack.c.bf16 %v1254_v25, %v1252_v22 }
 0x2ea   :  { %5619 = vmatprep.mubr.msk.f32.mxu1 %vm240_vm0, %v1255_v58  ;;  %v5889_v7 = vpack.c.bf16 %v1255_v58, %v1253_v38 }
 0x2eb   :  { %1459 = vmatmul.mubr.f32.gmra.mrb[32].mxu1 %v1254_v25 }
 0x2ec   :  { %5620 = vmatprep.mubr.msk.f32.mxu1 %vm240_vm0, %v8019_v18  ;;  %v8635_v18 = vpack.c.bf16 %v8094_v1, %v8083_v27 }
 0x2ef   :  { %1530 = vmatmul.mubr.f32.vlgmr.msra.gmra.mrb[34].mxu1 %v8021_v29  ;;  %v8636_v29 = vpack.c.bf16 %v8091_v47, %v8086_v42 }
 0x2f0   :  { %5864 = vmatpush1.bf16.msra.mxu1 %v8630_v19  ;;  %5621 = vmatprep.mubr.msk.f32.mxu1 %vm240_vm0, %v8028_v46  ;;  %v8638_v46 = vpack.c.bf16 %v8113_v12, %v8108_v56 }
 0x2f1   :  { %5866 = vmatprep.subr.bf16.mxu1 %v8631_v8 }
 0x2f3   :  { %1536 = vmatmul.mubr.f32.gmra.mrb[36].mxu1 %v8025_v43  ;;  %v8637_v43 = vpack.c.bf16 %v8116_v50, %v8105_v37 }
 0x2f4   :  { %5868 = vmatpush1.bf16.msra.mxu1 %v8632_v13  ;;  %5622 = vmatprep.mubr.msk.f32.mxu1 %vm240_vm0, %v8039_v62  ;;  %v8639_v62 = vpack.c.bf16 %v8137_v21, %v8130_v54 }
 0x2f5   :  { %5870 = vmatprep.subr.bf16.mxu1 %v8633_v14 }
 0x2f7   :  { %1542 = vmatmul.mubr.f32.gmra.mrb[38].mxu1 %v8042_v5  ;;  %v1636_v5 = vld [vmem:[#allocation7 + $0x48] sm:$0xff] }
 0x2f8   :  { %5872 = vmatpush1.bf16.msra.mxu1 %v8634_v20  ;;  %5623 = vmatprep.mubr.msk.f32.mxu1 %vm240_vm0, %v8050_v30  ;;  %v1638_v30 = vld [vmem:[#allocation7 + $0x58] sm:$0xff] }
 0x2f9   :  { %5874 = vmatprep.subr.bf16.mxu1 %v8635_v18 }
 0x2fb   :  { %1548 = vmatmul.mubr.f32.gmra.mrb[40].mxu1 %v8047_v31  ;;  %v1637_v31 = vld [vmem:[#allocation7 + $0x50] sm:$0xff] }
 0x2fc   :  { %5876 = vmatpush1.bf16.msra.mxu1 %v8636_v29  ;;  %5624 = vmatprep.mubr.msk.f32.mxu1 %vm240_vm0, %v8061_v57  ;;  %v1639_v57 = vld [vmem:[#allocation7 + $0x60] sm:$0xff] }
 0x2fd   :  { %5878 = vmatprep.subr.bf16.mxu1 %v8637_v43 }
 0x2ff   :  { %1554 = vmatmul.mubr.f32.gmra.mrb[42].mxu1 %v8064_v11  ;;  %v1640_v11 = vld [vmem:[#allocation7 + $0x68] sm:$0xff] }
 0x300   :  { %5880 = vmatpush1.bf16.msra.mxu1 %v8638_v46  ;;  %5625 = vmatprep.mubr.msk.f32.mxu1 %vm240_vm0, %v8072_v53  ;;  %v1642_v53 = vld [vmem:[#allocation7 + $0x78] sm:$0xff] }
 0x301   :  { %5882 = vmatprep.subr.bf16.mxu1 %v5881_v61 }
 0x303   :  { %1560 = vmatmul.mubr.f32.gmra.mrb[44].mxu1 %v8069_v36  ;;  %v1641_v36 = vld [vmem:[#allocation7 + $0x70] sm:$0xff] }
 0x304   :  { %5884 = vmatpush1.bf16.msra.mxu1 %v8639_v62  ;;  %5626 = vmatprep.mubr.msk.f32.mxu1 %vm240_vm0, %v8083_v27 }
 0x305   :  { %5886 = vmatprep.subr.bf16.mxu1 %v5885_v28 }
 0x307   :  { %1566 = vmatmul.mubr.f32.gmra.mrb[46].mxu1 %v8086_v42 }
 0x308   :  { %5888 = vmatpush1.bf16.msra.mxu1 %v5887_v45  ;;  %5627 = vmatprep.mubr.msk.f32.mxu1 %vm240_vm0, %v8094_v1 }
 0x309   :  { %5890 = vmatprep.subr.bf16.mxu1 %v5889_v7  ;;  %v8640_v7 = vmov 0.0  }
 0x30b   :  { %1572 = vmatmul.mubr.f32.gmra.mrb[48].mxu1 %v8091_v47 }
 0x30c   :  { %5892 = vmatpush1.bf16.msra.mxu1 %v5891_v2  ;;  %5628 = vmatprep.mubr.msk.f32.mxu1 %vm240_vm0, %v8105_v37 }
 0x30f   :  { %1578 = vmatmul.mubr.f32.gmra.mrb[50].mxu1 %v8108_v56 }
 0x310   :  { %5629 = vmatprep.mubr.msk.f32.mxu1 %vm240_vm0, %v8116_v50 }
 0x313   :  { %1584 = vmatmul.mubr.f32.gmra.mrb[52].mxu1 %v8113_v12 }
 0x314   :  { %5630 = vmatprep.mubr.msk.f32.mxu1 %vm240_vm0, %v8127_v35 }
 0x317   :  { %1590 = vmatmul.mubr.f32.gmra.mrb[54].mxu1 %v8130_v54 }
 0x318   :  { %5631 = vmatprep.mubr.msk.f32.mxu1 %vm240_vm0, %v8140_v4  ;;  %v1635_v4 = vld [vmem:[#allocation7 + $0x40] sm:$0xff] }
 0x31b   :  { %1596 = vmatmul.mubr.f32.gmra.mrb[56].mxu1 %v8137_v21 }
 0x31c   :  { %5632 = vmatprep.mubr.msk.f32.mxu1 %vm240_vm0, %v8149_v26 }
 0x31f   :  { %1602 = vmatmul.mubr.f32.gmra.mrb[58].mxu1 %v8151_v15 }
 0x320   :  { %5633 = vmatprep.mubr.msk.f32.mxu1 %vm240_vm0, %v8158_v44 }
 0x323   :  { %1608 = vmatmul.mubr.f32.gmra.mrb[60].mxu1 %v8155_v55 }
 0x324   :  { %5634 = vmatprep.mubr.msk.f32.mxu1 %vm240_vm0, %v1253_v38 }
 0x327   :  { %1614 = vmatmul.mubr.f32.gmra.mrb[62].mxu1 %v1252_v22 }
 0x328   :  { %5635 = vmatprep.mubr.msk.f32.mxu1 %vm240_vm0, %v1255_v58 }
 0x32b   :  { %1620 = vmatmul.mubr.f32.gmra.mrb[64].mxu1 %v1254_v25 }
 0x32c   :  { %1707 = vmatprep.mubr.f32.mxu1 %v8640_v7 }
 0x32f   :  { %1708 = vmatmul.mubr.f32.vlgmr.msra.gmra.mrb[66].mxu1 %v1635_v4 }
 0x330   :  { %1713 = vmatprep.mubr.f32.mxu1 %v8640_v7 }
 0x333   :  { %1714 = vmatmul.mubr.f32.gmra.mrb[68].mxu1 %v1636_v5 }
 0x334   :  { %1719 = vmatprep.mubr.f32.mxu1 %v8640_v7 }
 0x337   :  { %1720 = vmatmul.mubr.f32.gmra.mrb[70].mxu1 %v1637_v31 }
 0x338   :  { %1725 = vmatprep.mubr.f32.mxu1 %v8640_v7 }
 0x33b   :  { %1726 = vmatmul.mubr.f32.gmra.mrb[72].mxu1 %v1638_v30 }
 0x33c   :  { %1731 = vmatprep.mubr.f32.mxu1 %v8640_v7 }
 0x33f   :  { %1732 = vmatmul.mubr.f32.gmra.mrb[74].mxu1 %v1639_v57 }
 0x340   :  { %1737 = vmatprep.mubr.f32.mxu1 %v8640_v7 }
 0x343   :  { %1738 = vmatmul.mubr.f32.gmra.mrb[76].mxu1 %v1640_v11 }
 0x344   :  { %1743 = vmatprep.mubr.f32.mxu1 %v8640_v7 }
 0x347   :  { %1744 = vmatmul.mubr.f32.gmra.mrb[78].mxu1 %v1641_v36 }
 0x348   :  { %1749 = vmatprep.mubr.f32.mxu1 %v8640_v7 }
 0x34b   :  { %1750 = vmatmul.mubr.f32.gmra.mrb[80].mxu1 %v1642_v53 }
 0x34c   :  { %1820 = vmatprep.mubr.f32.mxu1 %v8640_v7 }
 0x382   :  { %v1370_v42 = vpop.f32.mrb[2].mxu1 }
 0x383   :  { %v1372_v27 = vpop.f32.mrb[3].mxu1 }
 0x386   :  { %v1376_v47 = vpop.f32.mrb[4].mxu1 }
 0x387   :  { %v5895_v1 = vpack.c.bf16 %v1376_v47, %v1370_v42  ;;  %v1378_v56 = vpop.f32.mrb[5].mxu1 }
 0x388   :  { %v5893_v37 = vpack.c.bf16 %v1378_v56, %v1372_v27 }
 0x38a   :  { %v1382_v12 = vpop.f32.mrb[6].mxu1  ;;  %5894 = vmatprep.subr.bf16.mxu1 %v5893_v37 }
 0x38b   :  { %v1384_v50 = vpop.f32.mrb[7].mxu1  ;;  %5896 = vmatpush1.bf16.msra.mxu1 %v5895_v1 }
 0x38e   :  { %v1388_v54 = vpop.f32.mrb[8].mxu1 }
 0x38f   :  { %v5899_v21 = vpack.c.bf16 %v1388_v54, %v1382_v12  ;;  %v1390_v35 = vpop.f32.mrb[9].mxu1 }
 0x390   :  { %v5897_v61 = vpack.c.bf16 %v1390_v35, %v1384_v50  ;;  %v1626_v50 = vld [vmem:[#allocation7] sm:$0xff] }
 0x392   :  { %v1394_v26 = vpop.f32.mrb[10].mxu1  ;;  %5898 = vmatprep.subr.bf16.mxu1 %v5897_v61  ;;  %v1627_v61 = vld [vmem:[#allocation7 + $0x8] sm:$0xff] }
 0x393   :  { %v1396_v15 = vpop.f32.mrb[11].mxu1  ;;  %5900 = vmatpush1.bf16.msra.mxu1 %v5899_v21 }
 0x396   :  { %v1400_v55 = vpop.f32.mrb[12].mxu1 }
 0x397   :  { %v5903_v44 = vpack.c.bf16 %v1400_v55, %v1394_v26  ;;  %v1402_v45 = vpop.f32.mrb[13].mxu1 }
 0x398   :  { %v5901_v28 = vpack.c.bf16 %v1402_v45, %v1396_v15 }
 0x39a   :  { %v1406_v39 = vpop.f32.mrb[14].mxu1  ;;  %5902 = vmatprep.subr.bf16.mxu1 %v5901_v28 }
 0x39b   :  { %v1408_v38 = vpop.f32.mrb[15].mxu1  ;;  %5904 = vmatpush1.bf16.msra.mxu1 %v5903_v44  ;;  %v1628_v44 = vld [vmem:[#allocation7 + $0x10] sm:$0xff] }
 0x39e   :  { %v1412_v9 = vpop.f32.mrb[16].mxu1 }
 0x39f   :  { %v5907_v22 = vpack.c.bf16 %v1412_v9, %v1406_v39  ;;  %v1414_v25 = vpop.f32.mrb[17].mxu1 }
 0x3a0   :  { %v5905_v58 = vpack.c.bf16 %v1414_v25, %v1408_v38  ;;  %v1629_v38 = vld [vmem:[#allocation7 + $0x18] sm:$0xff] }
 0x3a2   :  { %v1418_v2 = vpop.f32.mrb[18].mxu1  ;;  %5906 = vmatprep.subr.bf16.mxu1 %v5905_v58  ;;  %v1630_v58 = vld [vmem:[#allocation7 + $0x20] sm:$0xff] }
 0x3a3   :  { %v1420_v19 = vpop.f32.mrb[19].mxu1  ;;  %5908 = vmatpush1.bf16.msra.mxu1 %v5907_v22 }
 0x3a6   :  { %v1424_v8 = vpop.f32.mrb[20].mxu1 }
 0x3a7   :  { %v5911_v13 = vpack.c.bf16 %v1424_v8, %v1418_v2  ;;  %v1426_v14 = vpop.f32.mrb[21].mxu1 }
 0x3a8   :  { %v5909_v20 = vpack.c.bf16 %v1426_v14, %v1420_v19 }
 0x3aa   :  { %v1430_v18 = vpop.f32.mrb[22].mxu1  ;;  %5910 = vmatprep.subr.bf16.mxu1 %v5909_v20 }
 0x3ab   :  { %v1432_v29 = vpop.f32.mrb[23].mxu1  ;;  %5912 = vmatpush1.bf16.msra.mxu1 %v5911_v13  ;;  %v1631_v13 = vld [vmem:[#allocation7 + $0x28] sm:$0xff] }
 0x3ae   :  { %v1436_v43 = vpop.f32.mrb[24].mxu1 }
 0x3af   :  { %v5915_v46 = vpack.c.bf16 %v1436_v43, %v1430_v18  ;;  %v1438_v62 = vpop.f32.mrb[25].mxu1 }
 0x3b0   :  { %v5913_v4 = vpack.c.bf16 %v1438_v62, %v1432_v29  ;;  %v1632_v29 = vld [vmem:[#allocation7 + $0x30] sm:$0xff] }
 0x3b2   :  { %v1442_v5 = vpop.f32.mrb[26].mxu1  ;;  %5914 = vmatprep.subr.bf16.mxu1 %v5913_v4  ;;  %v1633_v4 = vld [vmem:[#allocation7 + $0x38] sm:$0xff] }
 0x3b3   :  { %v1444_v31 = vpop.f32.mrb[27].mxu1  ;;  %5916 = vmatpush1.bf16.msra.mxu1 %v5915_v46 }
 0x3b6   :  { %v1448_v30 = vpop.f32.mrb[28].mxu1 }
 0x3b7   :  { %v5919_v57 = vpack.c.bf16 %v1448_v30, %v1442_v5  ;;  %v1450_v11 = vpop.f32.mrb[29].mxu1 }
 0x3b8   :  { %v5917_v36 = vpack.c.bf16 %v1450_v11, %v1444_v31 }
 0x3ba   :  { %v1454_v53 = vpop.f32.mrb[30].mxu1  ;;  %5918 = vmatprep.subr.bf16.mxu1 %v5917_v36 }
 0x3bb   :  { %v1456_v42 = vpop.f32.mrb[31].mxu1  ;;  %5920 = vmatpush1.bf16.msra.mxu1 %v5919_v57 }
 0x3be   :  { %v1460_v27 = vpop.f32.mrb[32].mxu1 }
 0x3bf   :  { %v5923_v47 = vpack.c.bf16 %v1460_v27, %v1454_v53  ;;  %v1462_v1 = vpop.f32.mrb[33].mxu1 }
 0x3c0   :  { %v5921_v56 = vpack.c.bf16 %v1462_v1, %v1456_v42 }
 0x3c2   :  { %v1531_v37 = vpop.f32.mrb[34].mxu1  ;;  %5922 = vmatprep.subr.bf16.mxu1 %v5921_v56 }
 0x3c3   :  { %v1533_v12 = vpop.f32.mrb[35].mxu1  ;;  %5924 = vmatpush1.bf16.msra.mxu1 %v5923_v47 }
 0x3c6   :  { %v1537_v54 = vpop.f32.mrb[36].mxu1  ;;  %1821 = vmatmul.mubr.f32.vlgmr.msra.gmra.mrb[66].mxu1 %v1626_v50 }
 0x3c7   :  { %v5927_v21 = vpack.c.bf16 %v1537_v54, %v1531_v37  ;;  %v1539_v35 = vpop.f32.mrb[37].mxu1  ;;  %1826 = vmatprep.mubr.f32.mxu1 %v8640_v7 }
 0x3c8   :  { %v5925_v26 = vpack.c.bf16 %v1539_v35, %v1533_v12 }
 0x3ca   :  { %v1543_v15 = vpop.f32.mrb[38].mxu1  ;;  %5926 = vmatprep.subr.bf16.mxu1 %v5925_v26  ;;  %1827 = vmatmul.mubr.f32.gmra.mrb[68].mxu1 %v1627_v61 }
 0x3cb   :  { %v1545_v55 = vpop.f32.mrb[39].mxu1  ;;  %5928 = vmatpush1.bf16.msra.mxu1 %v5927_v21  ;;  %1832 = vmatprep.mubr.f32.mxu1 %v8640_v7 }
 0x3ce   :  { %v1549_v45 = vpop.f32.mrb[40].mxu1  ;;  %1833 = vmatmul.mubr.f32.gmra.mrb[70].mxu1 %v1628_v44 }
 0x3cf   :  { %v5931_v28 = vpack.c.bf16 %v1549_v45, %v1543_v15  ;;  %v1551_v39 = vpop.f32.mrb[41].mxu1  ;;  %1838 = vmatprep.mubr.f32.mxu1 %v8640_v7 }
 0x3d0   :  { %v5929_v9 = vpack.c.bf16 %v1551_v39, %v1545_v55  ;;  %v1870_v39 = vld [vmem:[#allocation7 + $0x80] sm:$0xff] }
 0x3d2   :  { %v1555_v22 = vpop.f32.mrb[42].mxu1  ;;  %5930 = vmatprep.subr.bf16.mxu1 %v5929_v9  ;;  %1839 = vmatmul.mubr.f32.gmra.mrb[72].mxu1 %v1629_v38  ;;  %v1871_v38 = vld [vmem:[#allocation7 + $0x88] sm:$0xff]  ;;  %v1872_v9 = vld [vmem:[#allocation7 + $0x90] sm:$0xff] }
 0x3d3   :  { %v1557_v25 = vpop.f32.mrb[43].mxu1  ;;  %5932 = vmatpush1.bf16.msra.mxu1 %v5931_v28  ;;  %1844 = vmatprep.mubr.f32.mxu1 %v8640_v7 }
 0x3d6   :  { %v1561_v2 = vpop.f32.mrb[44].mxu1  ;;  %1845 = vmatmul.mubr.f32.gmra.mrb[74].mxu1 %v1630_v58  ;;  %v1875_v58 = vld [vmem:[#allocation7 + $0xa8] sm:$0xff] }
 0x3d7   :  { %v5935_v19 = vpack.c.bf16 %v1561_v2, %v1555_v22  ;;  %v1563_v8 = vpop.f32.mrb[45].mxu1  ;;  %1850 = vmatprep.mubr.f32.mxu1 %v8640_v7  ;;  %v1873_v22 = vld [vmem:[#allocation7 + $0x98] sm:$0xff]  ;;  %v1876_v2 = vld [vmem:[#allocation7 + $0xb0] sm:$0xff] }
 0x3d8   :  { %v5933_v14 = vpack.c.bf16 %v1563_v8, %v1557_v25  ;;  %v1874_v25 = vld [vmem:[#allocation7 + $0xa0] sm:$0xff]  ;;  %v2018_v8 = vpop.permute.xlu0 %2017 }
 0x3da   :  { %v1567_v20 = vpop.f32.mrb[46].mxu1  ;;  %5934 = vmatprep.subr.bf16.mxu1 %v5933_v14  ;;  %1851 = vmatmul.mubr.f32.gmra.mrb[76].mxu1 %v1631_v13 }
 0x3db   :  { %v1569_v18 = vpop.f32.mrb[47].mxu1  ;;  %5936 = vmatpush1.bf16.msra.mxu1 %v5935_v19  ;;  %1856 = vmatprep.mubr.f32.mxu1 %v8640_v7  ;;  %v1877_v19 = vld [vmem:[#allocation7 + $0xb8] sm:$0xff] }
 0x3de   :  { %v1573_v43 = vpop.f32.mrb[48].mxu1  ;;  %1857 = vmatmul.mubr.f32.gmra.mrb[78].mxu1 %v1632_v29  ;;  %v2023_v29 = vpop.permute.xlu1 %2022 }
 0x3df   :  { %v5939_v46 = vpack.c.bf16 %v1573_v43, %v1567_v20  ;;  %v1575_v62 = vpop.f32.mrb[49].mxu1  ;;  %1862 = vmatprep.mubr.f32.mxu1 %v8640_v7 }
 0x3e0   :  { %v5937_v5 = vpack.c.bf16 %v1575_v62, %v1569_v18 }
 0x3e2   :  { %v1579_v31 = vpop.f32.mrb[50].mxu1  ;;  %5938 = vmatprep.subr.bf16.mxu1 %v5937_v5  ;;  %1863 = vmatmul.mubr.f32.gmra.mrb[80].mxu1 %v1633_v4 }
 0x3e3   :  { %v1581_v30 = vpop.f32.mrb[51].mxu1  ;;  %5940 = vmatpush1.bf16.msra.mxu1 %v5939_v46  ;;  %1942 = vmatprep.mubr.f32.mxu1 %v8640_v7 }
 0x3e6   :  { %v1585_v57 = vpop.f32.mrb[52].mxu1 }
 0x3e7   :  { %v5943_v11 = vpack.c.bf16 %v1585_v57, %v1579_v31  ;;  %v1587_v36 = vpop.f32.mrb[53].mxu1  ;;  %v2028_v57 = vpop.permute.xlu0 %2027 }
 0x3e8   :  { %v5941_v53 = vpack.c.bf16 %v1587_v36, %v1581_v30 }
 0x3ea   :  { %v1591_v42 = vpop.f32.mrb[54].mxu1  ;;  %5942 = vmatprep.subr.bf16.mxu1 %v5941_v53 }
 0x3eb   :  { %v1593_v27 = vpop.f32.mrb[55].mxu1  ;;  %5944 = vmatpush1.bf16.msra.mxu1 %v5943_v11 }
 0x3ee   :  { %v1597_v47 = vpop.f32.mrb[56].mxu1 }
 0x3ef   :  { %v5947_v1 = vpack.c.bf16 %v1597_v47, %v1591_v42  ;;  %v1599_v56 = vpop.f32.mrb[57].mxu1 }
 0x3f0   :  { %v5945_v37 = vpack.c.bf16 %v1599_v56, %v1593_v27  ;;  %v2033_v56 = vpop.permute.xlu1 %2032 }
 0x3f2   :  { %v1603_v12 = vpop.f32.mrb[58].mxu1  ;;  %5946 = vmatprep.subr.bf16.mxu1 %v5945_v37 }
 0x3f3   :  { %v1605_v50 = vpop.f32.mrb[59].mxu1  ;;  %5948 = vmatpush1.bf16.msra.mxu1 %v5947_v1 }
 0x3f6   :  { %v1609_v54 = vpop.f32.mrb[60].mxu1 }
 0x3f7   :  { %v5951_v21 = vpack.c.bf16 %v1609_v54, %v1603_v12  ;;  %v1611_v35 = vpop.f32.mrb[61].mxu1 }
 0x3f8   :  { %v5949_v61 = vpack.c.bf16 %v1611_v35, %v1605_v50 }
 0x3fa   :  { %v1615_v26 = vpop.f32.mrb[62].mxu1  ;;  %5950 = vmatprep.subr.bf16.mxu1 %v5949_v61 }
 0x3fb   :  { %v1617_v15 = vpop.f32.mrb[63].mxu1  ;;  %5952 = vmatpush1.bf16.msra.mxu1 %v5951_v21 }
 0x3fe   :  { %v1621_v55 = vpop.f32.mrb[64].mxu1 }
 0x3ff   :  { %v5955_v44 = vpack.c.bf16 %v1621_v55, %v1615_v26  ;;  %v1623_v45 = vpop.f32.mrb[65].mxu1  ;;  %v2038_v26 = vpop.permute.xlu0 %2037 }
 0x400   :  { %v5953_v28 = vpack.c.bf16 %v1623_v45, %v1617_v15 }
 0x402   :  { %5954 = vmatprep.subr.bf16.mxu1 %v5953_v28 }
 0x403   :  { %5956 = vmatpush1.bf16.msra.mxu1 %v5955_v44 }
 0x406   :  { %1943 = vmatmul.mubr.f32.vlgmr.msra.gmra.mrb[66].mxu1 %v1870_v39 }
 0x407   :  { %1948 = vmatprep.mubr.f32.mxu1 %v8640_v7 }
 0x40a   :  { %1949 = vmatmul.mubr.f32.gmra.mrb[68].mxu1 %v1871_v38 }
 0x40b   :  { %1954 = vmatprep.mubr.f32.mxu1 %v8640_v7 }
 0x40e   :  { %1955 = vmatmul.mubr.f32.gmra.mrb[70].mxu1 %v1872_v9  ;;  %v2043_v9 = vpop.permute.xlu1 %2042 }
 0x40f   :  { %1960 = vmatprep.mubr.f32.mxu1 %v8640_v7 }
 0x412   :  { %1961 = vmatmul.mubr.f32.gmra.mrb[72].mxu1 %v1873_v22 }
 0x413   :  { %1966 = vmatprep.mubr.f32.mxu1 %v8640_v7 }
 0x416   :  { %1967 = vmatmul.mubr.f32.gmra.mrb[74].mxu1 %v1874_v25 }
 0x417   :  { %1972 = vmatprep.mubr.f32.mxu1 %v8640_v7 }
 0x41a   :  { %1973 = vmatmul.mubr.f32.gmra.mrb[76].mxu1 %v1875_v58 }
 0x41b   :  { %1978 = vmatprep.mubr.f32.mxu1 %v8640_v7 }
 0x41e   :  { %1979 = vmatmul.mubr.f32.gmra.mrb[78].mxu1 %v1876_v2 }
 0x41f   :  { %1984 = vmatprep.mubr.f32.mxu1 %v8640_v7 }
 0x422   :  { %1985 = vmatmul.mubr.f32.gmra.mrb[80].mxu1 %v1877_v19 }
 0x423   :  { %2423 = vmatprep.mubr.f32.mxu1 %v8640_v7 }
 0x4d9   :  { %v1944_v13 = vpop.f32.mrb[66].mxu1 }
 0x4da   :  { %v2055_v14 = vadd.f32 %v2018_v8, %v1944_v13  ;;  %v1946_v20 = vpop.f32.mrb[67].mxu1 }
 0x4db   :  { %v2056_v18 = vadd.f32 %v2018_v8, %v1946_v20 }
 0x4dc   :  { %v8270_v62 = vmax.f32 %v2055_v14, 0.0  ;;  %v2048_v14 = vpop.permute.xlu0 %2047 }
 0x4dd   :  { %v8268_v43 = vmax.f32 %v2056_v18, 0.0  ;;  %v1950_v46 = vpop.f32.mrb[68].mxu1 }
 0x4de   :  { %v2057_v4 = vadd.f32 %v2023_v29, %v1950_v46  ;;  %v1952_v5 = vpop.f32.mrb[69].mxu1 }
 0x4df   :  { %v2058_v31 = vadd.f32 %v2023_v29, %v1952_v5  ;;  %5636 = vmatprep.mubr.msk.f32.mxu0 %vm240_vm0, %v8268_v43 }
 0x4e0   :  { %v8274_v30 = vmax.f32 %v2057_v4, 0.0  ;;  %2176 = vmatmul.mubr.f32.vlgmr.msra.gmra.mrb[34].mxu0 %v8270_v62 }
 0x4e1   :  { %v8277_v11 = vmax.f32 %v2058_v31, 0.0  ;;  %6000 = vmatpush1.bf16.msra.mxu0 %v7550_v40  ;;  %v1956_v36 = vpop.f32.mrb[70].mxu1 }
 0x4e2   :  { %v6039_v53 = vpack.c.bf16 %v8274_v30, %v8270_v62  ;;  %v2059_v42 = vadd.f32 %v2028_v57, %v1956_v36  ;;  %v1958_v27 = vpop.f32.mrb[71].mxu1  ;;  %6002 = vmatprep.subr.bf16.mxu0 %v7552_v41 }
 0x4e3   :  { %v2060_v47 = vadd.f32 %v2028_v57, %v1958_v27  ;;  %5637 = vmatprep.mubr.msk.f32.mxu0 %vm240_vm0, %v8277_v11  ;;  %v6037_v1 = vpack.c.bf16 %v8277_v11, %v8268_v43  ;;  %v2053_v57 = vpop.permute.xlu1 %2052 }
 0x4e4   :  { %2182 = vmatmul.mubr.f32.gmra.mrb[36].mxu0 %v8274_v30  ;;  %v8291_v50 = vmax.f32 %v2059_v42, 0.0 }
 0x4e5   :  { %v8288_v37 = vmax.f32 %v2060_v47, 0.0  ;;  %6004 = vmatpush1.bf16.msra.mxu0 %v7559_v51  ;;  %v1962_v12 = vpop.f32.mrb[72].mxu1  ;;  %6038 = vmatprep.subr.bf16.mxu1 %v6037_v1 }
 0x4e6   :  { %v2061_v54 = vadd.f32 %v2033_v56, %v1962_v12  ;;  %v1964_v21 = vpop.f32.mrb[73].mxu1  ;;  %6040 = vmatpush1.bf16.msra.mxu1 %v6039_v53  ;;  %6006 = vmatprep.subr.bf16.mxu0 %v7562_v52 }
 0x4e7   :  { %v2062_v35 = vadd.f32 %v2033_v56, %v1964_v21  ;;  %5638 = vmatprep.mubr.msk.f32.mxu0 %vm240_vm0, %v8288_v37 }
 0x4e8   :  { %v8296_v61 = vmax.f32 %v2061_v54, 0.0  ;;  %2188 = vmatmul.mubr.f32.gmra.mrb[38].mxu0 %v8291_v50 }
 0x4e9   :  { %v8299_v15 = vmax.f32 %v2062_v35, 0.0  ;;  %6008 = vmatpush1.bf16.msra.mxu0 %v7571_v63  ;;  %v1968_v55 = vpop.f32.mrb[74].mxu1  ;;  %v8641_v35 = vld [vmem:[#allocation23_spill] sm:$0xff] }
 0x4ea   :  { %v6043_v44 = vpack.c.bf16 %v8296_v61, %v8291_v50  ;;  %v2063_v45 = vadd.f32 %v2038_v26, %v1968_v55  ;;  %v1970_v28 = vpop.f32.mrb[75].mxu1  ;;  %6010 = vmatprep.subr.bf16.mxu0 %v7574_v0  ;;  %v8644_v55 = vld [vmem:[#allocation26_spill] sm:$0xff] }
 0x4eb   :  { %v2064_v39 = vadd.f32 %v2038_v26, %v1970_v28  ;;  %5639 = vmatprep.mubr.msk.f32.mxu0 %vm240_vm0, %v8299_v15  ;;  %v6041_v38 = vpack.c.bf16 %v8299_v15, %v8288_v37  ;;  %v8643_v26 = vld [vmem:[#allocation25_spill] sm:$0xff] }
 0x4ec   :  { %2194 = vmatmul.mubr.f32.gmra.mrb[40].mxu0 %v8296_v61  ;;  %v8313_v58 = vmax.f32 %v2063_v45, 0.0  ;;  %v8653_v45 = vld [vmem:[#allocation36_spill] sm:$0xff]  ;;  %v8654_v28 = vld [vmem:[#allocation37_spill] sm:$0xff] }
 0x4ed   :  { %v8310_v22 = vmax.f32 %v2064_v39, 0.0  ;;  %6012 = vmatpush1.bf16.msra.mxu0 %v7583_v16  ;;  %v1974_v25 = vpop.f32.mrb[76].mxu1  ;;  %6042 = vmatprep.subr.bf16.mxu1 %v6041_v38  ;;  %v8655_v39 = vld [vmem:[#allocation38_spill] sm:$0xff]  ;;  %v8656_v38 = vld [vmem:[#allocation39_spill] sm:$0xff] }
 0x4ee   :  { %v2065_v2 = vadd.f32 %v2043_v9, %v1974_v25  ;;  %v1976_v19 = vpop.f32.mrb[77].mxu1  ;;  %6044 = vmatpush1.bf16.msra.mxu1 %v6043_v44  ;;  %6014 = vmatprep.subr.bf16.mxu0 %v7586_v17  ;;  %v8652_v44 = vld [vmem:[#allocation35_spill] sm:$0xff]  ;;  %v8659_v25 = vld [vmem:[#allocation42_spill] sm:$0xff] }
 0x4ef   :  { %v2066_v8 = vadd.f32 %v2043_v9, %v1976_v19  ;;  %5640 = vmatprep.mubr.msk.f32.mxu0 %vm240_vm0, %v8310_v22  ;;  %v8657_v9 = vld [vmem:[#allocation40_spill] sm:$0xff]  ;;  %v2343_v19 = vld [vmem:[#allocation8 + $0x28] sm:$0xff] }
 0x4f0   :  { %v8318_v13 = vmax.f32 %v2065_v2, 0.0  ;;  %2200 = vmatmul.mubr.f32.gmra.mrb[42].mxu0 %v8313_v58  ;;  %v2342_v2 = vld [vmem:[#allocation8 + $0x20] sm:$0xff] }
 0x4f1   :  { %v2082_v20 = vmax.f32 %v2066_v8, 0.0  ;;  %6016 = vmatpush1.bf16.msra.mxu0 %v7595_v33  ;;  %v1980_v18 = vpop.f32.mrb[78].mxu1  ;;  %v2344_v8 = vld [vmem:[#allocation8 + $0x30] sm:$0xff] }
 0x4f2   :  { %v6047_v29 = vpack.c.bf16 %v8318_v13, %v8313_v58  ;;  %v2067_v46 = vadd.f32 %v2048_v14, %v1980_v18  ;;  %v1982_v4 = vpop.f32.mrb[79].mxu1  ;;  %6018 = vmatprep.subr.bf16.mxu0 %v7598_v34 }
 0x4f3   :  { %v2068_v5 = vadd.f32 %v2048_v14, %v1982_v4  ;;  %5641 = vmatprep.mubr.msk.f32.mxu0 %vm240_vm0, %v2082_v20  ;;  %v6045_v31 = vpack.c.bf16 %v2082_v20, %v8310_v22 }
 0x4f4   :  { %2206 = vmatmul.mubr.f32.gmra.mrb[44].mxu0 %v8318_v13  ;;  %v2083_v42 = vmax.f32 %v2067_v46, 0.0 }
 0x4f5   :  { %v2084_v36 = vmax.f32 %v2068_v5, 0.0  ;;  %6020 = vmatpush1.bf16.msra.mxu0 %v7607_v48  ;;  %v1986_v53 = vpop.f32.mrb[80].mxu1  ;;  %6046 = vmatprep.subr.bf16.mxu1 %v6045_v31 }
 0x4f6   :  { %v2069_v27 = vadd.f32 %v2053_v57, %v1986_v53  ;;  %v1988_v47 = vpop.f32.mrb[81].mxu1  ;;  %6048 = vmatpush1.bf16.msra.mxu1 %v6047_v29  ;;  %6022 = vmatprep.subr.bf16.mxu0 %v7610_v49 }
 0x4f7   :  { %v2070_v1 = vadd.f32 %v2053_v57, %v1988_v47  ;;  %5642 = vmatprep.mubr.msk.f32.mxu0 %vm240_vm0, %v2084_v36 }
 0x4f8   :  { %v2085_v56 = vmax.f32 %v2069_v27, 0.0  ;;  %2212 = vmatmul.mubr.f32.gmra.mrb[46].mxu0 %v2083_v42 }
 0x4f9   :  { %v2086_v12 = vmax.f32 %v2070_v1, 0.0  ;;  %6024 = vmatpush1.bf16.msra.mxu0 %v7617_v59 }
 0x4fa   :  { %v6051_v54 = vpack.c.bf16 %v2085_v56, %v2083_v42  ;;  %6026 = vmatprep.subr.bf16.mxu0 %v7620_v60 }
 0x4fb   :  { %5643 = vmatprep.mubr.msk.f32.mxu0 %vm240_vm0, %v2086_v12  ;;  %v6049_v21 = vpack.c.bf16 %v2086_v12, %v2084_v36 }
 0x4fc   :  { %2218 = vmatmul.mubr.f32.gmra.mrb[48].mxu0 %v2085_v56 }
 0x4fd   :  { %6028 = vmatpush1.bf16.msra.mxu0 %v7628_v6  ;;  %5644 = vmatprep.mubr.msk.f32.mxu0 %vm240_vm0, %v8268_v43  ;;  %v8642_v43 = vld [vmem:[#allocation24_spill] sm:$0xff] }
 0x4fe   :  { %6050 = vmatprep.subr.bf16.mxu1 %v6049_v21  ;;  %6030 = vmatprep.subr.bf16.mxu0 %v7631_v10 }
 0x4ff   :  { %6052 = vmatpush1.bf16.msra.mxu1 %v6051_v54 }
 0x501   :  { %6032 = vmatpush1.bf16.msra.mxu0 %v7638_v23 }
 0x502   :  { %6034 = vmatprep.subr.bf16.mxu0 %v7641_v24  ;;  %5652 = vmatmul.mubr.msk.f32.vlgmr.msra.gmra.mrb[82].mxu1 %vm2346_vm2, %v2342_v2 }
 0x503   :  { %2429 = vmatprep.mubr.f32.mxu1 %v8640_v7 }
 0x505   :  { %6036 = vmatpush1.bf16.msra.mxu0 %v7649_v32 }
 0x506   :  { %6086 = vmatprep.subr.bf16.mxu0 %v7511_v3  ;;  %5653 = vmatmul.mubr.msk.f32.gmra.mrb[84].mxu1 %vm2346_vm2, %v2343_v19 }
 0x507   :  { %2435 = vmatprep.mubr.f32.mxu1 %v8640_v7 }
 0x508   :  { %2289 = vmatmul.mubr.f32.vlgmr.msra.gmra.mrb[50].mxu0 %v8270_v62  ;;  %v8645_v62 = vld [vmem:[#allocation27_spill] sm:$0xff] }
 0x509   :  { %5645 = vmatprep.mubr.msk.f32.mxu0 %vm240_vm0, %v8277_v11  ;;  %6088 = vmatpush1.bf16.msra.mxu0 %v8641_v35  ;;  %v8646_v11 = vld [vmem:[#allocation28_spill] sm:$0xff] }
 0x50a   :  { %6090 = vmatprep.subr.bf16.mxu0 %v8642_v43  ;;  %5654 = vmatmul.mubr.msk.f32.gmra.mrb[86].mxu1 %vm2346_vm2, %v2344_v8 }
 0x50b   :  { %2441 = vmatprep.mubr.f32.mxu1 %v8640_v7 }
 0x50c   :  { %2295 = vmatmul.mubr.f32.gmra.mrb[52].mxu0 %v8274_v30  ;;  %v8647_v30 = vld [vmem:[#allocation29_spill] sm:$0xff] }
 0x50d   :  { %5646 = vmatprep.mubr.msk.f32.mxu0 %vm240_vm0, %v8288_v37  ;;  %6092 = vmatpush1.bf16.msra.mxu0 %v8643_v26  ;;  %v8648_v37 = vld [vmem:[#allocation30_spill] sm:$0xff] }
 0x50e   :  { %6094 = vmatprep.subr.bf16.mxu0 %v8644_v55 }
 0x510   :  { %2301 = vmatmul.mubr.f32.gmra.mrb[54].mxu0 %v8291_v50  ;;  %v8649_v50 = vld [vmem:[#allocation32_spill] sm:$0xff] }
 0x511   :  { %5647 = vmatprep.mubr.msk.f32.mxu0 %vm240_vm0, %v8299_v15  ;;  %6096 = vmatpush1.bf16.msra.mxu0 %v8645_v62  ;;  %v8650_v15 = vld [vmem:[#allocation33_spill] sm:$0xff] }
 0x512   :  { %6098 = vmatprep.subr.bf16.mxu0 %v8646_v11 }
 0x514   :  { %2307 = vmatmul.mubr.f32.gmra.mrb[56].mxu0 %v8296_v61  ;;  %v8651_v61 = vld [vmem:[#allocation34_spill] sm:$0xff] }
 0x515   :  { %5648 = vmatprep.mubr.msk.f32.mxu0 %vm240_vm0, %v8310_v22  ;;  %6100 = vmatpush1.bf16.msra.mxu0 %v8647_v30  ;;  %v8658_v22 = vld [vmem:[#allocation41_spill] sm:$0xff] }
 0x516   :  { %6102 = vmatprep.subr.bf16.mxu0 %v8648_v37 }
 0x518   :  { %2313 = vmatmul.mubr.f32.gmra.mrb[58].mxu0 %v8313_v58  ;;  %v8660_v58 = vld [vmem:[#allocation31_spill] sm:$0xff] }
 0x519   :  { %5649 = vmatprep.mubr.msk.f32.mxu0 %vm240_vm0, %v2082_v20  ;;  %6104 = vmatpush1.bf16.msra.mxu0 %v8649_v50 }
 0x51a   :  { %6106 = vmatprep.subr.bf16.mxu0 %v8650_v15 }
 0x51c   :  { %2319 = vmatmul.mubr.f32.gmra.mrb[60].mxu0 %v8318_v13  ;;  %v2345_v13 = vld [vmem:[#allocation8 + $0x38] sm:$0xff] }
 0x51d   :  { %5650 = vmatprep.mubr.msk.f32.mxu0 %vm240_vm0, %v2084_v36  ;;  %6108 = vmatpush1.bf16.msra.mxu0 %v8651_v61 }
 0x51e   :  { %6110 = vmatprep.subr.bf16.mxu0 %v8652_v44  ;;  %5655 = vmatmul.mubr.msk.f32.gmra.mrb[88].mxu1 %vm2346_vm2, %v2345_v13 }
 0x51f   :  { %2524 = vmatprep.mubr.f32.mxu1 %v8640_v7 }
 0x520   :  { %2325 = vmatmul.mubr.f32.gmra.mrb[62].mxu0 %v2083_v42 }
 0x521   :  { %5651 = vmatprep.mubr.msk.f32.mxu0 %vm240_vm0, %v2086_v12  ;;  %6112 = vmatpush1.bf16.msra.mxu0 %v8653_v45 }
 0x522   :  { %6114 = vmatprep.subr.bf16.mxu0 %v8654_v28 }
 0x524   :  { %2331 = vmatmul.mubr.f32.gmra.mrb[64].mxu0 %v2085_v56 }
 0x525   :  { %6116 = vmatpush1.bf16.msra.mxu0 %v8655_v39 }
 0x526   :  { %6118 = vmatprep.subr.bf16.mxu0 %v8656_v38 }
 0x529   :  { %6120 = vmatpush1.bf16.msra.mxu0 %v8657_v9 }
 0x52a   :  { %6122 = vmatprep.subr.bf16.mxu0 %v8658_v22 }
 0x52d   :  { %6124 = vmatpush1.bf16.msra.mxu0 %v8659_v25 }
 0x52e   :  { %6126 = vmatprep.subr.bf16.mxu0 %v8660_v58 }
 0x5b3   :  { %v2177_v14 = vpop.f32.mrb[34].mxu0 }
 0x5b4   :  { %v2179_v20 = vpop.f32.mrb[35].mxu0 }
 0x5b7   :  { %v2183_v18 = vpop.f32.mrb[36].mxu0 }
 0x5b8   :  { %v6055_v29 = vpack.c.bf16 %v2183_v18, %v2177_v14  ;;  %v2185_v46 = vpop.f32.mrb[37].mxu0  ;;  %v2338_v18 = vld [vmem:[#allocation8 + $0x8] sm:$0xff] }
 0x5b9   :  { %v6053_v4 = vpack.c.bf16 %v2185_v46, %v2179_v20  ;;  %v2337_v20 = vld [vmem:[#allocation8] sm:$0xff] }
 0x5bb   :  { %v2189_v5 = vpop.f32.mrb[38].mxu0  ;;  %6054 = vmatprep.subr.bf16.mxu1 %v6053_v4  ;;  %v2339_v4 = vld [vmem:[#allocation8 + $0x10] sm:$0xff] }
 0x5bc   :  { %v2191_v31 = vpop.f32.mrb[39].mxu0  ;;  %6056 = vmatpush1.bf16.msra.mxu1 %v6055_v29 }
 0x5bf   :  { %v2195_v57 = vpop.f32.mrb[40].mxu0 }
 0x5c0   :  { %v6059_v36 = vpack.c.bf16 %v2195_v57, %v2189_v5  ;;  %v2197_v53 = vpop.f32.mrb[41].mxu0 }
 0x5c1   :  { %v6057_v42 = vpack.c.bf16 %v2197_v53, %v2191_v31 }
 0x5c3   :  { %v2201_v27 = vpop.f32.mrb[42].mxu0  ;;  %6058 = vmatprep.subr.bf16.mxu1 %v6057_v42 }
 0x5c4   :  { %v2203_v47 = vpop.f32.mrb[43].mxu0  ;;  %6060 = vmatpush1.bf16.msra.mxu1 %v6059_v36  ;;  %v2340_v36 = vld [vmem:[#allocation8 + $0x18] sm:$0xff] }
 0x5c7   :  { %v2207_v1 = vpop.f32.mrb[44].mxu0 }
 0x5c8   :  { %v6063_v56 = vpack.c.bf16 %v2207_v1, %v2201_v27  ;;  %v2209_v12 = vpop.f32.mrb[45].mxu0 }
 0x5c9   :  { %v6061_v54 = vpack.c.bf16 %v2209_v12, %v2203_v47 }
 0x5cb   :  { %v2213_v21 = vpop.f32.mrb[46].mxu0  ;;  %6062 = vmatprep.subr.bf16.mxu1 %v6061_v54 }
 0x5cc   :  { %v2215_v2 = vpop.f32.mrb[47].mxu0  ;;  %6064 = vmatpush1.bf16.msra.mxu1 %v6063_v56 }
 0x5cf   :  { %v2219_v19 = vpop.f32.mrb[48].mxu0 }
 0x5d0   :  { %v6067_v8 = vpack.c.bf16 %v2219_v19, %v2213_v21  ;;  %v2221_v13 = vpop.f32.mrb[49].mxu0 }
 0x5d1   :  { %v6065_v14 = vpack.c.bf16 %v2221_v13, %v2215_v2 }
 0x5d3   :  { %6066 = vmatprep.subr.bf16.mxu1 %v6065_v14 }
 0x5d4   :  { %6068 = vmatpush1.bf16.msra.mxu1 %v6067_v8 }
 0x5d7   :  { %5656 = vmatmul.mubr.msk.f32.vlgmr.msra.gmra.mrb[82].mxu1 %vm2346_vm2, %v2337_v20 }
 0x5d8   :  { %2530 = vmatprep.mubr.f32.mxu1 %v8640_v7 }
 0x5db   :  { %v2290_v29 = vpop.f32.mrb[50].mxu0  ;;  %5657 = vmatmul.mubr.msk.f32.gmra.mrb[84].mxu1 %vm2346_vm2, %v2338_v18 }
 0x5dc   :  { %v2292_v46 = vpop.f32.mrb[51].mxu0  ;;  %2536 = vmatprep.mubr.f32.mxu1 %v8640_v7 }
 0x5df   :  { %v2296_v5 = vpop.f32.mrb[52].mxu0  ;;  %5658 = vmatmul.mubr.msk.f32.gmra.mrb[86].mxu1 %vm2346_vm2, %v2339_v4 }
 0x5e0   :  { %v6071_v31 = vpack.c.bf16 %v2296_v5, %v2290_v29  ;;  %v2298_v57 = vpop.f32.mrb[53].mxu0  ;;  %2542 = vmatprep.mubr.f32.mxu1 %v8640_v7  ;;  %v2550_v5 = vld [vmem:[#allocation8 + $0x40] sm:$0xff] }
 0x5e1   :  { %v6069_v53 = vpack.c.bf16 %v2298_v57, %v2292_v46  ;;  %v2552_v57 = vld [vmem:[#allocation8 + $0x50] sm:$0xff] }
 0x5e3   :  { %v2302_v42 = vpop.f32.mrb[54].mxu0  ;;  %6070 = vmatprep.subr.bf16.mxu1 %v6069_v53  ;;  %5659 = vmatmul.mubr.msk.f32.gmra.mrb[88].mxu1 %vm2346_vm2, %v2340_v36  ;;  %v2553_v36 = vld [vmem:[#allocation8 + $0x58] sm:$0xff]  ;;  %v2670_v53 = vpop.permute.xlu0 %2669 }
 0x5e4   :  { %v2304_v27 = vpop.f32.mrb[55].mxu0  ;;  %6072 = vmatpush1.bf16.msra.mxu1 %v6071_v31  ;;  %2630 = vmatprep.mubr.f32.mxu1 %v8640_v7  ;;  %v2551_v31 = vld [vmem:[#allocation8 + $0x48] sm:$0xff] }
 0x5e7   :  { %v2308_v47 = vpop.f32.mrb[56].mxu0 }
 0x5e8   :  { %v6075_v1 = vpack.c.bf16 %v2308_v47, %v2302_v42  ;;  %v2310_v56 = vpop.f32.mrb[57].mxu0 }
 0x5e9   :  { %v6073_v12 = vpack.c.bf16 %v2310_v56, %v2304_v27  ;;  %v2675_v56 = vpop.permute.xlu1 %2674 }
 0x5eb   :  { %v2314_v54 = vpop.f32.mrb[58].mxu0  ;;  %6074 = vmatprep.subr.bf16.mxu1 %v6073_v12 }
 0x5ec   :  { %v2316_v21 = vpop.f32.mrb[59].mxu0  ;;  %6076 = vmatpush1.bf16.msra.mxu1 %v6075_v1 }
 0x5ef   :  { %v2320_v2 = vpop.f32.mrb[60].mxu0 }
 0x5f0   :  { %v6079_v19 = vpack.c.bf16 %v2320_v2, %v2314_v54  ;;  %v2322_v8 = vpop.f32.mrb[61].mxu0 }
 0x5f1   :  { %v6077_v13 = vpack.c.bf16 %v2322_v8, %v2316_v21 }
 0x5f3   :  { %v2326_v14 = vpop.f32.mrb[62].mxu0  ;;  %6078 = vmatprep.subr.bf16.mxu1 %v6077_v13 }
 0x5f4   :  { %v2328_v20 = vpop.f32.mrb[63].mxu0  ;;  %6080 = vmatpush1.bf16.msra.mxu1 %v6079_v19 }
 0x5f7   :  { %v2332_v18 = vpop.f32.mrb[64].mxu0 }
 0x5f8   :  { %v6083_v29 = vpack.c.bf16 %v2332_v18, %v2326_v14  ;;  %v2334_v46 = vpop.f32.mrb[65].mxu0  ;;  %v2680_v14 = vpop.permute.xlu0 %2679 }
 0x5f9   :  { %v6081_v4 = vpack.c.bf16 %v2334_v46, %v2328_v20 }
 0x5fb   :  { %6082 = vmatprep.subr.bf16.mxu1 %v6081_v4 }
 0x5fc   :  { %6084 = vmatpush1.bf16.msra.mxu1 %v6083_v29 }
 0x5ff   :  { %5660 = vmatmul.mubr.msk.f32.vlgmr.msra.gmra.mrb[82].mxu1 %vm2346_vm2, %v2550_v5 }
 0x600   :  { %2636 = vmatprep.mubr.f32.mxu1 %v8640_v7 }
 0x603   :  { %5661 = vmatmul.mubr.msk.f32.gmra.mrb[84].mxu1 %vm2346_vm2, %v2551_v31 }
 0x604   :  { %2642 = vmatprep.mubr.f32.mxu1 %v8640_v7 }
 0x607   :  { %5662 = vmatmul.mubr.msk.f32.gmra.mrb[86].mxu1 %vm2346_vm2, %v2552_v57  ;;  %v2685_v57 = vpop.permute.xlu1 %2684 }
 0x608   :  { %2648 = vmatprep.mubr.f32.mxu1 %v8640_v7 }
 0x60b   :  { %5663 = vmatmul.mubr.msk.f32.gmra.mrb[88].mxu1 %vm2346_vm2, %v2553_v36 }
 0x60c   :  { %2968 = vmatprep.mubr.f32.mxu1 %v8640_v7 }
 0x6d2   :  { %v2632_v42 = vpop.f32.mrb[82].mxu1 }
 0x6d3   :  { %v2687_v27 = vadd.f32 %v2670_v53, %v2632_v42  ;;  %v2634_v47 = vpop.f32.mrb[83].mxu1 }
 0x6d4   :  { %v2688_v1 = vadd.f32 %v2670_v53, %v2634_v47 }
 0x6d5   :  { %v2695_v21 = vmax.f32 %v2687_v27, 0.0 }
 0x6d6   :  { %v2696_v12 = vmax.f32 %v2688_v1, 0.0  ;;  %v2638_v54 = vpop.f32.mrb[84].mxu1 }
 0x6d7   :  { %v2689_v2 = vadd.f32 %v2675_v56, %v2638_v54  ;;  %v2640_v19 = vpop.f32.mrb[85].mxu1 }
 0x6d8   :  { %v2690_v8 = vadd.f32 %v2675_v56, %v2640_v19  ;;  %5664 = vmatprep.mubr.msk.f32.mxu0 %vm240_vm0, %v2696_v12 }
 0x6d9   :  { %v2697_v13 = vmax.f32 %v2689_v2, 0.0  ;;  %2780 = vmatmul.mubr.f32.vlgmr.msra.gmra.mrb[66].mxu0 %v2695_v21 }
 0x6da   :  { %v2698_v20 = vmax.f32 %v2690_v8, 0.0  ;;  %6128 = vmatpush1.bf16.msra.mxu0 %v7550_v40  ;;  %v2644_v18 = vpop.f32.mrb[86].mxu1 }
 0x6db   :  { %v6167_v29 = vpack.c.bf16 %v2697_v13, %v2695_v21  ;;  %v2691_v46 = vadd.f32 %v2680_v14, %v2644_v18  ;;  %v2646_v4 = vpop.f32.mrb[87].mxu1  ;;  %6130 = vmatprep.subr.bf16.mxu0 %v7552_v41 }
 0x6dc   :  { %v2692_v5 = vadd.f32 %v2680_v14, %v2646_v4  ;;  %5665 = vmatprep.mubr.msk.f32.mxu0 %vm240_vm0, %v2698_v20  ;;  %v6165_v31 = vpack.c.bf16 %v2698_v20, %v2696_v12  ;;  %v3066_v4 = vld [vmem:[#allocation10 + $0x28] sm:$0xff] }
 0x6dd   :  { %2786 = vmatmul.mubr.f32.gmra.mrb[68].mxu0 %v2697_v13  ;;  %v2699_v42 = vmax.f32 %v2691_v46, 0.0  ;;  %v3065_v46 = vld [vmem:[#allocation10 + $0x20] sm:$0xff] }
 0x6de   :  { %v2700_v36 = vmax.f32 %v2692_v5, 0.0  ;;  %6132 = vmatpush1.bf16.msra.mxu0 %v7559_v51  ;;  %v2650_v53 = vpop.f32.mrb[88].mxu1  ;;  %6166 = vmatprep.subr.bf16.mxu1 %v6165_v31  ;;  %v3656_v5 = vld [vmem:[#allocation13 + $0x280] sm:$0xff] }
 0x6df   :  { %v2693_v27 = vadd.f32 %v2685_v57, %v2650_v53  ;;  %v2652_v47 = vpop.f32.mrb[89].mxu1  ;;  %6168 = vmatpush1.bf16.msra.mxu1 %v6167_v29  ;;  %6134 = vmatprep.subr.bf16.mxu0 %v7562_v52  ;;  %v3660_v31 = vld [vmem:[#allocation13 + $0x2a0] sm:$0xff]  ;;  %v3669_v53 = vld [vmem:[#allocation13 + $0x2e8] sm:$0xff] }
 0x6e0   :  { %v2694_v1 = vadd.f32 %v2685_v57, %v2652_v47  ;;  %5666 = vmatprep.mubr.msk.f32.mxu0 %vm240_vm0, %v2700_v36  ;;  %v6283_v57 = vpack.c.bf16 %v3660_v31, %v3656_v5  ;;  %v3668_v47 = vld [vmem:[#allocation13 + $0x2e0] sm:$0xff]  ;;  %v3667_v5 = vld [vmem:[#allocation13 + $0x2d8] sm:$0xff] }
 0x6e1   :  { %v2701_v56 = vmax.f32 %v2693_v27, 0.0  ;;  %2792 = vmatmul.mubr.f32.gmra.mrb[70].mxu0 %v2699_v42  ;;  %v3664_v27 = vld [vmem:[#allocation13 + $0x2c0] sm:$0xff]  ;;  %v3671_v31 = vld [vmem:[#allocation13 + $0x2f8] sm:$0xff] }
 0x6e2   :  { %v2702_v54 = vmax.f32 %v2694_v1, 0.0  ;;  %6136 = vmatpush1.bf16.msra.mxu0 %v7571_v63  ;;  %v6287_v1 = vpack.c.bf16 %v3668_v47, %v3664_v27  ;;  %v3670_v27 = vld [vmem:[#allocation13 + $0x2f0] sm:$0xff]  ;;  %v3675_v47 = vld [vmem:[#allocation13 + $0x318] sm:$0xff] }
 0x6e3   :  { %v6171_v2 = vpack.c.bf16 %v2701_v56, %v2699_v42  ;;  %6138 = vmatprep.subr.bf16.mxu0 %v7574_v0 }
 0x6e4   :  { %5667 = vmatprep.mubr.msk.f32.mxu0 %vm240_vm0, %v2702_v54  ;;  %v6169_v19 = vpack.c.bf16 %v2702_v54, %v2700_v36 }
 0x6e5   :  { %2798 = vmatmul.mubr.f32.gmra.mrb[72].mxu0 %v2701_v56 }
 0x6e6   :  { %6140 = vmatpush1.bf16.msra.mxu0 %v7583_v16  ;;  %5668 = vmatprep.mubr.msk.f32.mxu0 %vm240_vm0, %v2696_v12 }
 0x6e7   :  { %6170 = vmatprep.subr.bf16.mxu1 %v6169_v19  ;;  %6142 = vmatprep.subr.bf16.mxu0 %v7586_v17  ;;  %v3672_v19 = vld [vmem:[#allocation13 + $0x300] sm:$0xff] }
 0x6e8   :  { %6172 = vmatpush1.bf16.msra.mxu1 %v6171_v2 }
 0x6ea   :  { %6144 = vmatpush1.bf16.msra.mxu0 %v7595_v33 }
 0x6eb   :  { %6146 = vmatprep.subr.bf16.mxu0 %v7598_v34 }
 0x6ee   :  { %6148 = vmatpush1.bf16.msra.mxu0 %v7607_v48 }
 0x6ef   :  { %6150 = vmatprep.subr.bf16.mxu0 %v7610_v49 }
 0x6f2   :  { %6152 = vmatpush1.bf16.msra.mxu0 %v7617_v59 }
 0x6f3   :  { %6154 = vmatprep.subr.bf16.mxu0 %v7620_v60 }
 0x6f6   :  { %6156 = vmatpush1.bf16.msra.mxu0 %v7628_v6 }
 0x6f7   :  { %6158 = vmatprep.subr.bf16.mxu0 %v7631_v10 }
 0x6fa   :  { %6160 = vmatpush1.bf16.msra.mxu0 %v7638_v23 }
 0x6fb   :  { %6162 = vmatprep.subr.bf16.mxu0 %v7641_v24 }
 0x6fe   :  { %6164 = vmatpush1.bf16.msra.mxu0 %v7649_v32 }
 0x6ff   :  { %6190 = vmatprep.subr.bf16.mxu0 %v7511_v3  ;;  %v2896_v3 = vld [vmem:[#allocation10 + $0x10] sm:$0xff] }
 0x700   :  { %5672 = vmatmul.mubr.msk.f32.vlgmr.msra.gmra.mrb[90].mxu1 %vm240_vm0, %v2896_v3  ;;  %v3676_v3 = vld [vmem:[#allocation13 + $0x320] sm:$0xff] }
 0x701   :  { %2869 = vmatmul.mubr.f32.vlgmr.msra.gmra.mrb[74].mxu0 %v2695_v21  ;;  %2974 = vmatprep.mubr.f32.mxu1 %v8640_v7 }
 0x702   :  { %5669 = vmatprep.mubr.msk.f32.mxu0 %vm240_vm0, %v2698_v20  ;;  %6192 = vmatpush1.bf16.msra.mxu0 %v8641_v35  ;;  %v2897_v35 = vld [vmem:[#allocation10 + $0x18] sm:$0xff] }
 0x703   :  { %6194 = vmatprep.subr.bf16.mxu0 %v8642_v43 }
 0x704   :  { %5673 = vmatmul.mubr.msk.f32.gmra.mrb[92].mxu1 %vm240_vm0, %v2897_v35  ;;  %v6291_v35 = vpack.c.bf16 %v3676_v3, %v3672_v19  ;;  %v3683_v19 = vld [vmem:[#allocation13 + $0x358] sm:$0xff] }
 0x705   :  { %2875 = vmatmul.mubr.f32.gmra.mrb[76].mxu0 %v2697_v13  ;;  %3051 = vmatprep.mubr.f32.mxu1 %v8640_v7  ;;  %v3687_v3 = vld [vmem:[#allocation13 + $0x378] sm:$0xff] }
 0x706   :  { %5670 = vmatprep.mubr.msk.f32.mxu0 %vm240_vm0, %v2700_v36  ;;  %6196 = vmatpush1.bf16.msra.mxu0 %v8643_v26  ;;  %v3665_v36 = vld [vmem:[#allocation13 + $0x2c8] sm:$0xff] }
 0x707   :  { %6198 = vmatprep.subr.bf16.mxu0 %v8644_v55 }
 0x709   :  { %2881 = vmatmul.mubr.f32.gmra.mrb[78].mxu0 %v2699_v42  ;;  %v6285_v42 = vpack.c.bf16 %v3669_v53, %v3665_v36  ;;  %v6325_v53 = vpack.c.bf16 %v3671_v31, %v3667_v5  ;;  %v3730_v31 = vld [vmem:[#allocation13 + $0x4d0] sm:$0xff] }
 0x70a   :  { %5671 = vmatprep.mubr.msk.f32.mxu0 %vm240_vm0, %v2702_v54  ;;  %6200 = vmatpush1.bf16.msra.mxu0 %v8645_v62  ;;  %v3677_v54 = vld [vmem:[#allocation13 + $0x328] sm:$0xff] }
 0x70b   :  { %6202 = vmatprep.subr.bf16.mxu0 %v8646_v11 }
 0x70d   :  { %2887 = vmatmul.mubr.f32.gmra.mrb[80].mxu0 %v2701_v56  ;;  %v3673_v56 = vld [vmem:[#allocation13 + $0x308] sm:$0xff] }
 0x70e   :  { %6204 = vmatpush1.bf16.msra.mxu0 %v8647_v30  ;;  %v6289_v2 = vpack.c.bf16 %v3677_v54, %v3673_v56 }
 0x70f   :  { %6206 = vmatprep.subr.bf16.mxu0 %v8648_v37 }
 0x712   :  { %6208 = vmatpush1.bf16.msra.mxu0 %v8649_v50 }
 0x713   :  { %6210 = vmatprep.subr.bf16.mxu0 %v8650_v15 }
 0x716   :  { %6212 = vmatpush1.bf16.msra.mxu0 %v8651_v61 }
 0x717   :  { %6214 = vmatprep.subr.bf16.mxu0 %v8652_v44 }
 0x71a   :  { %6216 = vmatpush1.bf16.msra.mxu0 %v8653_v45 }
 0x71b   :  { %6218 = vmatprep.subr.bf16.mxu0 %v8654_v28  ;;  %v2893_v28 = vld [vmem:[#allocation10] sm:$0xff] }
 0x71e   :  { %6220 = vmatpush1.bf16.msra.mxu0 %v8655_v39  ;;  %v2894_v39 = vld [vmem:[#allocation10 + $0x8] sm:$0xff] }
 0x71f   :  { %6222 = vmatprep.subr.bf16.mxu0 %v8656_v38 }
 0x722   :  { %6224 = vmatpush1.bf16.msra.mxu0 %v8657_v9 }
 0x723   :  { %6226 = vmatprep.subr.bf16.mxu0 %v8658_v22 }
 0x726   :  { %6228 = vmatpush1.bf16.msra.mxu0 %v8659_v25 }
 0x7ac   :  { %v2781_v43 = vpop.f32.mrb[66].mxu0 }
 0x7ad   :  { %v2783_v26 = vpop.f32.mrb[67].mxu0 }
 0x7b0   :  { %v2787_v55 = vpop.f32.mrb[68].mxu0 }
 0x7b1   :  { %v6175_v62 = vpack.c.bf16 %v2787_v55, %v2781_v43  ;;  %v2789_v11 = vpop.f32.mrb[69].mxu0  ;;  %v3681_v43 = vld [vmem:[#allocation13 + $0x348] sm:$0xff] }
 0x7b2   :  { %v6173_v30 = vpack.c.bf16 %v2789_v11, %v2783_v26  ;;  %v3685_v26 = vld [vmem:[#allocation13 + $0x368] sm:$0xff]  ;;  %v3684_v11 = vld [vmem:[#allocation13 + $0x360] sm:$0xff] }
 0x7b3   :  { %v6293_v55 = vpack.c.bf16 %v3685_v26, %v3681_v43  ;;  %v6333_v43 = vpack.c.bf16 %v3687_v3, %v3683_v19  ;;  %v3682_v26 = vld [vmem:[#allocation13 + $0x350] sm:$0xff] }
 0x7b4   :  { %v2793_v37 = vpop.f32.mrb[70].mxu0  ;;  %6174 = vmatprep.subr.bf16.mxu1 %v6173_v30 }
 0x7b5   :  { %v2795_v50 = vpop.f32.mrb[71].mxu0  ;;  %6176 = vmatpush1.bf16.msra.mxu1 %v6175_v62  ;;  %v3680_v62 = vld [vmem:[#allocation13 + $0x340] sm:$0xff] }
 0x7b6   :  { %v6295_v30 = vpack.c.bf16 %v3684_v11, %v3680_v62  ;;  %v3691_v62 = vld [vmem:[#allocation13 + $0x398] sm:$0xff] }
 0x7b7   :  { %v3695_v11 = vld [vmem:[#allocation13 + $0x3b8] sm:$0xff] }
 0x7b8   :  { %v2799_v15 = vpop.f32.mrb[72].mxu0 }
 0x7b9   :  { %v6179_v61 = vpack.c.bf16 %v2799_v15, %v2793_v37  ;;  %v2801_v44 = vpop.f32.mrb[73].mxu0  ;;  %v3689_v37 = vld [vmem:[#allocation13 + $0x388] sm:$0xff] }
 0x7ba   :  { %v6177_v45 = vpack.c.bf16 %v2801_v44, %v2795_v50  ;;  %v3693_v50 = vld [vmem:[#allocation13 + $0x3a8] sm:$0xff]  ;;  %v3692_v44 = vld [vmem:[#allocation13 + $0x3a0] sm:$0xff] }
 0x7bb   :  { %v6297_v15 = vpack.c.bf16 %v3693_v50, %v3689_v37  ;;  %v6337_v37 = vpack.c.bf16 %v3695_v11, %v3691_v62  ;;  %v3690_v50 = vld [vmem:[#allocation13 + $0x390] sm:$0xff] }
 0x7bc   :  { %6178 = vmatprep.subr.bf16.mxu1 %v6177_v45  ;;  %v3581_v62 = vld [vmem:[#allocation13 + $0x30] sm:$0xff] }
 0x7bd   :  { %6180 = vmatpush1.bf16.msra.mxu1 %v6179_v61  ;;  %v3688_v61 = vld [vmem:[#allocation13 + $0x380] sm:$0xff] }
 0x7be   :  { %v6299_v45 = vpack.c.bf16 %v3692_v44, %v3688_v61  ;;  %v3699_v61 = vld [vmem:[#allocation13 + $0x3d8] sm:$0xff] }
 0x7bf   :  { %v3703_v44 = vld [vmem:[#allocation13 + $0x3f8] sm:$0xff] }
 0x7c0   :  { %5674 = vmatmul.mubr.msk.f32.vlgmr.msra.gmra.mrb[90].mxu1 %vm240_vm0, %v2893_v28  ;;  %v3697_v28 = vld [vmem:[#allocation13 + $0x3c8] sm:$0xff] }
 0x7c1   :  { %3057 = vmatprep.mubr.f32.mxu1 %v8640_v7 }
 0x7c4   :  { %5675 = vmatmul.mubr.msk.f32.gmra.mrb[92].mxu1 %vm240_vm0, %v2894_v39  ;;  %v3701_v39 = vld [vmem:[#allocation13 + $0x3e8] sm:$0xff] }
 0x7c5   :  { %3137 = vmatprep.mubr.f32.mxu1 %v8640_v7 }
 0x7d4   :  { %v2870_v38 = vpop.f32.mrb[74].mxu0 }
 0x7d5   :  { %v2872_v9 = vpop.f32.mrb[75].mxu0 }
 0x7d8   :  { %v2876_v22 = vpop.f32.mrb[76].mxu0 }
 0x7d9   :  { %v6183_v25 = vpack.c.bf16 %v2876_v22, %v2870_v38  ;;  %v2878_v12 = vpop.f32.mrb[77].mxu0  ;;  %v6301_v38 = vpack.c.bf16 %v3701_v39, %v3697_v28  ;;  %v3700_v22 = vld [vmem:[#allocation13 + $0x3e0] sm:$0xff]  ;;  %v6341_v28 = vpack.c.bf16 %v3703_v44, %v3699_v61  ;;  %v3698_v39 = vld [vmem:[#allocation13 + $0x3d0] sm:$0xff] }
 0x7da   :  { %v6181_v21 = vpack.c.bf16 %v2878_v12, %v2872_v9  ;;  %v3696_v9 = vld [vmem:[#allocation13 + $0x3c0] sm:$0xff]  ;;  %v3705_v12 = vld [vmem:[#allocation13 + $0x408] sm:$0xff] }
 0x7dc   :  { %v2882_v8 = vpop.f32.mrb[78].mxu0  ;;  %6182 = vmatprep.subr.bf16.mxu1 %v6181_v21  ;;  %v3709_v21 = vld [vmem:[#allocation13 + $0x428] sm:$0xff] }
 0x7dd   :  { %v2884_v13 = vpop.f32.mrb[79].mxu0  ;;  %6184 = vmatpush1.bf16.msra.mxu1 %v6183_v25  ;;  %v6303_v25 = vpack.c.bf16 %v3700_v22, %v3696_v9  ;;  %v3707_v9 = vld [vmem:[#allocation13 + $0x418] sm:$0xff] }
 0x7de   :  { %v3711_v22 = vld [vmem:[#allocation13 + $0x438] sm:$0xff] }
 0x7e0   :  { %v2888_v14 = vpop.f32.mrb[80].mxu0 }
 0x7e1   :  { %v6187_v20 = vpack.c.bf16 %v2888_v14, %v2882_v8  ;;  %v2890_v18 = vpop.f32.mrb[81].mxu0  ;;  %v6305_v8 = vpack.c.bf16 %v3709_v21, %v3705_v12  ;;  %v3708_v14 = vld [vmem:[#allocation13 + $0x420] sm:$0xff]  ;;  %v6345_v12 = vpack.c.bf16 %v3711_v22, %v3707_v9  ;;  %v3706_v21 = vld [vmem:[#allocation13 + $0x410] sm:$0xff] }
 0x7e2   :  { %v6185_v29 = vpack.c.bf16 %v2890_v18, %v2884_v13  ;;  %v3704_v13 = vld [vmem:[#allocation13 + $0x400] sm:$0xff]  ;;  %v3713_v18 = vld [vmem:[#allocation13 + $0x448] sm:$0xff]  ;;  %v3585_v9 = vld [vmem:[#allocation13 + $0x50] sm:$0xff] }
 0x7e3   :  { %v3589_v22 = vld [vmem:[#allocation13 + $0x70] sm:$0xff] }
 0x7e4   :  { %6186 = vmatprep.subr.bf16.mxu1 %v6185_v29  ;;  %v3717_v29 = vld [vmem:[#allocation13 + $0x468] sm:$0xff] }
 0x7e5   :  { %6188 = vmatpush1.bf16.msra.mxu1 %v6187_v20  ;;  %v6307_v20 = vpack.c.bf16 %v3708_v14, %v3704_v13  ;;  %v3715_v13 = vld [vmem:[#allocation13 + $0x458] sm:$0xff] }
 0x7e6   :  { %6230 = vmatprep.subr.bf16.mxu1 %v8660_v58  ;;  %v3719_v14 = vld [vmem:[#allocation13 + $0x478] sm:$0xff] }
 0x7e8   :  { %5676 = vmatmul.mubr.msk.f32.vlgmr.msra.gmra.mrb[90].mxu1 %vm240_vm0, %v3065_v46  ;;  %v6309_v46 = vpack.c.bf16 %v3717_v29, %v3713_v18  ;;  %v6349_v18 = vpack.c.bf16 %v3719_v14, %v3715_v13  ;;  %v3714_v29 = vld [vmem:[#allocation13 + $0x450] sm:$0xff]  ;;  %v3594_v13 = vld [vmem:[#allocation13 + $0x98] sm:$0xff] }
 0x7e9   :  { %3143 = vmatprep.mubr.f32.mxu1 %v8640_v7  ;;  %6232 = vmatpush1.bf16.msra.mxu1 %v7550_v40  ;;  %v3159_v40 = vpop.permute.xlu0 %3158  ;;  %v3598_v14 = vld [vmem:[#allocation13 + $0xb8] sm:$0xff] }
 0x7ea   :  { %6234 = vmatprep.subr.bf16.mxu1 %v7552_v41 }
 0x7ec   :  { %5677 = vmatmul.mubr.msk.f32.gmra.mrb[92].mxu1 %vm240_vm0, %v3066_v4  ;;  %v3712_v4 = vld [vmem:[#allocation13 + $0x440] sm:$0xff] }
 0x7ed   :  { %6236 = vmatpush1.bf16.msra.mxu1 %v7559_v51 }
 0x7ee   :  { %6238 = vmatprep.subr.bf16.mxu1 %v7562_v52 }
 0x7f1   :  { %6240 = vmatpush1.bf16.msra.mxu1 %v7571_v63 }
 0x7f2   :  { %6242 = vmatprep.subr.bf16.mxu1 %v7574_v0  ;;  %v3164_v0 = vpop.permute.xlu1 %3163 }
 0x7f5   :  { %6244 = vmatpush1.bf16.msra.mxu1 %v7583_v16 }
 0x7f6   :  { %6246 = vmatprep.subr.bf16.mxu1 %v7586_v17 }
 0x7f9   :  { %6248 = vmatpush1.bf16.msra.mxu1 %v7595_v33 }
 0x7fa   :  { %6250 = vmatprep.subr.bf16.mxu1 %v7598_v34 }
 0x7fd   :  { %6252 = vmatpush1.bf16.msra.mxu1 %v7607_v48 }
 0x7fe   :  { %6254 = vmatprep.subr.bf16.mxu1 %v7610_v49 }
 0x801   :  { %6256 = vmatpush1.bf16.msra.mxu1 %v7617_v59 }
 0x802   :  { %6258 = vmatprep.subr.bf16.mxu1 %v7620_v60 }
 0x805   :  { %6260 = vmatpush1.bf16.msra.mxu1 %v7628_v6 }
 0x806   :  { %6262 = vmatprep.subr.bf16.mxu1 %v7631_v10 }
 0x809   :  { %6264 = vmatpush1.bf16.msra.mxu1 %v7638_v23  ;;  %v3336_v23 = vld [vmem:[#allocation11 + $0x8] sm:$0xff] }
 0x80a   :  { %6266 = vmatprep.subr.bf16.mxu1 %v7641_v24  ;;  %v3657_v24 = vld [vmem:[#allocation13 + $0x288] sm:$0xff] }
 0x80d   :  { %6268 = vmatpush1.bf16.msra.mxu1 %v7649_v32  ;;  %v3661_v32 = vld [vmem:[#allocation13 + $0x2a8] sm:$0xff] }
 0x80e   :  { %v6281_v58 = vpack.c.bf16 %v3661_v32, %v3657_v24  ;;  %v3658_v32 = vld [vmem:[#allocation13 + $0x290] sm:$0xff] }
 0x810   :  { %6282 = vmatprep.subr.bf16.mxu1 %v6281_v58  ;;  %v3662_v58 = vld [vmem:[#allocation13 + $0x2b0] sm:$0xff] }
 0x811   :  { %v6323_v36 = vpack.c.bf16 %v3662_v58, %v3658_v32  ;;  %v3732_v32 = vld [vmem:[#allocation13 + $0x4e0] sm:$0xff] }
 0x8bb   :  { %v3139_v41 = vpop.f32.mrb[90].mxu1 }
 0x8bc   :  { %v3166_v51 = vadd.f32 %v3159_v40, %v3139_v41  ;;  %v3141_v52 = vpop.f32.mrb[91].mxu1 }
 0x8bd   :  { %v3167_v63 = vadd.f32 %v3159_v40, %v3141_v52  ;;  %v3716_v40 = vld [vmem:[#allocation13 + $0x460] sm:$0xff] }
 0x8be   :  { %v3170_v33 = vmax.f32 %v3166_v51, 0.0  ;;  %v6311_v41 = vpack.c.bf16 %v3716_v40, %v3712_v4  ;;  %v3721_v40 = vld [vmem:[#allocation13 + $0x488] sm:$0xff] }
 0x8bf   :  { %v3171_v16 = vmax.f32 %v3167_v63, 0.0  ;;  %v3145_v17 = vpop.f32.mrb[92].mxu1 }
 0x8c0   :  { %v3168_v34 = vadd.f32 %v3164_v0, %v3145_v17  ;;  %v3147_v48 = vpop.f32.mrb[93].mxu1 }
 0x8c1   :  { %v3169_v49 = vadd.f32 %v3164_v0, %v3147_v48  ;;  %5678 = vmatprep.mubr.msk.f32.mxu0 %vm240_vm0, %v3171_v16  ;;  %5680 = vmatprep.mubr.msk.f32.mxu1 %vm240_vm0, %v3171_v16 }
 0x8c2   :  { %v3172_v59 = vmax.f32 %v3168_v34, 0.0  ;;  %3245 = vmatmul.mubr.f32.vlgmr.msra.gmra.mrb[82].mxu0 %v3170_v33  ;;  %3322 = vmatmul.mubr.f32.vlgmr.msra.gmra.mrb[94].mxu1 %v3170_v33 }
 0x8c3   :  { %v3173_v60 = vmax.f32 %v3169_v49, 0.0  ;;  %6284 = vmatpush1.bf16.msra.mxu1 %v6283_v57  ;;  %v3487_v57 = vld [vmem:[#allocation11 + $0x10] sm:$0xff] }
 0x8c4   :  { %v6271_v6 = vpack.c.bf16 %v3172_v59, %v3170_v33  ;;  %6286 = vmatprep.subr.bf16.mxu1 %v6285_v42  ;;  %v3666_v42 = vld [vmem:[#allocation13 + $0x2d0] sm:$0xff] }
 0x8c5   :  { %5679 = vmatprep.mubr.msk.f32.mxu0 %vm240_vm0, %v3173_v60  ;;  %5681 = vmatprep.mubr.msk.f32.mxu1 %vm240_vm0, %v3173_v60  ;;  %v6269_v10 = vpack.c.bf16 %v3173_v60, %v3171_v16  ;;  %v6327_v56 = vpack.c.bf16 %v3670_v27, %v3666_v42  ;;  %v3580_v42 = vld [vmem:[#allocation13 + $0x28] sm:$0xff]  ;;  %v3578_v27 = vld [vmem:[#allocation13 + $0x18] sm:$0xff] }
 0x8c6   :  { %3251 = vmatmul.mubr.f32.gmra.mrb[84].mxu0 %v3172_v59  ;;  %3328 = vmatmul.mubr.f32.gmra.mrb[96].mxu1 %v3172_v59 }
 0x8c7   :  { %6270 = vmatprep.subr.bf16.mxu0 %v6269_v10  ;;  %3405 = vmatprep.mubr.f32.mxu0 %v8640_v7  ;;  %v3663_v10 = vld [vmem:[#allocation13 + $0x2b8] sm:$0xff] }
 0x8c8   :  { %6272 = vmatpush1.bf16.msra.mxu0 %v6271_v6  ;;  %6288 = vmatpush1.bf16.msra.mxu1 %v6287_v1  ;;  %v3659_v6 = vld [vmem:[#allocation13 + $0x298] sm:$0xff] }
 0x8c9   :  { %6290 = vmatprep.subr.bf16.mxu1 %v6289_v2  ;;  %v6321_v24 = vpack.c.bf16 %v3663_v10, %v3659_v6  ;;  %v3679_v1 = vld [vmem:[#allocation13 + $0x338] sm:$0xff]  ;;  %v3674_v2 = vld [vmem:[#allocation13 + $0x310] sm:$0xff] }
 0x8ca   :  { %v6329_v54 = vpack.c.bf16 %v3679_v1, %v3675_v47  ;;  %v3731_v6 = vld [vmem:[#allocation13 + $0x4d8] sm:$0xff] }
 0x8cb   :  { %5682 = vmatmul.mubr.msk.f32.vlgmr.msra.gmra.mrb[86].mxu0 %vm3337_vm3, %v3336_v23  ;;  %v3334_v23 = vld [vmem:[#allocation11] sm:$0xff]  ;;  %v3582_v1 = vld [vmem:[#allocation13 + $0x38] sm:$0xff] }
 0x8cc   :  { %3479 = vmatprep.mubr.f32.mxu0 %v8640_v7  ;;  %6292 = vmatpush1.bf16.msra.mxu1 %v6291_v35 }
 0x8cd   :  { %6294 = vmatprep.subr.bf16.mxu1 %v6293_v55  ;;  %v3686_v55 = vld [vmem:[#allocation13 + $0x370] sm:$0xff] }
 0x8d0   :  { %6296 = vmatpush1.bf16.msra.mxu1 %v6295_v30  ;;  %v6335_v30 = vpack.c.bf16 %v3686_v55, %v3682_v26  ;;  %v3579_v26 = vld [vmem:[#allocation13 + $0x20] sm:$0xff]  ;;  %v3577_v55 = vld [vmem:[#allocation13 + $0x10] sm:$0xff] }
 0x8d1   :  { %6298 = vmatprep.subr.bf16.mxu1 %v6297_v15  ;;  %v3694_v15 = vld [vmem:[#allocation13 + $0x3b0] sm:$0xff] }
 0x8d4   :  { %6300 = vmatpush1.bf16.msra.mxu1 %v6299_v45  ;;  %v6339_v45 = vpack.c.bf16 %v3694_v15, %v3690_v50  ;;  %v3586_v50 = vld [vmem:[#allocation13 + $0x58] sm:$0xff] }
 0x8d5   :  { %6302 = vmatprep.subr.bf16.mxu1 %v6301_v38  ;;  %v3702_v38 = vld [vmem:[#allocation13 + $0x3f0] sm:$0xff]  ;;  %v3590_v15 = vld [vmem:[#allocation13 + $0x78] sm:$0xff] }
 0x8d8   :  { %6304 = vmatpush1.bf16.msra.mxu1 %v6303_v25  ;;  %v6343_v25 = vpack.c.bf16 %v3702_v38, %v3698_v39  ;;  %v3587_v39 = vld [vmem:[#allocation13 + $0x60] sm:$0xff] }
 0x8d9   :  { %6306 = vmatprep.subr.bf16.mxu1 %v6305_v8  ;;  %v3710_v8 = vld [vmem:[#allocation13 + $0x430] sm:$0xff] }
 0x8dc   :  { %6308 = vmatpush1.bf16.msra.mxu1 %v6307_v20  ;;  %v6347_v20 = vpack.c.bf16 %v3710_v8, %v3706_v21  ;;  %v6405_v21 = vpack.c.bf16 %v3590_v15, %v3586_v50  ;;  %v3596_v8 = vld [vmem:[#allocation13 + $0xa8] sm:$0xff]  ;;  %v3626_v50 = vld [vmem:[#allocation13 + $0x198] sm:$0xff] }
 0x8dd   :  { %6310 = vmatprep.subr.bf16.mxu1 %v6309_v46  ;;  %v3718_v46 = vld [vmem:[#allocation13 + $0x470] sm:$0xff]  ;;  %v3630_v15 = vld [vmem:[#allocation13 + $0x1b8] sm:$0xff] }
 0x8de   :  { %v6351_v4 = vpack.c.bf16 %v3718_v46, %v3714_v29  ;;  %v3591_v29 = vld [vmem:[#allocation13 + $0x80] sm:$0xff] }
 0x8df   :  { %v3595_v46 = vld [vmem:[#allocation13 + $0xa0] sm:$0xff] }
 0x8e0   :  { %6312 = vmatpush1.bf16.msra.mxu1 %v6311_v41  ;;  %v3725_v41 = vld [vmem:[#allocation13 + $0x4a8] sm:$0xff] }
 0x995   :  { %v3246_v51 = vpop.f32.mrb[82].mxu0  ;;  %v3323_v52 = vpop.f32.mrb[94].mxu1 }
 0x996   :  { %v3248_v63 = vpop.f32.mrb[83].mxu0  ;;  %v3325_v0 = vpop.f32.mrb[95].mxu1 }
 0x999   :  { %v3252_v16 = vpop.f32.mrb[84].mxu0  ;;  %v3329_v17 = vpop.f32.mrb[96].mxu1 }
 0x99a   :  { %v6275_v33 = vpack.c.bf16 %v3252_v16, %v3246_v51  ;;  %v6279_v34 = vpack.c.bf16 %v3329_v17, %v3323_v52  ;;  %v3254_v48 = vpop.f32.mrb[85].mxu0  ;;  %v3331_v49 = vpop.f32.mrb[97].mxu1  ;;  %v3723_v51 = vld [vmem:[#allocation13 + $0x498] sm:$0xff]  ;;  %v6313_v52 = vpack.c.bf16 %v3725_v41, %v3721_v40  ;;  %v3724_v16 = vld [vmem:[#allocation13 + $0x4a0] sm:$0xff]  ;;  %v6409_v40 = vpack.c.bf16 %v3598_v14, %v3594_v13  ;;  %v3593_v41 = vld [vmem:[#allocation13 + $0x90] sm:$0xff] }
 0x99b   :  { %v6273_v59 = vpack.c.bf16 %v3254_v48, %v3248_v63  ;;  %v6277_v60 = vpack.c.bf16 %v3331_v49, %v3325_v0  ;;  %v3727_v63 = vld [vmem:[#allocation13 + $0x4b8] sm:$0xff]  ;;  %v3720_v0 = vld [vmem:[#allocation13 + $0x480] sm:$0xff]  ;;  %v3726_v48 = vld [vmem:[#allocation13 + $0x4b0] sm:$0xff] }
 0x99c   :  { %v6353_v17 = vpack.c.bf16 %v3727_v63, %v3723_v51  ;;  %6314 = vmatprep.subr.bf16.mxu1 %v6313_v52  ;;  %v3597_v51 = vld [vmem:[#allocation13 + $0xb0] sm:$0xff]  ;;  %v3600_v52 = vld [vmem:[#allocation13 + $0xc8] sm:$0xff] }
 0x99d   :  { %6274 = vmatprep.subr.bf16.mxu0 %v6273_v59  ;;  %v3729_v59 = vld [vmem:[#allocation13 + $0x4c8] sm:$0xff] }
 0x99e   :  { %6276 = vmatpush1.bf16.msra.mxu0 %v6275_v33  ;;  %v6315_v33 = vpack.c.bf16 %v3724_v16, %v3720_v0  ;;  %v3604_v63 = vld [vmem:[#allocation13 + $0xe8] sm:$0xff]  ;;  %v3602_v0 = vld [vmem:[#allocation13 + $0xd8] sm:$0xff] }
 0x99f   :  { %6278 = vmatprep.subr.bf16.mxu0 %v6277_v60  ;;  %v3733_v60 = vld [vmem:[#allocation13 + $0x4e8] sm:$0xff]  ;;  %v3606_v16 = vld [vmem:[#allocation13 + $0xf8] sm:$0xff] }
 0x9a0   :  { %6316 = vmatpush1.bf16.msra.mxu1 %v6315_v33  ;;  %v6317_v10 = vpack.c.bf16 %v3733_v60, %v3729_v59  ;;  %v6411_v33 = vpack.c.bf16 %v3597_v51, %v3593_v41  ;;  %v6413_v59 = vpack.c.bf16 %v3606_v16, %v3602_v0  ;;  %v3601_v60 = vld [vmem:[#allocation13 + $0xd0] sm:$0xff]  ;;  %v3640_v41 = vld [vmem:[#allocation13 + $0x208] sm:$0xff] }
 0x9a1   :  { %5683 = vmatmul.mubr.msk.f32.vlgmr.msra.gmra.mrb[86].mxu0 %vm3337_vm3, %v3334_v23  ;;  %v3735_v23 = vld [vmem:[#allocation13 + $0x4f8] sm:$0xff]  ;;  %v3644_v51 = vld [vmem:[#allocation13 + $0x228] sm:$0xff] }
 0x9a2   :  { %6280 = vmatpush1.bf16.msra.mxu0 %v6279_v34  ;;  %3555 = vmatprep.mubr.f32.mxu0 %v8640_v7  ;;  %v3678_v7 = vld [vmem:[#allocation13 + $0x330] sm:$0xff]  ;;  %v6357_v58 = vpack.c.bf16 %v3735_v23, %v3731_v6  ;;  %v3612_v23 = vld [vmem:[#allocation13 + $0x128] sm:$0xff] }
 0x9a3   :  { %6322 = vmatprep.subr.bf16.mxu0 %v6321_v24  ;;  %v6331_v35 = vpack.c.bf16 %v3678_v7, %v3674_v2  ;;  %v3722_v34 = vld [vmem:[#allocation13 + $0x490] sm:$0xff]  ;;  %v3728_v24 = vld [vmem:[#allocation13 + $0x4c0] sm:$0xff]  ;;  %6318 = vmatprep.subr.bf16.mxu1 %v6317_v10  ;;  %v3608_v10 = vld [vmem:[#allocation13 + $0x108] sm:$0xff] }
 0x9a4   :  { %v6355_v49 = vpack.c.bf16 %v3726_v48, %v3722_v34  ;;  %v6319_v5 = vpack.c.bf16 %v3732_v32, %v3728_v24  ;;  %v3599_v34 = vld [vmem:[#allocation13 + $0xc0] sm:$0xff]  ;;  %v3605_v6 = vld [vmem:[#allocation13 + $0xf0] sm:$0xff]  ;;  %v3610_v24 = vld [vmem:[#allocation13 + $0x118] sm:$0xff] }
 0x9a5   :  { %v3603_v48 = vld [vmem:[#allocation13 + $0xe0] sm:$0xff]  ;;  %v3614_v32 = vld [vmem:[#allocation13 + $0x138] sm:$0xff] }
 0x9a6   :  { %6320 = vmatpush1.bf16.msra.mxu1 %v6319_v5  ;;  %v6415_v5 = vpack.c.bf16 %v3605_v6, %v3601_v60  ;;  %v3648_v60 = vld [vmem:[#allocation13 + $0x248] sm:$0xff] }
 0x9a7   :  { %v3652_v6 = vld [vmem:[#allocation13 + $0x268] sm:$0xff] }
 0x9a9   :  { %5684 = vmatmul.mubr.msk.f32.vlgmr.msra.gmra.mrb[86].mxu0 %vm3337_vm3, %v3487_v57  ;;  %v3734_v57 = vld [vmem:[#allocation13 + $0x4f0] sm:$0xff] }
 0x9aa   :  { %6324 = vmatpush1.bf16.msra.mxu0 %v6323_v36  ;;  %v6359_v36 = vpack.c.bf16 %v3734_v57, %v3730_v31  ;;  %v3607_v31 = vld [vmem:[#allocation13 + $0x100] sm:$0xff] }
 0x9ab   :  { %6326 = vmatprep.subr.bf16.mxu0 %v6325_v53  ;;  %v3576_v53 = vld [vmem:[#allocation13 + $0x8] sm:$0xff]  ;;  %v3611_v57 = vld [vmem:[#allocation13 + $0x120] sm:$0xff] }
 0x9ac   :  { %v6361_v47 = vpack.c.bf16 %v3580_v42, %v3576_v53  ;;  %v6417_v53 = vpack.c.bf16 %v3614_v32, %v3610_v24  ;;  %v3609_v42 = vld [vmem:[#allocation13 + $0x110] sm:$0xff] }
 0x9ae   :  { %6328 = vmatpush1.bf16.msra.mxu0 %v6327_v56  ;;  %v6401_v56 = vpack.c.bf16 %v3582_v1, %v3578_v27  ;;  %6362 = vmatprep.subr.bf16.mxu1 %v6361_v47  ;;  %v3613_v27 = vld [vmem:[#allocation13 + $0x130] sm:$0xff]  ;;  %v3616_v47 = vld [vmem:[#allocation13 + $0x148] sm:$0xff] }
 0x9af   :  { %6330 = vmatprep.subr.bf16.mxu0 %v6329_v54  ;;  %v3568_v54 = vpop.permute.xlu0 %3567  ;;  %v3620_v1 = vld [vmem:[#allocation13 + $0x168] sm:$0xff] }
 0x9b2   :  { %6332 = vmatpush1.bf16.msra.mxu0 %v6331_v35  ;;  %v3575_v35 = vld [vmem:[#allocation13] sm:$0xff] }
 0x9b3   :  { %6334 = vmatprep.subr.bf16.mxu0 %v6333_v43  ;;  %v6363_v44 = vpack.c.bf16 %v3579_v26, %v3575_v35  ;;  %v6381_v35 = vpack.c.bf16 %v3620_v1, %v3616_v47  ;;  %v4033_v47 = vld [vmem:[#allocation13 + $0x518] sm:$0xff] }
 0x9b4   :  { %v4037_v1 = vld [vmem:[#allocation13 + $0x538] sm:$0xff] }
 0x9b6   :  { %6336 = vmatpush1.bf16.msra.mxu0 %v6335_v30  ;;  %v3584_v30 = vld [vmem:[#allocation13 + $0x48] sm:$0xff] }
 0x9b7   :  { %6338 = vmatprep.subr.bf16.mxu0 %v6337_v37  ;;  %v3588_v37 = vld [vmem:[#allocation13 + $0x68] sm:$0xff] }
 0x9ba   :  { %6340 = vmatpush1.bf16.msra.mxu0 %v6339_v45  ;;  %v6403_v45 = vpack.c.bf16 %v3581_v62, %v3577_v55  ;;  %v3617_v55 = vld [vmem:[#allocation13 + $0x150] sm:$0xff] }
 0x9bb   :  { %6342 = vmatprep.subr.bf16.mxu0 %v6341_v28  ;;  %v3583_v28 = vld [vmem:[#allocation13 + $0x40] sm:$0xff]  ;;  %v3621_v62 = vld [vmem:[#allocation13 + $0x170] sm:$0xff] }
 0x9be   :  { %6344 = vmatpush1.bf16.msra.mxu0 %v6343_v25  ;;  %v3592_v25 = vld [vmem:[#allocation13 + $0x88] sm:$0xff] }
 0x9bf   :  { %6346 = vmatprep.subr.bf16.mxu0 %v6345_v12  ;;  %v6365_v12 = vpack.c.bf16 %v3588_v37, %v3584_v30  ;;  %v3624_v30 = vld [vmem:[#allocation13 + $0x188] sm:$0xff] }
 0x9c0   :  { %v3628_v37 = vld [vmem:[#allocation13 + $0x1a8] sm:$0xff] }
 0x9c2   :  { %6348 = vmatpush1.bf16.msra.mxu0 %v6347_v20  ;;  %v6367_v20 = vpack.c.bf16 %v3587_v39, %v3583_v28  ;;  %v3627_v28 = vld [vmem:[#allocation13 + $0x1a0] sm:$0xff]  ;;  %v6385_v39 = vpack.c.bf16 %v3628_v37, %v3624_v30  ;;  %v4041_v30 = vld [vmem:[#allocation13 + $0x558] sm:$0xff] }
 0x9c3   :  { %6350 = vmatprep.subr.bf16.mxu0 %v6349_v18  ;;  %v6407_v18 = vpack.c.bf16 %v3589_v22, %v3585_v9  ;;  %v3625_v9 = vld [vmem:[#allocation13 + $0x190] sm:$0xff]  ;;  %v4045_v37 = vld [vmem:[#allocation13 + $0x578] sm:$0xff] }
 0x9c4   :  { %v3629_v22 = vld [vmem:[#allocation13 + $0x1b0] sm:$0xff] }
 0x9c5   :  { %v6427_v14 = vpack.c.bf16 %v3629_v22, %v3625_v9  ;;  %v4044_v9 = vld [vmem:[#allocation13 + $0x570] sm:$0xff]  ;;  %v4047_v22 = vld [vmem:[#allocation13 + $0x588] sm:$0xff] }
 0x9c6   :  { %6352 = vmatpush1.bf16.msra.mxu0 %v6351_v4  ;;  %v6369_v4 = vpack.c.bf16 %v3596_v8, %v3592_v25  ;;  %v3632_v25 = vld [vmem:[#allocation13 + $0x1c8] sm:$0xff]  ;;  %v3638_v8 = vld [vmem:[#allocation13 + $0x1f8] sm:$0xff] }
 0x9c7   :  { %6354 = vmatprep.subr.bf16.mxu0 %v6353_v17  ;;  %v6371_v17 = vpack.c.bf16 %v3595_v46, %v3591_v29 }
 0x9ca   :  { %6356 = vmatpush1.bf16.msra.mxu0 %v6355_v49  ;;  %v6373_v49 = vpack.c.bf16 %v3604_v63, %v3600_v52  ;;  %v3642_v52 = vld [vmem:[#allocation13 + $0x218] sm:$0xff] }
 0x9cb   :  { %6358 = vmatprep.subr.bf16.mxu0 %v6357_v58  ;;  %v6375_v58 = vpack.c.bf16 %v3603_v48, %v3599_v34  ;;  %v3646_v63 = vld [vmem:[#allocation13 + $0x238] sm:$0xff]  ;;  %v6393_v34 = vpack.c.bf16 %v3644_v51, %v3640_v41  ;;  %v4059_v41 = vld [vmem:[#allocation13 + $0x5e8] sm:$0xff] }
 0x9cc   :  { %v6433_v48 = vpack.c.bf16 %v3646_v63, %v3642_v52  ;;  %v4057_v51 = vld [vmem:[#allocation13 + $0x5d8] sm:$0xff] }
 0x9cd   :  { %v4061_v52 = vld [vmem:[#allocation13 + $0x5f8] sm:$0xff] }
 0x9ce   :  { %6360 = vmatpush1.bf16.msra.mxu0 %v6359_v36  ;;  %v6377_v36 = vpack.c.bf16 %v3612_v23, %v3608_v10  ;;  %v3650_v10 = vld [vmem:[#allocation13 + $0x258] sm:$0xff] }
 0x9cf   :  { %6402 = vmatprep.subr.bf16.mxu0 %v6401_v56  ;;  %v3618_v56 = vld [vmem:[#allocation13 + $0x158] sm:$0xff] }
 0x9d0   :  { %v3654_v23 = vld [vmem:[#allocation13 + $0x278] sm:$0xff] }
 0xa7c   :  { %v3557_v2 = vpop.f32.mrb[86].mxu0 }
 0xa7d   :  { %v3570_v7 = vadd.f32 %v3568_v54, %v3557_v2  ;;  %v3559_v19 = vpop.f32.mrb[87].mxu0  ;;  %v6379_v2 = vpack.c.bf16 %v3611_v57, %v3607_v31  ;;  %v6397_v31 = vpack.c.bf16 %v3652_v6, %v3648_v60  ;;  %v6437_v57 = vpack.c.bf16 %v3654_v23, %v3650_v10  ;;  %v4067_v60 = vld [vmem:[#allocation13 + $0x628] sm:$0xff]  ;;  %v4065_v6 = vld [vmem:[#allocation13 + $0x618] sm:$0xff] }
 0xa7e   :  { %v3571_v3 = vadd.f32 %v3568_v54, %v3559_v19  ;;  %v3622_v54 = vld [vmem:[#allocation13 + $0x178] sm:$0xff]  ;;  %v3615_v19 = vld [vmem:[#allocation13 + $0x140] sm:$0xff] }
 0xa7f   :  { %v8491_v43 = vmax.f32 %v3570_v7, 0.0  ;;  %v6419_v7 = vpack.c.bf16 %v3613_v27, %v3609_v42  ;;  %v6421_v26 = vpack.c.bf16 %v3622_v54, %v3618_v56  ;;  %v4031_v42 = vld [vmem:[#allocation13 + $0x508] sm:$0xff]  ;;  %v4069_v10 = vld [vmem:[#allocation13 + $0x638] sm:$0xff] }
 0xa80   :  { %v8493_v11 = vmax.f32 %v3571_v3, 0.0  ;;  %v3619_v3 = vld [vmem:[#allocation13 + $0x160] sm:$0xff]  ;;  %v4035_v27 = vld [vmem:[#allocation13 + $0x528] sm:$0xff] }
 0xa81   :  { %v3738_v38 = vrot.slane %v8491_v43, 1 }
 0xa82   :  { %v3739_v61 = vrot.slane %v8493_v11, 1 }
 0xa84   :  { %5685 = vmatprep.mubr.msk.f32.mxu1 %vm240_vm0, %v3739_v61  ;;  %5686 = vmatprep.mubr.msk.f32.mxu0 %vm240_vm0, %v3739_v61  ;;  %v6383_v61 = vpack.c.bf16 %v3619_v3, %v3615_v19  ;;  %v4030_v19 = vld [vmem:[#allocation13 + $0x500] sm:$0xff] }
 0xa85   :  { %3808 = vmatmul.mubr.f32.vlgmr.msra.gmra.mrb[98].mxu1 %v3738_v38  ;;  %3879 = vmatmul.mubr.f32.vlgmr.msra.gmra.mrb[88].mxu0 %v3738_v38  ;;  %v6425_v38 = vpack.c.bf16 %v3630_v15, %v3626_v50  ;;  %v4034_v3 = vld [vmem:[#allocation13 + $0x520] sm:$0xff] }
 0xa86   :  { %6364 = vmatpush1.bf16.msra.mxu1 %v6363_v44  ;;  %6404 = vmatpush1.bf16.msra.mxu0 %v6403_v45  ;;  %v6423_v44 = vpack.c.bf16 %v3621_v62, %v3617_v55  ;;  %v3623_v45 = vld [vmem:[#allocation13 + $0x180] sm:$0xff]  ;;  %v4039_v55 = vld [vmem:[#allocation13 + $0x548] sm:$0xff]  ;;  %v6443_v50 = vpack.c.bf16 %v4034_v3, %v4030_v19  ;;  %v4072_v19 = vld [vmem:[#allocation13 + $0x650] sm:$0xff] }
 0xa87   :  { %5687 = vmatprep.mubr.msk.f32.mxu1 %vm240_vm0, %v8493_v11  ;;  %5688 = vmatprep.mubr.msk.f32.mxu0 %vm240_vm0, %v8493_v11  ;;  %v6387_v13 = vpack.c.bf16 %v3627_v28, %v3623_v45  ;;  %v4043_v62 = vld [vmem:[#allocation13 + $0x568] sm:$0xff]  ;;  %v4040_v45 = vld [vmem:[#allocation13 + $0x550] sm:$0xff]  ;;  %v4111_v28 = vrot.slane %v8493_v11, 2 }
 0xa88   :  { %6366 = vmatprep.subr.bf16.mxu1 %v6365_v12  ;;  %6406 = vmatprep.subr.bf16.mxu0 %v6405_v21  ;;  %v3636_v12 = vld [vmem:[#allocation13 + $0x1e8] sm:$0xff]  ;;  %v3634_v21 = vld [vmem:[#allocation13 + $0x1d8] sm:$0xff] }
 0xa89   :  { %v6389_v29 = vpack.c.bf16 %v3636_v12, %v3632_v25  ;;  %v6429_v46 = vpack.c.bf16 %v3638_v8, %v3634_v21  ;;  %v4051_v25 = vld [vmem:[#allocation13 + $0x5a8] sm:$0xff]  ;;  %v4049_v12 = vld [vmem:[#allocation13 + $0x598] sm:$0xff] }
 0xa8a   :  { %6368 = vmatpush1.bf16.msra.mxu1 %v6367_v20  ;;  %6408 = vmatpush1.bf16.msra.mxu0 %v6407_v18  ;;  %v3631_v20 = vld [vmem:[#allocation13 + $0x1c0] sm:$0xff]  ;;  %v4053_v21 = vld [vmem:[#allocation13 + $0x5b8] sm:$0xff] }
 0xa8b   :  { %6370 = vmatprep.subr.bf16.mxu1 %v6369_v4  ;;  %6410 = vmatprep.subr.bf16.mxu0 %v6409_v40  ;;  %v3635_v18 = vld [vmem:[#allocation13 + $0x1e0] sm:$0xff]  ;;  %v3633_v4 = vld [vmem:[#allocation13 + $0x1d0] sm:$0xff] }
 0xa8c   :  { %v3637_v40 = vld [vmem:[#allocation13 + $0x1f0] sm:$0xff]  ;;  %v6391_v0 = vpack.c.bf16 %v3635_v18, %v3631_v20  ;;  %v4046_v20 = vld [vmem:[#allocation13 + $0x580] sm:$0xff] }
 0xa8d   :  { %v6431_v16 = vpack.c.bf16 %v3637_v40, %v3633_v4  ;;  %v4050_v18 = vld [vmem:[#allocation13 + $0x5a0] sm:$0xff]  ;;  %v4052_v4 = vld [vmem:[#allocation13 + $0x5b0] sm:$0xff]  ;;  %v4055_v40 = vld [vmem:[#allocation13 + $0x5c8] sm:$0xff] }
 0xa8e   :  { %6372 = vmatpush1.bf16.msra.mxu1 %v6371_v17  ;;  %6412 = vmatpush1.bf16.msra.mxu0 %v6411_v33  ;;  %v3639_v17 = vld [vmem:[#allocation13 + $0x200] sm:$0xff]  ;;  %v6451_v63 = vpack.c.bf16 %v4050_v18, %v4046_v20  ;;  %v4088_v20 = vld [vmem:[#allocation13 + $0x6d0] sm:$0xff] }
 0xa8f   :  { %6374 = vmatprep.subr.bf16.mxu1 %v6373_v49  ;;  %6414 = vmatprep.subr.bf16.mxu0 %v6413_v59  ;;  %v3643_v33 = vld [vmem:[#allocation13 + $0x220] sm:$0xff]  ;;  %v3641_v49 = vld [vmem:[#allocation13 + $0x210] sm:$0xff] }
 0xa90   :  { %v3645_v59 = vld [vmem:[#allocation13 + $0x230] sm:$0xff]  ;;  %v6395_v24 = vpack.c.bf16 %v3643_v33, %v3639_v17  ;;  %v4054_v17 = vld [vmem:[#allocation13 + $0x5c0] sm:$0xff] }
 0xa91   :  { %v6435_v32 = vpack.c.bf16 %v3645_v59, %v3641_v49  ;;  %v4058_v33 = vld [vmem:[#allocation13 + $0x5e0] sm:$0xff]  ;;  %v4060_v49 = vld [vmem:[#allocation13 + $0x5f0] sm:$0xff]  ;;  %v4063_v59 = vld [vmem:[#allocation13 + $0x608] sm:$0xff] }
 0xa92   :  { %6376 = vmatpush1.bf16.msra.mxu1 %v6375_v58  ;;  %6416 = vmatpush1.bf16.msra.mxu0 %v6415_v5  ;;  %v3647_v58 = vld [vmem:[#allocation13 + $0x240] sm:$0xff]  ;;  %v6455_v23 = vpack.c.bf16 %v4058_v33, %v4054_v17  ;;  %v4096_v17 = vld [vmem:[#allocation13 + $0x710] sm:$0xff] }
 0xa93   :  { %6378 = vmatprep.subr.bf16.mxu1 %v6377_v36  ;;  %6418 = vmatprep.subr.bf16.mxu0 %v6417_v53  ;;  %v3651_v5 = vld [vmem:[#allocation13 + $0x260] sm:$0xff]  ;;  %v3649_v36 = vld [vmem:[#allocation13 + $0x250] sm:$0xff] }
 0xa94   :  { %v3653_v53 = vld [vmem:[#allocation13 + $0x270] sm:$0xff]  ;;  %v6399_v56 = vpack.c.bf16 %v3651_v5, %v3647_v58  ;;  %v4062_v58 = vld [vmem:[#allocation13 + $0x600] sm:$0xff] }
 0xa95   :  { %v6439_v54 = vpack.c.bf16 %v3653_v53, %v3649_v36  ;;  %v4066_v5 = vld [vmem:[#allocation13 + $0x620] sm:$0xff]  ;;  %v4068_v36 = vld [vmem:[#allocation13 + $0x630] sm:$0xff]  ;;  %v4071_v53 = vld [vmem:[#allocation13 + $0x648] sm:$0xff] }
 0xa96   :  { %6380 = vmatpush1.bf16.msra.mxu1 %v6379_v2  ;;  %6420 = vmatpush1.bf16.msra.mxu0 %v6419_v7  ;;  %v6441_v2 = vpack.c.bf16 %v4035_v27, %v4031_v42  ;;  %v6481_v7 = vpack.c.bf16 %v4037_v1, %v4033_v47  ;;  %v4075_v42 = vld [vmem:[#allocation13 + $0x668] sm:$0xff]  ;;  %v4073_v27 = vld [vmem:[#allocation13 + $0x658] sm:$0xff]  ;;  %v6459_v1 = vpack.c.bf16 %v4066_v5, %v4062_v58  ;;  %v4104_v58 = vld [vmem:[#allocation13 + $0x750] sm:$0xff] }
 0xa97   :  { %6382 = vmatprep.subr.bf16.mxu1 %v6381_v35  ;;  %6422 = vmatprep.subr.bf16.mxu0 %v6421_v26  ;;  %v4032_v35 = vld [vmem:[#allocation13 + $0x510] sm:$0xff]  ;;  %v4077_v47 = vld [vmem:[#allocation13 + $0x678] sm:$0xff] }
 0xa98   :  { %v4036_v26 = vld [vmem:[#allocation13 + $0x530] sm:$0xff]  ;;  %v6501_v3 = vpack.c.bf16 %v4077_v47, %v4073_v27 }
 0xa99   :  { %v6483_v15 = vpack.c.bf16 %v4036_v26, %v4032_v35  ;;  %v4076_v35 = vld [vmem:[#allocation13 + $0x670] sm:$0xff]  ;;  %v4079_v26 = vld [vmem:[#allocation13 + $0x688] sm:$0xff] }
 0xa9a   :  { %6384 = vmatpush1.bf16.msra.mxu1 %v6383_v61  ;;  %6424 = vmatpush1.bf16.msra.mxu0 %v6423_v44  ;;  %v4038_v61 = vld [vmem:[#allocation13 + $0x540] sm:$0xff] }
 0xa9b   :  { %6386 = vmatprep.subr.bf16.mxu1 %v6385_v39  ;;  %6426 = vmatprep.subr.bf16.mxu0 %v6425_v38  ;;  %v4042_v44 = vld [vmem:[#allocation13 + $0x560] sm:$0xff]  ;;  %v6445_v39 = vpack.c.bf16 %v4043_v62, %v4039_v55  ;;  %v6485_v38 = vpack.c.bf16 %v4045_v37, %v4041_v30  ;;  %v4083_v55 = vld [vmem:[#allocation13 + $0x6a8] sm:$0xff]  ;;  %v4081_v62 = vld [vmem:[#allocation13 + $0x698] sm:$0xff] }
 0xa9c   :  { %v6447_v8 = vpack.c.bf16 %v4042_v44, %v4038_v61  ;;  %v4085_v30 = vld [vmem:[#allocation13 + $0x6b8] sm:$0xff]  ;;  %v4078_v61 = vld [vmem:[#allocation13 + $0x680] sm:$0xff] }
 0xa9d   :  { %v4082_v44 = vld [vmem:[#allocation13 + $0x6a0] sm:$0xff] }
 0xa9e   :  { %6388 = vmatpush1.bf16.msra.mxu1 %v6387_v13  ;;  %6428 = vmatpush1.bf16.msra.mxu0 %v6427_v14  ;;  %v6487_v13 = vpack.c.bf16 %v4044_v9, %v4040_v45  ;;  %v6449_v14 = vpack.c.bf16 %v4051_v25, %v4047_v22  ;;  %v4080_v45 = vld [vmem:[#allocation13 + $0x690] sm:$0xff]  ;;  %v4091_v9 = vld [vmem:[#allocation13 + $0x6e8] sm:$0xff]  ;;  %v4089_v22 = vld [vmem:[#allocation13 + $0x6d8] sm:$0xff] }
 0xa9f   :  { %6390 = vmatprep.subr.bf16.mxu1 %v6389_v29  ;;  %6430 = vmatprep.subr.bf16.mxu0 %v6429_v46  ;;  %v4048_v29 = vld [vmem:[#allocation13 + $0x590] sm:$0xff]  ;;  %v6489_v46 = vpack.c.bf16 %v4053_v21, %v4049_v12  ;;  %v4093_v25 = vld [vmem:[#allocation13 + $0x6f8] sm:$0xff]  ;;  %v6467_v12 = vpack.c.bf16 %v4082_v44, %v4078_v61 }
 0xaa0   :  { %v6509_v18 = vpack.c.bf16 %v4093_v25, %v4089_v22  ;;  %v4272_v61 = vld [vmem:[#allocation13 + $0x7d0] sm:$0xff]  ;;  %v4281_v22 = vld [vmem:[#allocation13 + $0x818] sm:$0xff] }
 0xaa1   :  { %v4285_v25 = vld [vmem:[#allocation13 + $0x838] sm:$0xff] }
 0xaa2   :  { %6392 = vmatpush1.bf16.msra.mxu1 %v6391_v0  ;;  %6432 = vmatpush1.bf16.msra.mxu0 %v6431_v16  ;;  %v6491_v0 = vpack.c.bf16 %v4052_v4, %v4048_v29  ;;  %v6453_v16 = vpack.c.bf16 %v4059_v41, %v4055_v40  ;;  %v4092_v29 = vld [vmem:[#allocation13 + $0x6f0] sm:$0xff]  ;;  %v4099_v4 = vld [vmem:[#allocation13 + $0x728] sm:$0xff]  ;;  %v4097_v40 = vld [vmem:[#allocation13 + $0x718] sm:$0xff] }
 0xaa3   :  { %6394 = vmatprep.subr.bf16.mxu1 %v6393_v34  ;;  %6434 = vmatprep.subr.bf16.mxu0 %v6433_v48  ;;  %v4056_v34 = vld [vmem:[#allocation13 + $0x5d0] sm:$0xff]  ;;  %v6493_v48 = vpack.c.bf16 %v4061_v52, %v4057_v51  ;;  %v4101_v41 = vld [vmem:[#allocation13 + $0x738] sm:$0xff]  ;;  %v6511_v52 = vpack.c.bf16 %v4092_v29, %v4088_v20 }
 0xaa4   :  { %v6513_v33 = vpack.c.bf16 %v4101_v41, %v4097_v40  ;;  %v4280_v20 = vld [vmem:[#allocation13 + $0x810] sm:$0xff]  ;;  %v4289_v40 = vld [vmem:[#allocation13 + $0x858] sm:$0xff] }
 0xaa5   :  { %v4284_v29 = vld [vmem:[#allocation13 + $0x830] sm:$0xff]  ;;  %v4293_v41 = vld [vmem:[#allocation13 + $0x878] sm:$0xff] }
 0xaa6   :  { %6396 = vmatpush1.bf16.msra.mxu1 %v6395_v24  ;;  %6436 = vmatpush1.bf16.msra.mxu0 %v6435_v32  ;;  %v6495_v24 = vpack.c.bf16 %v4060_v49, %v4056_v34  ;;  %v6457_v32 = vpack.c.bf16 %v4067_v60, %v4063_v59  ;;  %v4100_v34 = vld [vmem:[#allocation13 + $0x730] sm:$0xff]  ;;  %v4107_v49 = vld [vmem:[#allocation13 + $0x768] sm:$0xff]  ;;  %v4105_v59 = vld [vmem:[#allocation13 + $0x758] sm:$0xff] }
 0xaa7   :  { %6398 = vmatprep.subr.bf16.mxu1 %v6397_v31  ;;  %6438 = vmatprep.subr.bf16.mxu0 %v6437_v57  ;;  %v4064_v31 = vld [vmem:[#allocation13 + $0x610] sm:$0xff]  ;;  %v6497_v57 = vpack.c.bf16 %v4069_v10, %v4065_v6  ;;  %v4109_v60 = vld [vmem:[#allocation13 + $0x778] sm:$0xff]  ;;  %v6515_v10 = vpack.c.bf16 %v4100_v34, %v4096_v17 }
 0xaa8   :  { %v6517_v5 = vpack.c.bf16 %v4109_v60, %v4105_v59  ;;  %v4288_v17 = vld [vmem:[#allocation13 + $0x850] sm:$0xff]  ;;  %v4297_v59 = vld [vmem:[#allocation13 + $0x898] sm:$0xff] }
 0xaa9   :  { %v4292_v34 = vld [vmem:[#allocation13 + $0x870] sm:$0xff]  ;;  %v4301_v60 = vld [vmem:[#allocation13 + $0x8b8] sm:$0xff] }
 0xaaa   :  { %6400 = vmatpush1.bf16.msra.mxu1 %v6399_v56  ;;  %6440 = vmatpush1.bf16.msra.mxu0 %v6439_v54  ;;  %v6499_v56 = vpack.c.bf16 %v4068_v36, %v4064_v31  ;;  %v6461_v54 = vpack.c.bf16 %v4075_v42, %v4071_v53  ;;  %v4108_v31 = vld [vmem:[#allocation13 + $0x770] sm:$0xff]  ;;  %v4267_v36 = vld [vmem:[#allocation13 + $0x7a8] sm:$0xff]  ;;  %v4265_v53 = vld [vmem:[#allocation13 + $0x798] sm:$0xff] }
 0xaab   :  { %6442 = vmatprep.subr.bf16.mxu1 %v6441_v2  ;;  %6482 = vmatprep.subr.bf16.mxu0 %v6481_v7  ;;  %v4070_v2 = vld [vmem:[#allocation13 + $0x640] sm:$0xff]  ;;  %v4269_v42 = vld [vmem:[#allocation13 + $0x7b8] sm:$0xff]  ;;  %v6519_v47 = vpack.c.bf16 %v4108_v31, %v4104_v58  ;;  %v4296_v58 = vld [vmem:[#allocation13 + $0x890] sm:$0xff] }
 0xaac   :  { %v4074_v7 = vld [vmem:[#allocation13 + $0x660] sm:$0xff]  ;;  %v4300_v31 = vld [vmem:[#allocation13 + $0x8b0] sm:$0xff] }
 0xaad   :  { %3952 = vmatmul.mubr.f32.vlgmr.msra.gmra.mrb[98].mxu1 %v8491_v43  ;;  %4023 = vmatmul.mubr.f32.vlgmr.msra.gmra.mrb[88].mxu0 %v8491_v43  ;;  %v6463_v37 = vpack.c.bf16 %v4074_v7, %v4070_v2  ;;  %v6561_v2 = vpack.c.bf16 %v4269_v42, %v4265_v53  ;;  %v4264_v7 = vld [vmem:[#allocation13 + $0x790] sm:$0xff]  ;;  %v4305_v53 = vld [vmem:[#allocation13 + $0x8d8] sm:$0xff] }
 0xaae   :  { %6444 = vmatpush1.bf16.msra.mxu1 %v6443_v50  ;;  %5689 = vmatprep.mubr.msk.f32.mxu1 %vm240_vm0, %v4111_v28  ;;  %v6503_v50 = vpack.c.bf16 %v4076_v35, %v4072_v19  ;;  %v4268_v19 = vld [vmem:[#allocation13 + $0x7b0] sm:$0xff]  ;;  %v4275_v35 = vld [vmem:[#allocation13 + $0x7e8] sm:$0xff]  ;;  %v4309_v42 = vld [vmem:[#allocation13 + $0x8f8] sm:$0xff] }
 0xaaf   :  { %6484 = vmatpush1.bf16.msra.mxu0 %v6483_v15  ;;  %5690 = vmatprep.mubr.msk.f32.mxu0 %vm240_vm0, %v4111_v28  ;;  %v6465_v15 = vpack.c.bf16 %v4083_v55, %v4079_v26  ;;  %v6505_v28 = vpack.c.bf16 %v4085_v30, %v4081_v62  ;;  %v4273_v55 = vld [vmem:[#allocation13 + $0x7d8] sm:$0xff]  ;;  %v4110_v30 = vrot.slane %v8491_v43, 2 }
 0xab0   :  { %6446 = vmatprep.subr.bf16.mxu1 %v6445_v39  ;;  %6486 = vmatprep.subr.bf16.mxu0 %v6485_v38  ;;  %v4084_v39 = vld [vmem:[#allocation13 + $0x6b0] sm:$0xff]  ;;  %v4087_v38 = vld [vmem:[#allocation13 + $0x6c8] sm:$0xff]  ;;  %v4277_v62 = vld [vmem:[#allocation13 + $0x7f8] sm:$0xff] }
 0xab1   :  { %v6507_v21 = vpack.c.bf16 %v4084_v39, %v4080_v45  ;;  %v4276_v45 = vld [vmem:[#allocation13 + $0x7f0] sm:$0xff]  ;;  %v4283_v39 = vld [vmem:[#allocation13 + $0x828] sm:$0xff] }
 0xab2   :  { %6448 = vmatpush1.bf16.msra.mxu1 %v6447_v8  ;;  %v6469_v8 = vpack.c.bf16 %v4091_v9, %v4087_v38  ;;  %v4343_v38 = vrot.slane %v8493_v11, 3  ;;  %v6565_v9 = vpack.c.bf16 %v4277_v62, %v4273_v55  ;;  %v4317_v55 = vld [vmem:[#allocation13 + $0x938] sm:$0xff] }
 0xab3   :  { %6488 = vmatpush1.bf16.msra.mxu0 %v6487_v13  ;;  %6450 = vmatprep.subr.bf16.mxu1 %v6449_v14  ;;  %v4086_v13 = vld [vmem:[#allocation13 + $0x6c0] sm:$0xff] }
 0xab4   :  { %6490 = vmatprep.subr.bf16.mxu0 %v6489_v46  ;;  %v4090_v14 = vld [vmem:[#allocation13 + $0x6e0] sm:$0xff]  ;;  %v4095_v46 = vld [vmem:[#allocation13 + $0x708] sm:$0xff] }
 0xab5   :  { %v6471_v51 = vpack.c.bf16 %v4090_v14, %v4086_v13  ;;  %v4278_v13 = vld [vmem:[#allocation13 + $0x800] sm:$0xff] }
 0xab6   :  { %6452 = vmatpush1.bf16.msra.mxu1 %v6451_v63  ;;  %v6473_v63 = vpack.c.bf16 %v4099_v4, %v4095_v46  ;;  %v4282_v14 = vld [vmem:[#allocation13 + $0x820] sm:$0xff]  ;;  %v4287_v46 = vld [vmem:[#allocation13 + $0x848] sm:$0xff] }
 0xab7   :  { %6492 = vmatpush1.bf16.msra.mxu0 %v6491_v0  ;;  %6454 = vmatprep.subr.bf16.mxu1 %v6453_v16  ;;  %v4094_v0 = vld [vmem:[#allocation13 + $0x700] sm:$0xff]  ;;  %v4291_v4 = vld [vmem:[#allocation13 + $0x868] sm:$0xff] }
 0xab8   :  { %6494 = vmatprep.subr.bf16.mxu0 %v6493_v48  ;;  %v4098_v16 = vld [vmem:[#allocation13 + $0x720] sm:$0xff]  ;;  %v4103_v48 = vld [vmem:[#allocation13 + $0x748] sm:$0xff] }
 0xab9   :  { %v6475_v6 = vpack.c.bf16 %v4098_v16, %v4094_v0  ;;  %v4286_v0 = vld [vmem:[#allocation13 + $0x840] sm:$0xff] }
 0xaba   :  { %6456 = vmatpush1.bf16.msra.mxu1 %v6455_v23  ;;  %v6477_v23 = vpack.c.bf16 %v4107_v49, %v4103_v48  ;;  %v4290_v16 = vld [vmem:[#allocation13 + $0x860] sm:$0xff]  ;;  %v4295_v48 = vld [vmem:[#allocation13 + $0x888] sm:$0xff] }
 0xabb   :  { %6496 = vmatpush1.bf16.msra.mxu0 %v6495_v24  ;;  %6458 = vmatprep.subr.bf16.mxu1 %v6457_v32  ;;  %v4102_v24 = vld [vmem:[#allocation13 + $0x740] sm:$0xff]  ;;  %v4299_v49 = vld [vmem:[#allocation13 + $0x8a8] sm:$0xff] }
 0xabc   :  { %6498 = vmatprep.subr.bf16.mxu0 %v6497_v57  ;;  %v4106_v32 = vld [vmem:[#allocation13 + $0x760] sm:$0xff]  ;;  %v4263_v57 = vld [vmem:[#allocation13 + $0x788] sm:$0xff] }
 0xabd   :  { %v6479_v27 = vpack.c.bf16 %v4106_v32, %v4102_v24  ;;  %v4294_v24 = vld [vmem:[#allocation13 + $0x880] sm:$0xff] }
 0xabe   :  { %6460 = vmatpush1.bf16.msra.mxu1 %v6459_v1  ;;  %v6521_v1 = vpack.c.bf16 %v4267_v36, %v4263_v57  ;;  %v4298_v32 = vld [vmem:[#allocation13 + $0x8a0] sm:$0xff]  ;;  %v4303_v57 = vld [vmem:[#allocation13 + $0x8c8] sm:$0xff] }
 0xabf   :  { %6500 = vmatpush1.bf16.msra.mxu0 %v6499_v56  ;;  %6462 = vmatprep.subr.bf16.mxu1 %v6461_v54  ;;  %v4262_v56 = vld [vmem:[#allocation13 + $0x780] sm:$0xff]  ;;  %v4307_v36 = vld [vmem:[#allocation13 + $0x8e8] sm:$0xff] }
 0xac0   :  { %6502 = vmatprep.subr.bf16.mxu0 %v6501_v3  ;;  %v4266_v54 = vld [vmem:[#allocation13 + $0x7a0] sm:$0xff]  ;;  %v4271_v3 = vld [vmem:[#allocation13 + $0x7c8] sm:$0xff] }
 0xac1   :  { %v6523_v26 = vpack.c.bf16 %v4266_v54, %v4262_v56  ;;  %v6525_v44 = vpack.c.bf16 %v4275_v35, %v4271_v3  ;;  %v4302_v56 = vld [vmem:[#allocation13 + $0x8c0] sm:$0xff]  ;;  %v4311_v3 = vld [vmem:[#allocation13 + $0x908] sm:$0xff] }
 0xac2   :  { %6464 = vmatpush1.bf16.msra.mxu1 %v6463_v37  ;;  %v6563_v37 = vpack.c.bf16 %v4268_v19, %v4264_v7  ;;  %v4306_v54 = vld [vmem:[#allocation13 + $0x8e0] sm:$0xff]  ;;  %v6581_v7 = vpack.c.bf16 %v4309_v42, %v4305_v53  ;;  %v4308_v19 = vld [vmem:[#allocation13 + $0x8f0] sm:$0xff]  ;;  %v4315_v35 = vld [vmem:[#allocation13 + $0x928] sm:$0xff] }
 0xac3   :  { %6504 = vmatpush1.bf16.msra.mxu0 %v6503_v50  ;;  %6466 = vmatprep.subr.bf16.mxu1 %v6465_v15  ;;  %v4270_v50 = vld [vmem:[#allocation13 + $0x7c0] sm:$0xff]  ;;  %v6543_v62 = vpack.c.bf16 %v4306_v54, %v4302_v56  ;;  %v4634_v54 = vld [vmem:[#allocation13 + $0x290] sm:$0xff] }
 0xac4   :  { %6506 = vmatprep.subr.bf16.mxu0 %v6505_v28  ;;  %v4274_v15 = vld [vmem:[#allocation13 + $0x7e0] sm:$0xff]  ;;  %v4279_v28 = vld [vmem:[#allocation13 + $0x808] sm:$0xff] }
 0xac6   :  { %6468 = vmatpush1.bf16.msra.mxu1 %v6467_v12  ;;  %v6527_v12 = vpack.c.bf16 %v4274_v15, %v4270_v50  ;;  %v4310_v50 = vld [vmem:[#allocation13 + $0x900] sm:$0xff] }
 0xac7   :  { %6508 = vmatpush1.bf16.msra.mxu0 %v6507_v21  ;;  %6470 = vmatprep.subr.bf16.mxu1 %v6469_v8  ;;  %v6567_v21 = vpack.c.bf16 %v4276_v45, %v4272_v61  ;;  %v6529_v8 = vpack.c.bf16 %v4283_v39, %v4279_v28  ;;  %v4314_v15 = vld [vmem:[#allocation13 + $0x920] sm:$0xff]  ;;  %v4312_v61 = vld [vmem:[#allocation13 + $0x910] sm:$0xff]  ;;  %v4319_v28 = vld [vmem:[#allocation13 + $0x948] sm:$0xff] }
 0xac8   :  { %6510 = vmatprep.subr.bf16.mxu0 %v6509_v18  ;;  %v6569_v18 = vpack.c.bf16 %v4285_v25, %v4281_v22  ;;  %v4316_v45 = vld [vmem:[#allocation13 + $0x930] sm:$0xff]  ;;  %v4323_v39 = vld [vmem:[#allocation13 + $0x968] sm:$0xff]  ;;  %v6547_v22 = vpack.c.bf16 %v4314_v15, %v4310_v50 }
 0xac9   :  { %v6587_v25 = vpack.c.bf16 %v4316_v45, %v4312_v61  ;;  %v4642_v50 = vld [vmem:[#allocation13 + $0x2d0] sm:$0xff]  ;;  %v4653_v45 = vld [vmem:[#allocation13 + $0x328] sm:$0xff] }
 0xaca   :  { %6472 = vmatpush1.bf16.msra.mxu1 %v6471_v51  ;;  %v6531_v51 = vpack.c.bf16 %v4282_v14, %v4278_v13  ;;  %v4320_v13 = vld [vmem:[#allocation13 + $0x950] sm:$0xff] }
 0xacb   :  { %6512 = vmatpush1.bf16.msra.mxu0 %v6511_v52  ;;  %6474 = vmatprep.subr.bf16.mxu1 %v6473_v63  ;;  %v6571_v52 = vpack.c.bf16 %v4284_v29, %v4280_v20  ;;  %v6533_v63 = vpack.c.bf16 %v4291_v4, %v4287_v46  ;;  %v4324_v20 = vld [vmem:[#allocation13 + $0x970] sm:$0xff]  ;;  %v4331_v29 = vld [vmem:[#allocation13 + $0x9a8] sm:$0xff]  ;;  %v4329_v46 = vld [vmem:[#allocation13 + $0x998] sm:$0xff] }
 0xacc   :  { %6514 = vmatprep.subr.bf16.mxu0 %v6513_v33  ;;  %v6573_v33 = vpack.c.bf16 %v4293_v41, %v4289_v40  ;;  %v4333_v4 = vld [vmem:[#allocation13 + $0x9b8] sm:$0xff]  ;;  %v6591_v41 = vpack.c.bf16 %v4324_v20, %v4320_v13  ;;  %v4646_v61 = vld [vmem:[#allocation13 + $0x2f0] sm:$0xff] }
 0xacd   :  { %v4650_v13 = vld [vmem:[#allocation13 + $0x310] sm:$0xff] }
 0xace   :  { %6476 = vmatpush1.bf16.msra.mxu1 %v6475_v6  ;;  %v6535_v6 = vpack.c.bf16 %v4290_v16, %v4286_v0  ;;  %v4328_v0 = vld [vmem:[#allocation13 + $0x990] sm:$0xff]  ;;  %v6593_v16 = vpack.c.bf16 %v4333_v4, %v4329_v46  ;;  %v4659_v46 = vld [vmem:[#allocation13 + $0x358] sm:$0xff] }
 0xacf   :  { %6516 = vmatpush1.bf16.msra.mxu0 %v6515_v10  ;;  %6478 = vmatprep.subr.bf16.mxu1 %v6477_v23  ;;  %v6575_v10 = vpack.c.bf16 %v4292_v34, %v4288_v17  ;;  %v6537_v23 = vpack.c.bf16 %v4299_v49, %v4295_v48  ;;  %v4332_v17 = vld [vmem:[#allocation13 + $0x9b0] sm:$0xff]  ;;  %v4339_v34 = vld [vmem:[#allocation13 + $0x9e8] sm:$0xff]  ;;  %v4337_v48 = vld [vmem:[#allocation13 + $0x9d8] sm:$0xff] }
 0xad0   :  { %6518 = vmatprep.subr.bf16.mxu0 %v6517_v5  ;;  %v6577_v5 = vpack.c.bf16 %v4301_v60, %v4297_v59  ;;  %v4341_v49 = vld [vmem:[#allocation13 + $0x9f8] sm:$0xff]  ;;  %v6595_v60 = vpack.c.bf16 %v4332_v17, %v4328_v0  ;;  %v4654_v20 = vld [vmem:[#allocation13 + $0x330] sm:$0xff] }
 0xad1   :  { %v4663_v4 = vld [vmem:[#allocation13 + $0x378] sm:$0xff]  ;;  %v4658_v0 = vld [vmem:[#allocation13 + $0x350] sm:$0xff] }
 0xad2   :  { %6480 = vmatpush1.bf16.msra.mxu1 %v6479_v27  ;;  %v6539_v27 = vpack.c.bf16 %v4298_v32, %v4294_v24  ;;  %v4336_v24 = vld [vmem:[#allocation13 + $0x9d0] sm:$0xff]  ;;  %v6597_v32 = vpack.c.bf16 %v4341_v49, %v4337_v48  ;;  %v4667_v48 = vld [vmem:[#allocation13 + $0x398] sm:$0xff] }
 0xad3   :  { %6520 = vmatpush1.bf16.msra.mxu0 %v6519_v47  ;;  %6522 = vmatprep.subr.bf16.mxu1 %v6521_v1  ;;  %v6579_v47 = vpack.c.bf16 %v4300_v31, %v4296_v58  ;;  %v6541_v1 = vpack.c.bf16 %v4307_v36, %v4303_v57  ;;  %v4340_v58 = vld [vmem:[#allocation13 + $0x9f0] sm:$0xff]  ;;  %v4637_v31 = vld [vmem:[#allocation13 + $0x2a8] sm:$0xff]  ;;  %v4635_v57 = vld [vmem:[#allocation13 + $0x298] sm:$0xff] }
 0xad4   :  { %6562 = vmatprep.subr.bf16.mxu0 %v6561_v2  ;;  %v4304_v2 = vld [vmem:[#allocation13 + $0x8d0] sm:$0xff]  ;;  %v4639_v36 = vld [vmem:[#allocation13 + $0x2b8] sm:$0xff]  ;;  %v6599_v42 = vpack.c.bf16 %v4340_v58, %v4336_v24 }
 0xad5   :  { %4180 = vmatmul.mubr.f32.vlgmr.msra.gmra.mrb[98].mxu1 %v4110_v30  ;;  %v6641_v56 = vpack.c.bf16 %v4639_v36, %v4635_v57  ;;  %v4662_v17 = vld [vmem:[#allocation13 + $0x370] sm:$0xff]  ;;  %v4671_v49 = vld [vmem:[#allocation13 + $0x3b8] sm:$0xff] }
 0xad6   :  { %4251 = vmatmul.mubr.f32.vlgmr.msra.gmra.mrb[88].mxu0 %v4110_v30  ;;  %6524 = vmatpush1.bf16.msra.mxu1 %v6523_v26  ;;  %v4313_v26 = vld [vmem:[#allocation13 + $0x918] sm:$0xff]  ;;  %v6583_v30 = vpack.c.bf16 %v4308_v19, %v4304_v2  ;;  %v4638_v2 = vld [vmem:[#allocation13 + $0x2b0] sm:$0xff]  ;;  %v4645_v19 = vld [vmem:[#allocation13 + $0x2e8] sm:$0xff] }
 0xad7   :  { %5691 = vmatprep.mubr.msk.f32.mxu1 %vm240_vm0, %v4343_v38  ;;  %6564 = vmatpush1.bf16.msra.mxu0 %v6563_v37  ;;  %v6545_v37 = vpack.c.bf16 %v4315_v35, %v4311_v3  ;;  %v4643_v35 = vld [vmem:[#allocation13 + $0x2d8] sm:$0xff]  ;;  %v4666_v24 = vld [vmem:[#allocation13 + $0x390] sm:$0xff] }
 0xad8   :  { %5692 = vmatprep.mubr.msk.f32.mxu0 %vm240_vm0, %v4343_v38  ;;  %6526 = vmatprep.subr.bf16.mxu1 %v6525_v44  ;;  %v6585_v44 = vpack.c.bf16 %v4317_v55, %v4313_v26  ;;  %v4321_v38 = vld [vmem:[#allocation13 + $0x958] sm:$0xff]  ;;  %v4342_v55 = vrot.slane %v8491_v43, 3  ;;  %v4670_v58 = vld [vmem:[#allocation13 + $0x3b0] sm:$0xff] }
 0xad9   :  { %6566 = vmatprep.subr.bf16.mxu0 %v6565_v9  ;;  %v4325_v9 = vld [vmem:[#allocation13 + $0x978] sm:$0xff] }
 0xada   :  { %6528 = vmatpush1.bf16.msra.mxu1 %v6527_v12  ;;  %v6549_v12 = vpack.c.bf16 %v4323_v39, %v4319_v28  ;;  %v6589_v14 = vpack.c.bf16 %v4325_v9, %v4321_v38  ;;  %v4647_v26 = vld [vmem:[#allocation13 + $0x2f8] sm:$0xff]  ;;  %v4713_v28 = vrot.slane %v8493_v11, 5 }
 0xadb   :  { %6568 = vmatpush1.bf16.msra.mxu0 %v6567_v21  ;;  %6530 = vmatprep.subr.bf16.mxu1 %v6529_v8  ;;  %v4318_v21 = vld [vmem:[#allocation13 + $0x940] sm:$0xff]  ;;  %v6645_v39 = vpack.c.bf16 %v4647_v26, %v4643_v35  ;;  %v4651_v38 = vld [vmem:[#allocation13 + $0x318] sm:$0xff] }
 0xadc   :  { %6570 = vmatprep.subr.bf16.mxu0 %v6569_v18  ;;  %v4322_v8 = vld [vmem:[#allocation13 + $0x960] sm:$0xff]  ;;  %v4327_v18 = vld [vmem:[#allocation13 + $0x988] sm:$0xff]  ;;  %v4655_v9 = vld [vmem:[#allocation13 + $0x338] sm:$0xff] }
 0xadd   :  { %v6551_v40 = vpack.c.bf16 %v4322_v8, %v4318_v21  ;;  %v4648_v21 = vld [vmem:[#allocation13 + $0x300] sm:$0xff]  ;;  %v4675_v57 = vld [vmem:[#allocation13 + $0x3d8] sm:$0xff] }
 0xade   :  { %6532 = vmatpush1.bf16.msra.mxu1 %v6531_v51  ;;  %v6553_v51 = vpack.c.bf16 %v4331_v29, %v4327_v18  ;;  %v4652_v8 = vld [vmem:[#allocation13 + $0x320] sm:$0xff]  ;;  %v4657_v18 = vld [vmem:[#allocation13 + $0x348] sm:$0xff]  ;;  %v4679_v36 = vld [vmem:[#allocation13 + $0x3f8] sm:$0xff] }
 0xadf   :  { %6572 = vmatpush1.bf16.msra.mxu0 %v6571_v52  ;;  %6534 = vmatprep.subr.bf16.mxu1 %v6533_v63  ;;  %v4326_v52 = vld [vmem:[#allocation13 + $0x980] sm:$0xff]  ;;  %v4661_v29 = vld [vmem:[#allocation13 + $0x368] sm:$0xff]  ;;  %v4687_v35 = vld [vmem:[#allocation13 + $0x438] sm:$0xff] }
 0xae0   :  { %6574 = vmatprep.subr.bf16.mxu0 %v6573_v33  ;;  %v4330_v63 = vld [vmem:[#allocation13 + $0x9a0] sm:$0xff]  ;;  %v4335_v33 = vld [vmem:[#allocation13 + $0x9c8] sm:$0xff] }
 0xae1   :  { %v6555_v59 = vpack.c.bf16 %v4330_v63, %v4326_v52  ;;  %v4656_v52 = vld [vmem:[#allocation13 + $0x340] sm:$0xff] }
 0xae2   :  { %6536 = vmatpush1.bf16.msra.mxu1 %v6535_v6  ;;  %v6557_v6 = vpack.c.bf16 %v4339_v34, %v4335_v33  ;;  %v4660_v63 = vld [vmem:[#allocation13 + $0x360] sm:$0xff]  ;;  %v4665_v33 = vld [vmem:[#allocation13 + $0x388] sm:$0xff] }
 0xae3   :  { %6576 = vmatpush1.bf16.msra.mxu0 %v6575_v10  ;;  %6538 = vmatprep.subr.bf16.mxu1 %v6537_v23  ;;  %v4334_v10 = vld [vmem:[#allocation13 + $0x9c0] sm:$0xff]  ;;  %v4669_v34 = vld [vmem:[#allocation13 + $0x3a8] sm:$0xff] }
 0xae4   :  { %6578 = vmatprep.subr.bf16.mxu0 %v6577_v5  ;;  %v4338_v23 = vld [vmem:[#allocation13 + $0x9e0] sm:$0xff]  ;;  %v4633_v5 = vld [vmem:[#allocation13 + $0x288] sm:$0xff] }
 0xae5   :  { %v6559_v53 = vpack.c.bf16 %v4338_v23, %v4334_v10  ;;  %v4664_v10 = vld [vmem:[#allocation13 + $0x380] sm:$0xff] }
 0xae6   :  { %6540 = vmatpush1.bf16.msra.mxu1 %v6539_v27  ;;  %v6601_v27 = vpack.c.bf16 %v4637_v31, %v4633_v5  ;;  %v4668_v23 = vld [vmem:[#allocation13 + $0x3a0] sm:$0xff]  ;;  %v4673_v5 = vld [vmem:[#allocation13 + $0x3c8] sm:$0xff] }
 0xae7   :  { %6580 = vmatpush1.bf16.msra.mxu0 %v6579_v47  ;;  %6542 = vmatprep.subr.bf16.mxu1 %v6541_v1  ;;  %v4632_v47 = vld [vmem:[#allocation13 + $0x280] sm:$0xff]  ;;  %v4677_v31 = vld [vmem:[#allocation13 + $0x3e8] sm:$0xff] }
 0xae8   :  { %6582 = vmatprep.subr.bf16.mxu0 %v6581_v7  ;;  %v4636_v1 = vld [vmem:[#allocation13 + $0x2a0] sm:$0xff]  ;;  %v4641_v7 = vld [vmem:[#allocation13 + $0x2c8] sm:$0xff] }
 0xae9   :  { %v6603_v3 = vpack.c.bf16 %v4636_v1, %v4632_v47  ;;  %v6605_v15 = vpack.c.bf16 %v4645_v19, %v4641_v7  ;;  %v4672_v47 = vld [vmem:[#allocation13 + $0x3c0] sm:$0xff]  ;;  %v4681_v7 = vld [vmem:[#allocation13 + $0x408] sm:$0xff] }
 0xaea   :  { %6544 = vmatpush1.bf16.msra.mxu1 %v6543_v62  ;;  %v6643_v62 = vpack.c.bf16 %v4638_v2, %v4634_v54  ;;  %v4676_v1 = vld [vmem:[#allocation13 + $0x3e0] sm:$0xff]  ;;  %v6661_v54 = vpack.c.bf16 %v4679_v36, %v4675_v57  ;;  %v4678_v2 = vld [vmem:[#allocation13 + $0x3f0] sm:$0xff]  ;;  %v4685_v19 = vld [vmem:[#allocation13 + $0x428] sm:$0xff] }
 0xaeb   :  { %6584 = vmatpush1.bf16.msra.mxu0 %v6583_v30  ;;  %6546 = vmatprep.subr.bf16.mxu1 %v6545_v37  ;;  %v4640_v30 = vld [vmem:[#allocation13 + $0x2c0] sm:$0xff]  ;;  %v6623_v26 = vpack.c.bf16 %v4676_v1, %v4672_v47  ;;  %v4554_v1 = vld [vmem:[#allocation13 + $0x10] sm:$0xff] }
 0xaec   :  { %6586 = vmatprep.subr.bf16.mxu0 %v6585_v44  ;;  %v4644_v37 = vld [vmem:[#allocation13 + $0x2e0] sm:$0xff]  ;;  %v4649_v44 = vld [vmem:[#allocation13 + $0x308] sm:$0xff] }
 0xaee   :  { %6548 = vmatpush1.bf16.msra.mxu1 %v6547_v22  ;;  %v6607_v22 = vpack.c.bf16 %v4644_v37, %v4640_v30  ;;  %v4680_v30 = vld [vmem:[#allocation13 + $0x400] sm:$0xff] }
 0xaef   :  { %6588 = vmatpush1.bf16.msra.mxu0 %v6587_v25  ;;  %6550 = vmatprep.subr.bf16.mxu1 %v6549_v12  ;;  %v6647_v25 = vpack.c.bf16 %v4646_v61, %v4642_v50  ;;  %v6609_v12 = vpack.c.bf16 %v4653_v45, %v4649_v44  ;;  %v4684_v37 = vld [vmem:[#allocation13 + $0x420] sm:$0xff]  ;;  %v4682_v50 = vld [vmem:[#allocation13 + $0x410] sm:$0xff]  ;;  %v4689_v44 = vld [vmem:[#allocation13 + $0x448] sm:$0xff] }
 0xaf0   :  { %6590 = vmatprep.subr.bf16.mxu0 %v6589_v14  ;;  %v6649_v14 = vpack.c.bf16 %v4655_v9, %v4651_v38  ;;  %v4686_v61 = vld [vmem:[#allocation13 + $0x430] sm:$0xff]  ;;  %v4693_v45 = vld [vmem:[#allocation13 + $0x468] sm:$0xff]  ;;  %v6627_v38 = vpack.c.bf16 %v4684_v37, %v4680_v30 }
 0xaf1   :  { %v6667_v9 = vpack.c.bf16 %v4686_v61, %v4682_v50  ;;  %v4562_v30 = vld [vmem:[#allocation13 + $0x50] sm:$0xff]  ;;  %v4573_v61 = vld [vmem:[#allocation13 + $0xa8] sm:$0xff] }
 0xaf2   :  { %6552 = vmatpush1.bf16.msra.mxu1 %v6551_v40  ;;  %v6611_v40 = vpack.c.bf16 %v4652_v8, %v4648_v21  ;;  %v4690_v21 = vld [vmem:[#allocation13 + $0x450] sm:$0xff] }
 0xaf3   :  { %6592 = vmatpush1.bf16.msra.mxu0 %v6591_v41  ;;  %6554 = vmatprep.subr.bf16.mxu1 %v6553_v51  ;;  %v6651_v41 = vpack.c.bf16 %v4654_v20, %v4650_v13  ;;  %v6613_v51 = vpack.c.bf16 %v4661_v29, %v4657_v18  ;;  %v4694_v13 = vld [vmem:[#allocation13 + $0x470] sm:$0xff]  ;;  %v4701_v20 = vld [vmem:[#allocation13 + $0x4a8] sm:$0xff]  ;;  %v4699_v18 = vld [vmem:[#allocation13 + $0x498] sm:$0xff] }
 0xaf4   :  { %6594 = vmatprep.subr.bf16.mxu0 %v6593_v16  ;;  %v6653_v16 = vpack.c.bf16 %v4663_v4, %v4659_v46  ;;  %v4703_v29 = vld [vmem:[#allocation13 + $0x4b8] sm:$0xff]  ;;  %v6671_v4 = vpack.c.bf16 %v4694_v13, %v4690_v21  ;;  %v4566_v50 = vld [vmem:[#allocation13 + $0x70] sm:$0xff] }
 0xaf5   :  { %v4570_v21 = vld [vmem:[#allocation13 + $0x90] sm:$0xff] }
 0xaf6   :  { %6556 = vmatpush1.bf16.msra.mxu1 %v6555_v59  ;;  %v6615_v59 = vpack.c.bf16 %v4660_v63, %v4656_v52  ;;  %v4698_v52 = vld [vmem:[#allocation13 + $0x490] sm:$0xff]  ;;  %v6673_v63 = vpack.c.bf16 %v4703_v29, %v4699_v18  ;;  %v4579_v18 = vld [vmem:[#allocation13 + $0xd8] sm:$0xff] }
 0xaf7   :  { %6596 = vmatpush1.bf16.msra.mxu0 %v6595_v60  ;;  %6558 = vmatprep.subr.bf16.mxu1 %v6557_v6  ;;  %v6655_v60 = vpack.c.bf16 %v4662_v17, %v4658_v0  ;;  %v6617_v6 = vpack.c.bf16 %v4669_v34, %v4665_v33  ;;  %v4702_v0 = vld [vmem:[#allocation13 + $0x4b0] sm:$0xff]  ;;  %v4709_v17 = vld [vmem:[#allocation13 + $0x4e8] sm:$0xff]  ;;  %v4707_v33 = vld [vmem:[#allocation13 + $0x4d8] sm:$0xff] }
 0xaf8   :  { %6598 = vmatprep.subr.bf16.mxu0 %v6597_v32  ;;  %v6657_v32 = vpack.c.bf16 %v4671_v49, %v4667_v48  ;;  %v4711_v34 = vld [vmem:[#allocation13 + $0x4f8] sm:$0xff]  ;;  %v6675_v49 = vpack.c.bf16 %v4702_v0, %v4698_v52  ;;  %v4574_v13 = vld [vmem:[#allocation13 + $0xb0] sm:$0xff] }
 0xaf9   :  { %v4583_v29 = vld [vmem:[#allocation13 + $0xf8] sm:$0xff]  ;;  %v4578_v52 = vld [vmem:[#allocation13 + $0xd0] sm:$0xff] }
 0xafa   :  { %6560 = vmatpush1.bf16.msra.mxu1 %v6559_v53  ;;  %v6619_v53 = vpack.c.bf16 %v4668_v23, %v4664_v10  ;;  %v4706_v10 = vld [vmem:[#allocation13 + $0x4d0] sm:$0xff]  ;;  %v6677_v23 = vpack.c.bf16 %v4711_v34, %v4707_v33  ;;  %v4587_v33 = vld [vmem:[#allocation13 + $0x118] sm:$0xff] }
 0xafb   :  { %6600 = vmatpush1.bf16.msra.mxu0 %v6599_v42  ;;  %6602 = vmatprep.subr.bf16.mxu1 %v6601_v27  ;;  %v6659_v42 = vpack.c.bf16 %v4670_v58, %v4666_v24  ;;  %v6621_v27 = vpack.c.bf16 %v4677_v31, %v4673_v5  ;;  %v4710_v24 = vld [vmem:[#allocation13 + $0x4f0] sm:$0xff]  ;;  %v4557_v58 = vld [vmem:[#allocation13 + $0x28] sm:$0xff]  ;;  %v4555_v5 = vld [vmem:[#allocation13 + $0x18] sm:$0xff] }
 0xafc   :  { %6642 = vmatprep.subr.bf16.mxu0 %v6641_v56  ;;  %v4674_v56 = vld [vmem:[#allocation13 + $0x3d0] sm:$0xff]  ;;  %v4559_v31 = vld [vmem:[#allocation13 + $0x38] sm:$0xff]  ;;  %v6679_v36 = vpack.c.bf16 %v4710_v24, %v4706_v10 }
 0xafd   :  { %4412 = vmatmul.mubr.f32.vlgmr.msra.gmra.mrb[98].mxu1 %v4342_v55  ;;  %v6721_v47 = vpack.c.bf16 %v4559_v31, %v4555_v5  ;;  %v4582_v0 = vld [vmem:[#allocation13 + $0xf0] sm:$0xff]  ;;  %v4591_v34 = vld [vmem:[#allocation13 + $0x138] sm:$0xff] }
 0xafe   :  { %4483 = vmatmul.mubr.f32.vlgmr.msra.gmra.mrb[88].mxu0 %v4342_v55  ;;  %6604 = vmatpush1.bf16.msra.mxu1 %v6603_v3  ;;  %v4683_v3 = vld [vmem:[#allocation13 + $0x418] sm:$0xff]  ;;  %v6663_v55 = vpack.c.bf16 %v4678_v2, %v4674_v56  ;;  %v4558_v56 = vld [vmem:[#allocation13 + $0x30] sm:$0xff]  ;;  %v4565_v2 = vld [vmem:[#allocation13 + $0x68] sm:$0xff] }
 0xaff   :  { %5693 = vmatprep.mubr.msk.f32.mxu1 %vm240_vm0, %v4713_v28  ;;  %6644 = vmatpush1.bf16.msra.mxu0 %v6643_v62  ;;  %v6625_v62 = vpack.c.bf16 %v4685_v19, %v4681_v7  ;;  %v4563_v19 = vld [vmem:[#allocation13 + $0x58] sm:$0xff]  ;;  %v4586_v10 = vld [vmem:[#allocation13 + $0x110] sm:$0xff] }
 0xb00   :  { %5694 = vmatprep.mubr.msk.f32.mxu0 %vm240_vm0, %v4713_v28  ;;  %6606 = vmatprep.subr.bf16.mxu1 %v6605_v15  ;;  %v6665_v15 = vpack.c.bf16 %v4687_v35, %v4683_v3  ;;  %v4691_v28 = vld [vmem:[#allocation13 + $0x458] sm:$0xff]  ;;  %v4712_v35 = vrot.slane %v8491_v43, 5  ;;  %v4590_v24 = vld [vmem:[#allocation13 + $0x130] sm:$0xff] }
 0xb01   :  { %6646 = vmatprep.subr.bf16.mxu0 %v6645_v39  ;;  %v4695_v39 = vld [vmem:[#allocation13 + $0x478] sm:$0xff] }
 0xb02   :  { %6608 = vmatpush1.bf16.msra.mxu1 %v6607_v22  ;;  %v6629_v22 = vpack.c.bf16 %v4693_v45, %v4689_v44  ;;  %v6669_v8 = vpack.c.bf16 %v4695_v39, %v4691_v28  ;;  %v4567_v3 = vld [vmem:[#allocation13 + $0x78] sm:$0xff]  ;;  %v4860_v44 = vrot.slane %v8493_v11, 4 }
 0xb03   :  { %6648 = vmatpush1.bf16.msra.mxu0 %v6647_v25  ;;  %6610 = vmatprep.subr.bf16.mxu1 %v6609_v12  ;;  %v4688_v25 = vld [vmem:[#allocation13 + $0x440] sm:$0xff]  ;;  %v6725_v45 = vpack.c.bf16 %v4567_v3, %v4563_v19  ;;  %v4571_v28 = vld [vmem:[#allocation13 + $0x98] sm:$0xff] }
 0xb04   :  { %6650 = vmatprep.subr.bf16.mxu0 %v6649_v14  ;;  %v4692_v12 = vld [vmem:[#allocation13 + $0x460] sm:$0xff]  ;;  %v4697_v14 = vld [vmem:[#allocation13 + $0x488] sm:$0xff]  ;;  %v4575_v39 = vld [vmem:[#allocation13 + $0xb8] sm:$0xff] }
 0xb05   :  { %v6631_v46 = vpack.c.bf16 %v4692_v12, %v4688_v25  ;;  %v4568_v25 = vld [vmem:[#allocation13 + $0x80] sm:$0xff]  ;;  %v4595_v5 = vld [vmem:[#allocation13 + $0x158] sm:$0xff] }
 0xb06   :  { %6612 = vmatpush1.bf16.msra.mxu1 %v6611_v40  ;;  %v6633_v40 = vpack.c.bf16 %v4701_v20, %v4697_v14  ;;  %v4572_v12 = vld [vmem:[#allocation13 + $0xa0] sm:$0xff]  ;;  %v4577_v14 = vld [vmem:[#allocation13 + $0xc8] sm:$0xff]  ;;  %v4599_v31 = vld [vmem:[#allocation13 + $0x178] sm:$0xff] }
 0xb07   :  { %6652 = vmatpush1.bf16.msra.mxu0 %v6651_v41  ;;  %6614 = vmatprep.subr.bf16.mxu1 %v6613_v51  ;;  %v4696_v41 = vld [vmem:[#allocation13 + $0x480] sm:$0xff]  ;;  %v4581_v20 = vld [vmem:[#allocation13 + $0xe8] sm:$0xff]  ;;  %v4607_v19 = vld [vmem:[#allocation13 + $0x1b8] sm:$0xff] }
 0xb08   :  { %6654 = vmatprep.subr.bf16.mxu0 %v6653_v16  ;;  %v4700_v51 = vld [vmem:[#allocation13 + $0x4a0] sm:$0xff]  ;;  %v4705_v16 = vld [vmem:[#allocation13 + $0x4c8] sm:$0xff] }
 0xb09   :  { %v6635_v48 = vpack.c.bf16 %v4700_v51, %v4696_v41  ;;  %v4576_v41 = vld [vmem:[#allocation13 + $0xc0] sm:$0xff] }
 0xb0a   :  { %6616 = vmatpush1.bf16.msra.mxu1 %v6615_v59  ;;  %v6637_v59 = vpack.c.bf16 %v4709_v17, %v4705_v16  ;;  %v4580_v51 = vld [vmem:[#allocation13 + $0xe0] sm:$0xff]  ;;  %v4585_v16 = vld [vmem:[#allocation13 + $0x108] sm:$0xff] }
 0xb0b   :  { %6656 = vmatpush1.bf16.msra.mxu0 %v6655_v60  ;;  %6618 = vmatprep.subr.bf16.mxu1 %v6617_v6  ;;  %v4704_v60 = vld [vmem:[#allocation13 + $0x4c0] sm:$0xff]  ;;  %v4589_v17 = vld [vmem:[#allocation13 + $0x128] sm:$0xff] }
 0xb0c   :  { %6658 = vmatprep.subr.bf16.mxu0 %v6657_v32  ;;  %v4708_v6 = vld [vmem:[#allocation13 + $0x4e0] sm:$0xff]  ;;  %v4553_v32 = vld [vmem:[#allocation13 + $0x8] sm:$0xff] }
 0xb0d   :  { %v6639_v57 = vpack.c.bf16 %v4708_v6, %v4704_v60  ;;  %v4584_v60 = vld [vmem:[#allocation13 + $0x100] sm:$0xff] }
 0xb0e   :  { %6620 = vmatpush1.bf16.msra.mxu1 %v6619_v53  ;;  %v6681_v53 = vpack.c.bf16 %v4557_v58, %v4553_v32  ;;  %v4588_v6 = vld [vmem:[#allocation13 + $0x120] sm:$0xff]  ;;  %v4593_v32 = vld [vmem:[#allocation13 + $0x148] sm:$0xff] }
 0xb0f   :  { %6660 = vmatpush1.bf16.msra.mxu0 %v6659_v42  ;;  %6622 = vmatprep.subr.bf16.mxu1 %v6621_v27  ;;  %v4552_v42 = vld [vmem:[#allocation13] sm:$0xff]  ;;  %v4597_v58 = vld [vmem:[#allocation13 + $0x168] sm:$0xff] }
 0xb10   :  { %6662 = vmatprep.subr.bf16.mxu0 %v6661_v54  ;;  %v4556_v27 = vld [vmem:[#allocation13 + $0x20] sm:$0xff]  ;;  %v4561_v54 = vld [vmem:[#allocation13 + $0x48] sm:$0xff] }
 0xb11   :  { %v6683_v7 = vpack.c.bf16 %v4556_v27, %v4552_v42  ;;  %v6685_v37 = vpack.c.bf16 %v4565_v2, %v4561_v54  ;;  %v4592_v42 = vld [vmem:[#allocation13 + $0x140] sm:$0xff]  ;;  %v4601_v54 = vld [vmem:[#allocation13 + $0x188] sm:$0xff] }
 0xb12   :  { %6624 = vmatpush1.bf16.msra.mxu1 %v6623_v26  ;;  %v6723_v26 = vpack.c.bf16 %v4558_v56, %v4554_v1  ;;  %v4596_v27 = vld [vmem:[#allocation13 + $0x160] sm:$0xff]  ;;  %v6741_v1 = vpack.c.bf16 %v4599_v31, %v4595_v5  ;;  %v4598_v56 = vld [vmem:[#allocation13 + $0x170] sm:$0xff]  ;;  %v4605_v2 = vld [vmem:[#allocation13 + $0x1a8] sm:$0xff] }
 0xb13   :  { %6664 = vmatpush1.bf16.msra.mxu0 %v6663_v55  ;;  %6626 = vmatprep.subr.bf16.mxu1 %v6625_v62  ;;  %v4560_v55 = vld [vmem:[#allocation13 + $0x40] sm:$0xff]  ;;  %v6703_v3 = vpack.c.bf16 %v4596_v27, %v4592_v42  ;;  %v5008_v27 = vld [vmem:[#allocation13 + $0x510] sm:$0xff] }
 0xb14   :  { %6666 = vmatprep.subr.bf16.mxu0 %v6665_v15  ;;  %v4564_v62 = vld [vmem:[#allocation13 + $0x60] sm:$0xff]  ;;  %v4569_v15 = vld [vmem:[#allocation13 + $0x88] sm:$0xff] }
 0xb16   :  { %6628 = vmatpush1.bf16.msra.mxu1 %v6627_v38  ;;  %v6687_v38 = vpack.c.bf16 %v4564_v62, %v4560_v55  ;;  %v4600_v55 = vld [vmem:[#allocation13 + $0x180] sm:$0xff] }
 0xb17   :  { %6668 = vmatpush1.bf16.msra.mxu0 %v6667_v9  ;;  %6630 = vmatprep.subr.bf16.mxu1 %v6629_v22  ;;  %v6727_v9 = vpack.c.bf16 %v4566_v50, %v4562_v30  ;;  %v6689_v22 = vpack.c.bf16 %v4573_v61, %v4569_v15  ;;  %v4604_v62 = vld [vmem:[#allocation13 + $0x1a0] sm:$0xff]  ;;  %v4602_v30 = vld [vmem:[#allocation13 + $0x190] sm:$0xff]  ;;  %v4609_v15 = vld [vmem:[#allocation13 + $0x1c8] sm:$0xff] }
 0xb18   :  { %6670 = vmatprep.subr.bf16.mxu0 %v6669_v8  ;;  %v6729_v8 = vpack.c.bf16 %v4575_v39, %v4571_v28  ;;  %v4606_v50 = vld [vmem:[#allocation13 + $0x1b0] sm:$0xff]  ;;  %v4613_v61 = vld [vmem:[#allocation13 + $0x1e8] sm:$0xff]  ;;  %v6707_v28 = vpack.c.bf16 %v4604_v62, %v4600_v55 }
 0xb19   :  { %v6747_v39 = vpack.c.bf16 %v4606_v50, %v4602_v30  ;;  %v5016_v55 = vld [vmem:[#allocation13 + $0x550] sm:$0xff]  ;;  %v5027_v50 = vld [vmem:[#allocation13 + $0x5a8] sm:$0xff] }
 0xb1a   :  { %6632 = vmatpush1.bf16.msra.mxu1 %v6631_v46  ;;  %v6691_v46 = vpack.c.bf16 %v4572_v12, %v4568_v25  ;;  %v4610_v25 = vld [vmem:[#allocation13 + $0x1d0] sm:$0xff] }
 0xb1b   :  { %6672 = vmatpush1.bf16.msra.mxu0 %v6671_v4  ;;  %6634 = vmatprep.subr.bf16.mxu1 %v6633_v40  ;;  %v6731_v4 = vpack.c.bf16 %v4574_v13, %v4570_v21  ;;  %v6693_v40 = vpack.c.bf16 %v4581_v20, %v4577_v14  ;;  %v4614_v21 = vld [vmem:[#allocation13 + $0x1f0] sm:$0xff]  ;;  %v4621_v13 = vld [vmem:[#allocation13 + $0x228] sm:$0xff]  ;;  %v4619_v14 = vld [vmem:[#allocation13 + $0x218] sm:$0xff] }
 0xb1c   :  { %6674 = vmatprep.subr.bf16.mxu0 %v6673_v63  ;;  %v6733_v63 = vpack.c.bf16 %v4583_v29, %v4579_v18  ;;  %v4623_v20 = vld [vmem:[#allocation13 + $0x238] sm:$0xff]  ;;  %v6751_v29 = vpack.c.bf16 %v4614_v21, %v4610_v25  ;;  %v5020_v30 = vld [vmem:[#allocation13 + $0x570] sm:$0xff] }
 0xb1d   :  { %v5024_v25 = vld [vmem:[#allocation13 + $0x590] sm:$0xff] }
 0xb1e   :  { %6636 = vmatpush1.bf16.msra.mxu1 %v6635_v48  ;;  %v6695_v48 = vpack.c.bf16 %v4580_v51, %v4576_v41  ;;  %v4618_v41 = vld [vmem:[#allocation13 + $0x210] sm:$0xff]  ;;  %v6753_v51 = vpack.c.bf16 %v4623_v20, %v4619_v14  ;;  %v5033_v14 = vld [vmem:[#allocation13 + $0x5d8] sm:$0xff] }
 0xb1f   :  { %6676 = vmatpush1.bf16.msra.mxu0 %v6675_v49  ;;  %6638 = vmatprep.subr.bf16.mxu1 %v6637_v59  ;;  %v6735_v49 = vpack.c.bf16 %v4582_v0, %v4578_v52  ;;  %v6697_v59 = vpack.c.bf16 %v4589_v17, %v4585_v16  ;;  %v4622_v52 = vld [vmem:[#allocation13 + $0x230] sm:$0xff]  ;;  %v4629_v0 = vld [vmem:[#allocation13 + $0x268] sm:$0xff]  ;;  %v4627_v16 = vld [vmem:[#allocation13 + $0x258] sm:$0xff] }
 0xb20   :  { %6678 = vmatprep.subr.bf16.mxu0 %v6677_v23  ;;  %v6737_v23 = vpack.c.bf16 %v4591_v34, %v4587_v33  ;;  %v4631_v17 = vld [vmem:[#allocation13 + $0x278] sm:$0xff]  ;;  %v6755_v34 = vpack.c.bf16 %v4622_v52, %v4618_v41  ;;  %v5028_v21 = vld [vmem:[#allocation13 + $0x5b0] sm:$0xff] }
 0xb21   :  { %v5037_v20 = vld [vmem:[#allocation13 + $0x5f8] sm:$0xff]  ;;  %v5032_v41 = vld [vmem:[#allocation13 + $0x5d0] sm:$0xff] }
 0xb22   :  { %6640 = vmatpush1.bf16.msra.mxu1 %v6639_v57  ;;  %v6699_v57 = vpack.c.bf16 %v4588_v6, %v4584_v60  ;;  %v4626_v60 = vld [vmem:[#allocation13 + $0x250] sm:$0xff]  ;;  %v6757_v6 = vpack.c.bf16 %v4631_v17, %v4627_v16  ;;  %v5041_v16 = vld [vmem:[#allocation13 + $0x618] sm:$0xff] }
 0xb23   :  { %6680 = vmatpush1.bf16.msra.mxu0 %v6679_v36  ;;  %6682 = vmatprep.subr.bf16.mxu1 %v6681_v53  ;;  %v6739_v36 = vpack.c.bf16 %v4590_v24, %v4586_v10  ;;  %v6701_v53 = vpack.c.bf16 %v4597_v58, %v4593_v32  ;;  %v4630_v10 = vld [vmem:[#allocation13 + $0x270] sm:$0xff]  ;;  %v5011_v24 = vld [vmem:[#allocation13 + $0x528] sm:$0xff]  ;;  %v5009_v32 = vld [vmem:[#allocation13 + $0x518] sm:$0xff] }
 0xb24   :  { %6722 = vmatprep.subr.bf16.mxu0 %v6721_v47  ;;  %v4594_v47 = vld [vmem:[#allocation13 + $0x150] sm:$0xff]  ;;  %v5013_v58 = vld [vmem:[#allocation13 + $0x538] sm:$0xff]  ;;  %v6759_v31 = vpack.c.bf16 %v4630_v10, %v4626_v60 }
 0xb25   :  { %4782 = vmatmul.mubr.f32.vlgmr.msra.gmra.mrb[100].mxu1 %v4712_v35  ;;  %v6801_v42 = vpack.c.bf16 %v5013_v58, %v5009_v32  ;;  %v5036_v52 = vld [vmem:[#allocation13 + $0x5f0] sm:$0xff]  ;;  %v5045_v17 = vld [vmem:[#allocation13 + $0x638] sm:$0xff] }
 0xb26   :  { %4853 = vmatmul.mubr.f32.vlgmr.msra.gmra.mrb[90].mxu0 %v4712_v35  ;;  %6684 = vmatpush1.bf16.msra.mxu1 %v6683_v7  ;;  %v4603_v7 = vld [vmem:[#allocation13 + $0x198] sm:$0xff]  ;;  %v6743_v35 = vpack.c.bf16 %v4598_v56, %v4594_v47  ;;  %v5012_v47 = vld [vmem:[#allocation13 + $0x530] sm:$0xff]  ;;  %v5019_v56 = vld [vmem:[#allocation13 + $0x568] sm:$0xff] }
 0xb27   :  { %5695 = vmatprep.mubr.msk.f32.mxu1 %vm240_vm0, %v4860_v44  ;;  %6724 = vmatpush1.bf16.msra.mxu0 %v6723_v26  ;;  %v6705_v26 = vpack.c.bf16 %v4605_v2, %v4601_v54  ;;  %v5017_v2 = vld [vmem:[#allocation13 + $0x558] sm:$0xff]  ;;  %v5040_v60 = vld [vmem:[#allocation13 + $0x610] sm:$0xff] }
 0xb28   :  { %5696 = vmatprep.mubr.msk.f32.mxu0 %vm240_vm0, %v4860_v44  ;;  %6686 = vmatprep.subr.bf16.mxu1 %v6685_v37  ;;  %v6745_v37 = vpack.c.bf16 %v4607_v19, %v4603_v7  ;;  %v4611_v44 = vld [vmem:[#allocation13 + $0x1d8] sm:$0xff]  ;;  %v4859_v19 = vrot.slane %v8491_v43, 4  ;;  %v5044_v10 = vld [vmem:[#allocation13 + $0x630] sm:$0xff] }
 0xb29   :  { %6726 = vmatprep.subr.bf16.mxu0 %v6725_v45  ;;  %v4615_v45 = vld [vmem:[#allocation13 + $0x1f8] sm:$0xff] }
 0xb2a   :  { %6688 = vmatpush1.bf16.msra.mxu1 %v6687_v38  ;;  %v6709_v38 = vpack.c.bf16 %v4613_v61, %v4609_v15  ;;  %v6749_v12 = vpack.c.bf16 %v4615_v45, %v4611_v44  ;;  %v5021_v7 = vld [vmem:[#allocation13 + $0x578] sm:$0xff]  ;;  %v5087_v15 = vrot.slane %v8493_v11, 6 }
 0xb2b   :  { %6728 = vmatpush1.bf16.msra.mxu0 %v6727_v9  ;;  %6690 = vmatprep.subr.bf16.mxu1 %v6689_v22  ;;  %v4608_v9 = vld [vmem:[#allocation13 + $0x1c0] sm:$0xff]  ;;  %v6805_v61 = vpack.c.bf16 %v5021_v7, %v5017_v2  ;;  %v5025_v44 = vld [vmem:[#allocation13 + $0x598] sm:$0xff] }
 0xb2c   :  { %6730 = vmatprep.subr.bf16.mxu0 %v6729_v8  ;;  %v4612_v22 = vld [vmem:[#allocation13 + $0x1e0] sm:$0xff]  ;;  %v4617_v8 = vld [vmem:[#allocation13 + $0x208] sm:$0xff]  ;;  %v5029_v45 = vld [vmem:[#allocation13 + $0x5b8] sm:$0xff] }
 0xb2d   :  { %v6711_v18 = vpack.c.bf16 %v4612_v22, %v4608_v9  ;;  %v5022_v9 = vld [vmem:[#allocation13 + $0x580] sm:$0xff]  ;;  %v5049_v32 = vld [vmem:[#allocation13 + $0x658] sm:$0xff] }
 0xb2e   :  { %6692 = vmatpush1.bf16.msra.mxu1 %v6691_v46  ;;  %v6713_v46 = vpack.c.bf16 %v4621_v13, %v4617_v8  ;;  %v5026_v22 = vld [vmem:[#allocation13 + $0x5a0] sm:$0xff]  ;;  %v5031_v8 = vld [vmem:[#allocation13 + $0x5c8] sm:$0xff]  ;;  %v5053_v58 = vld [vmem:[#allocation13 + $0x678] sm:$0xff] }
 0xb2f   :  { %6732 = vmatpush1.bf16.msra.mxu0 %v6731_v4  ;;  %6694 = vmatprep.subr.bf16.mxu1 %v6693_v40  ;;  %v4616_v4 = vld [vmem:[#allocation13 + $0x200] sm:$0xff]  ;;  %v5035_v13 = vld [vmem:[#allocation13 + $0x5e8] sm:$0xff]  ;;  %v5061_v2 = vld [vmem:[#allocation13 + $0x6b8] sm:$0xff] }
 0xb30   :  { %6734 = vmatprep.subr.bf16.mxu0 %v6733_v63  ;;  %v4620_v40 = vld [vmem:[#allocation13 + $0x220] sm:$0xff]  ;;  %v4625_v63 = vld [vmem:[#allocation13 + $0x248] sm:$0xff] }
 0xb31   :  { %v6715_v33 = vpack.c.bf16 %v4620_v40, %v4616_v4  ;;  %v5030_v4 = vld [vmem:[#allocation13 + $0x5c0] sm:$0xff] }
 0xb32   :  { %6696 = vmatpush1.bf16.msra.mxu1 %v6695_v48  ;;  %v6717_v48 = vpack.c.bf16 %v4629_v0, %v4625_v63  ;;  %v5034_v40 = vld [vmem:[#allocation13 + $0x5e0] sm:$0xff]  ;;  %v5039_v63 = vld [vmem:[#allocation13 + $0x608] sm:$0xff] }
 0xb33   :  { %6736 = vmatpush1.bf16.msra.mxu0 %v6735_v49  ;;  %6698 = vmatprep.subr.bf16.mxu1 %v6697_v59  ;;  %v4624_v49 = vld [vmem:[#allocation13 + $0x240] sm:$0xff]  ;;  %v5043_v0 = vld [vmem:[#allocation13 + $0x628] sm:$0xff] }
 0xb34   :  { %6738 = vmatprep.subr.bf16.mxu0 %v6737_v23  ;;  %v4628_v59 = vld [vmem:[#allocation13 + $0x260] sm:$0xff]  ;;  %v5007_v23 = vld [vmem:[#allocation13 + $0x508] sm:$0xff] }
 0xb35   :  { %v6719_v5 = vpack.c.bf16 %v4628_v59, %v4624_v49  ;;  %v5038_v49 = vld [vmem:[#allocation13 + $0x600] sm:$0xff] }
 0xb36   :  { %6700 = vmatpush1.bf16.msra.mxu1 %v6699_v57  ;;  %v6761_v57 = vpack.c.bf16 %v5011_v24, %v5007_v23  ;;  %v5042_v59 = vld [vmem:[#allocation13 + $0x620] sm:$0xff]  ;;  %v5047_v23 = vld [vmem:[#allocation13 + $0x648] sm:$0xff] }
 0xb37   :  { %6740 = vmatpush1.bf16.msra.mxu0 %v6739_v36  ;;  %6702 = vmatprep.subr.bf16.mxu1 %v6701_v53  ;;  %v5006_v36 = vld [vmem:[#allocation13 + $0x500] sm:$0xff]  ;;  %v5051_v24 = vld [vmem:[#allocation13 + $0x668] sm:$0xff] }
 0xb38   :  { %6742 = vmatprep.subr.bf16.mxu0 %v6741_v1  ;;  %v5010_v53 = vld [vmem:[#allocation13 + $0x520] sm:$0xff]  ;;  %v5015_v1 = vld [vmem:[#allocation13 + $0x548] sm:$0xff] }
 0xb39   :  { %v6763_v54 = vpack.c.bf16 %v5010_v53, %v5006_v36  ;;  %v6765_v62 = vpack.c.bf16 %v5019_v56, %v5015_v1  ;;  %v5046_v36 = vld [vmem:[#allocation13 + $0x640] sm:$0xff]  ;;  %v5055_v1 = vld [vmem:[#allocation13 + $0x688] sm:$0xff] }
 0xb3a   :  { %6704 = vmatpush1.bf16.msra.mxu1 %v6703_v3  ;;  %v6803_v3 = vpack.c.bf16 %v5012_v47, %v5008_v27  ;;  %v5050_v53 = vld [vmem:[#allocation13 + $0x660] sm:$0xff]  ;;  %v6821_v27 = vpack.c.bf16 %v5053_v58, %v5049_v32  ;;  %v5052_v47 = vld [vmem:[#allocation13 + $0x670] sm:$0xff]  ;;  %v5059_v56 = vld [vmem:[#allocation13 + $0x6a8] sm:$0xff] }
 0xb3b   :  { %6744 = vmatpush1.bf16.msra.mxu0 %v6743_v35  ;;  %6706 = vmatprep.subr.bf16.mxu1 %v6705_v26  ;;  %v5014_v35 = vld [vmem:[#allocation13 + $0x540] sm:$0xff]  ;;  %v6783_v7 = vpack.c.bf16 %v5050_v53, %v5046_v36  ;;  %v5239_v53 = vld [vmem:[#allocation13 + $0x790] sm:$0xff] }
 0xb3c   :  { %6746 = vmatprep.subr.bf16.mxu0 %v6745_v37  ;;  %v5018_v26 = vld [vmem:[#allocation13 + $0x560] sm:$0xff]  ;;  %v5023_v37 = vld [vmem:[#allocation13 + $0x588] sm:$0xff] }
 0xb3e   :  { %6708 = vmatpush1.bf16.msra.mxu1 %v6707_v28  ;;  %v6767_v28 = vpack.c.bf16 %v5018_v26, %v5014_v35  ;;  %v5054_v35 = vld [vmem:[#allocation13 + $0x680] sm:$0xff] }
 0xb3f   :  { %6748 = vmatpush1.bf16.msra.mxu0 %v6747_v39  ;;  %6710 = vmatprep.subr.bf16.mxu1 %v6709_v38  ;;  %v6807_v39 = vpack.c.bf16 %v5020_v30, %v5016_v55  ;;  %v6769_v38 = vpack.c.bf16 %v5027_v50, %v5023_v37  ;;  %v5058_v26 = vld [vmem:[#allocation13 + $0x6a0] sm:$0xff]  ;;  %v5056_v55 = vld [vmem:[#allocation13 + $0x690] sm:$0xff]  ;;  %v5063_v37 = vld [vmem:[#allocation13 + $0x6c8] sm:$0xff] }
 0xb40   :  { %6750 = vmatprep.subr.bf16.mxu0 %v6749_v12  ;;  %v6809_v12 = vpack.c.bf16 %v5029_v45, %v5025_v44  ;;  %v5060_v30 = vld [vmem:[#allocation13 + $0x6b0] sm:$0xff]  ;;  %v5067_v50 = vld [vmem:[#allocation13 + $0x6e8] sm:$0xff]  ;;  %v6787_v44 = vpack.c.bf16 %v5058_v26, %v5054_v35 }
 0xb41   :  { %v6827_v45 = vpack.c.bf16 %v5060_v30, %v5056_v55  ;;  %v5247_v35 = vld [vmem:[#allocation13 + $0x7d0] sm:$0xff]  ;;  %v5258_v30 = vld [vmem:[#allocation13 + $0x828] sm:$0xff] }
 0xb42   :  { %6712 = vmatpush1.bf16.msra.mxu1 %v6711_v18  ;;  %v6771_v18 = vpack.c.bf16 %v5026_v22, %v5022_v9  ;;  %v5064_v9 = vld [vmem:[#allocation13 + $0x6d0] sm:$0xff] }
 0xb43   :  { %6752 = vmatpush1.bf16.msra.mxu0 %v6751_v29  ;;  %6714 = vmatprep.subr.bf16.mxu1 %v6713_v46  ;;  %v6811_v29 = vpack.c.bf16 %v5028_v21, %v5024_v25  ;;  %v6773_v46 = vpack.c.bf16 %v5035_v13, %v5031_v8  ;;  %v5068_v25 = vld [vmem:[#allocation13 + $0x6f0] sm:$0xff]  ;;  %v5075_v21 = vld [vmem:[#allocation13 + $0x728] sm:$0xff]  ;;  %v5073_v8 = vld [vmem:[#allocation13 + $0x718] sm:$0xff] }
 0xb44   :  { %6754 = vmatprep.subr.bf16.mxu0 %v6753_v51  ;;  %v6813_v51 = vpack.c.bf16 %v5037_v20, %v5033_v14  ;;  %v5077_v13 = vld [vmem:[#allocation13 + $0x738] sm:$0xff]  ;;  %v6831_v20 = vpack.c.bf16 %v5068_v25, %v5064_v9  ;;  %v5251_v55 = vld [vmem:[#allocation13 + $0x7f0] sm:$0xff] }
 0xb45   :  { %v5255_v9 = vld [vmem:[#allocation13 + $0x810] sm:$0xff] }
 0xb46   :  { %6716 = vmatpush1.bf16.msra.mxu1 %v6715_v33  ;;  %v6775_v33 = vpack.c.bf16 %v5034_v40, %v5030_v4  ;;  %v5072_v4 = vld [vmem:[#allocation13 + $0x710] sm:$0xff]  ;;  %v6833_v40 = vpack.c.bf16 %v5077_v13, %v5073_v8  ;;  %v5268_v8 = vld [vmem:[#allocation13 + $0x878] sm:$0xff] }
 0xb47   :  { %6756 = vmatpush1.bf16.msra.mxu0 %v6755_v34  ;;  %6718 = vmatprep.subr.bf16.mxu1 %v6717_v48  ;;  %v6815_v34 = vpack.c.bf16 %v5036_v52, %v5032_v41  ;;  %v6777_v48 = vpack.c.bf16 %v5043_v0, %v5039_v63  ;;  %v5076_v41 = vld [vmem:[#allocation13 + $0x730] sm:$0xff]  ;;  %v5083_v52 = vld [vmem:[#allocation13 + $0x768] sm:$0xff]  ;;  %v5081_v63 = vld [vmem:[#allocation13 + $0x758] sm:$0xff] }
 0xb48   :  { %6758 = vmatprep.subr.bf16.mxu0 %v6757_v6  ;;  %v6817_v6 = vpack.c.bf16 %v5045_v17, %v5041_v16  ;;  %v5085_v0 = vld [vmem:[#allocation13 + $0x778] sm:$0xff]  ;;  %v6835_v17 = vpack.c.bf16 %v5076_v41, %v5072_v4  ;;  %v5259_v25 = vld [vmem:[#allocation13 + $0x830] sm:$0xff]  ;;  %v5270_v41 = vld [vmem:[#allocation13 + $0x888] sm:$0xff] }
 0xb4a   :  { %6720 = vmatpush1.bf16.msra.mxu1 %v6719_v5  ;;  %v6779_v5 = vpack.c.bf16 %v5042_v59, %v5038_v49  ;;  %v5080_v49 = vld [vmem:[#allocation13 + $0x750] sm:$0xff]  ;;  %v6837_v59 = vpack.c.bf16 %v5085_v0, %v5081_v63  ;;  %v5276_v63 = vld [vmem:[#allocation13 + $0x8b8] sm:$0xff] }
 0xb4b   :  { %6760 = vmatpush1.bf16.msra.mxu0 %v6759_v31  ;;  %6762 = vmatprep.subr.bf16.mxu1 %v6761_v57  ;;  %v6819_v31 = vpack.c.bf16 %v5044_v10, %v5040_v60  ;;  %v6781_v57 = vpack.c.bf16 %v5051_v24, %v5047_v23  ;;  %v5084_v60 = vld [vmem:[#allocation13 + $0x770] sm:$0xff]  ;;  %v5242_v10 = vld [vmem:[#allocation13 + $0x7a8] sm:$0xff]  ;;  %v5240_v23 = vld [vmem:[#allocation13 + $0x798] sm:$0xff] }
 0xb4c   :  { %6802 = vmatprep.subr.bf16.mxu0 %v6801_v42  ;;  %v5048_v42 = vld [vmem:[#allocation13 + $0x650] sm:$0xff]  ;;  %v5244_v24 = vld [vmem:[#allocation13 + $0x7b8] sm:$0xff]  ;;  %v6839_v58 = vpack.c.bf16 %v5084_v60, %v5080_v49  ;;  %v5278_v60 = vld [vmem:[#allocation13 + $0x8c8] sm:$0xff] }
 0xb4d   :  { %4929 = vmatmul.mubr.f32.vlgmr.msra.gmra.mrb[100].mxu1 %v4859_v19  ;;  %v6881_v36 = vpack.c.bf16 %v5244_v24, %v5240_v23  ;;  %v5284_v23 = vld [vmem:[#allocation13 + $0x8f8] sm:$0xff] }
 0xb4e   :  { %5000 = vmatmul.mubr.f32.vlgmr.msra.gmra.mrb[90].mxu0 %v4859_v19  ;;  %6764 = vmatpush1.bf16.msra.mxu1 %v6763_v54  ;;  %v5057_v54 = vld [vmem:[#allocation13 + $0x698] sm:$0xff]  ;;  %v6823_v19 = vpack.c.bf16 %v5052_v47, %v5048_v42  ;;  %v5243_v42 = vld [vmem:[#allocation13 + $0x7b0] sm:$0xff]  ;;  %v5250_v47 = vld [vmem:[#allocation13 + $0x7e8] sm:$0xff] }
 0xb4f   :  { %5697 = vmatprep.mubr.msk.f32.mxu1 %vm240_vm0, %v5087_v15  ;;  %6804 = vmatpush1.bf16.msra.mxu0 %v6803_v3  ;;  %v6785_v3 = vpack.c.bf16 %v5059_v56, %v5055_v1  ;;  %v5248_v56 = vld [vmem:[#allocation13 + $0x7d8] sm:$0xff] }
 0xb50   :  { %5698 = vmatprep.mubr.msk.f32.mxu0 %vm240_vm0, %v5087_v15  ;;  %6766 = vmatprep.subr.bf16.mxu1 %v6765_v62  ;;  %v6825_v62 = vpack.c.bf16 %v5061_v2, %v5057_v54  ;;  %v5065_v15 = vld [vmem:[#allocation13 + $0x6d8] sm:$0xff]  ;;  %v5086_v2 = vrot.slane %v8491_v43, 6 }
 0xb51   :  { %6806 = vmatprep.subr.bf16.mxu0 %v6805_v61  ;;  %v5069_v61 = vld [vmem:[#allocation13 + $0x6f8] sm:$0xff] }
 0xb52   :  { %6768 = vmatpush1.bf16.msra.mxu1 %v6767_v28  ;;  %v6789_v28 = vpack.c.bf16 %v5067_v50, %v5063_v37  ;;  %v6829_v22 = vpack.c.bf16 %v5069_v61, %v5065_v15  ;;  %v5252_v54 = vld [vmem:[#allocation13 + $0x7f8] sm:$0xff]  ;;  %v5318_v37 = vrot.slane %v8493_v11, 7  ;;  %v5262_v11 = vld [vmem:[#allocation13 + $0x848] sm:$0xff] }
 0xb53   :  { %6808 = vmatpush1.bf16.msra.mxu0 %v6807_v39  ;;  %6770 = vmatprep.subr.bf16.mxu1 %v6769_v38  ;;  %v5062_v39 = vld [vmem:[#allocation13 + $0x6c0] sm:$0xff]  ;;  %v6885_v50 = vpack.c.bf16 %v5252_v54, %v5248_v56  ;;  %v5256_v15 = vld [vmem:[#allocation13 + $0x818] sm:$0xff] }
 0xb54   :  { %6810 = vmatprep.subr.bf16.mxu0 %v6809_v12  ;;  %v5066_v38 = vld [vmem:[#allocation13 + $0x6e0] sm:$0xff]  ;;  %v5071_v12 = vld [vmem:[#allocation13 + $0x708] sm:$0xff]  ;;  %v5260_v61 = vld [vmem:[#allocation13 + $0x838] sm:$0xff] }
 0xb55   :  { %v6791_v14 = vpack.c.bf16 %v5066_v38, %v5062_v39  ;;  %v5253_v39 = vld [vmem:[#allocation13 + $0x800] sm:$0xff] }
 0xb56   :  { %6772 = vmatpush1.bf16.msra.mxu1 %v6771_v18  ;;  %v6793_v18 = vpack.c.bf16 %v5075_v21, %v5071_v12  ;;  %v5257_v38 = vld [vmem:[#allocation13 + $0x820] sm:$0xff]  ;;  %v5266_v12 = vld [vmem:[#allocation13 + $0x868] sm:$0xff]  ;;  %v5264_v21 = vld [vmem:[#allocation13 + $0x858] sm:$0xff] }
 0xb57   :  { %6812 = vmatpush1.bf16.msra.mxu0 %v6811_v29  ;;  %6774 = vmatprep.subr.bf16.mxu1 %v6773_v46  ;;  %v5070_v29 = vld [vmem:[#allocation13 + $0x700] sm:$0xff]  ;;  %v6851_v13 = vpack.c.bf16 %v5257_v38, %v5253_v39  ;;  %v6893_v4 = vpack.c.bf16 %v5268_v8, %v5264_v21  ;;  %v5299_v38 = vld [vmem:[#allocation13 + $0x970] sm:$0xff] }
 0xb58   :  { %6814 = vmatprep.subr.bf16.mxu0 %v6813_v51  ;;  %v5074_v46 = vld [vmem:[#allocation13 + $0x720] sm:$0xff]  ;;  %v5079_v51 = vld [vmem:[#allocation13 + $0x748] sm:$0xff] }
 0xb59   :  { %v6795_v16 = vpack.c.bf16 %v5074_v46, %v5070_v29  ;;  %v5265_v29 = vld [vmem:[#allocation13 + $0x860] sm:$0xff]  ;;  %v5263_v46 = vld [vmem:[#allocation13 + $0x850] sm:$0xff] }
 0xb5a   :  { %6776 = vmatpush1.bf16.msra.mxu1 %v6775_v33  ;;  %v6797_v33 = vpack.c.bf16 %v5083_v52, %v5079_v51  ;;  %v5274_v51 = vld [vmem:[#allocation13 + $0x8a8] sm:$0xff]  ;;  %v5272_v52 = vld [vmem:[#allocation13 + $0x898] sm:$0xff] }
 0xb5b   :  { %6816 = vmatpush1.bf16.msra.mxu0 %v6815_v34  ;;  %6778 = vmatprep.subr.bf16.mxu1 %v6777_v48  ;;  %v5078_v34 = vld [vmem:[#allocation13 + $0x740] sm:$0xff]  ;;  %v6897_v49 = vpack.c.bf16 %v5276_v63, %v5272_v52 }
 0xb5c   :  { %6818 = vmatprep.subr.bf16.mxu0 %v6817_v6  ;;  %v5082_v48 = vld [vmem:[#allocation13 + $0x760] sm:$0xff]  ;;  %v5238_v6 = vld [vmem:[#allocation13 + $0x788] sm:$0xff] }
 0xb5d   :  { %v6799_v32 = vpack.c.bf16 %v5082_v48, %v5078_v34  ;;  %v5273_v34 = vld [vmem:[#allocation13 + $0x8a0] sm:$0xff]  ;;  %v5271_v48 = vld [vmem:[#allocation13 + $0x890] sm:$0xff] }
 0xb5e   :  { %6780 = vmatpush1.bf16.msra.mxu1 %v6779_v5  ;;  %v6841_v5 = vpack.c.bf16 %v5242_v10, %v5238_v6  ;;  %v5282_v6 = vld [vmem:[#allocation13 + $0x8e8] sm:$0xff]  ;;  %v5280_v10 = vld [vmem:[#allocation13 + $0x8d8] sm:$0xff] }
 0xb5f   :  { %6820 = vmatpush1.bf16.msra.mxu0 %v6819_v31  ;;  %6782 = vmatprep.subr.bf16.mxu1 %v6781_v57  ;;  %v5237_v31 = vld [vmem:[#allocation13 + $0x780] sm:$0xff] }
 0xb60   :  { %6822 = vmatprep.subr.bf16.mxu0 %v6821_v27  ;;  %v5241_v57 = vld [vmem:[#allocation13 + $0x7a0] sm:$0xff]  ;;  %v5246_v27 = vld [vmem:[#allocation13 + $0x7c8] sm:$0xff] }
 0xb61   :  { %v6843_v1 = vpack.c.bf16 %v5241_v57, %v5237_v31  ;;  %v6845_v26 = vpack.c.bf16 %v5250_v47, %v5246_v27  ;;  %v5281_v31 = vld [vmem:[#allocation13 + $0x8e0] sm:$0xff]  ;;  %v5279_v57 = vld [vmem:[#allocation13 + $0x8d0] sm:$0xff]  ;;  %v5290_v27 = vld [vmem:[#allocation13 + $0x928] sm:$0xff] }
 0xb62   :  { %6784 = vmatpush1.bf16.msra.mxu1 %v6783_v7  ;;  %v6883_v7 = vpack.c.bf16 %v5243_v42, %v5239_v53  ;;  %v5283_v53 = vld [vmem:[#allocation13 + $0x8f0] sm:$0xff]  ;;  %v5286_v42 = vld [vmem:[#allocation13 + $0x908] sm:$0xff]  ;;  %v5288_v47 = vld [vmem:[#allocation13 + $0x918] sm:$0xff] }
 0xb63   :  { %6824 = vmatpush1.bf16.msra.mxu0 %v6823_v19  ;;  %6786 = vmatprep.subr.bf16.mxu1 %v6785_v3  ;;  %v5245_v19 = vld [vmem:[#allocation13 + $0x7c0] sm:$0xff]  ;;  %v6903_v54 = vpack.c.bf16 %v5283_v53, %v5279_v57 }
 0xb64   :  { %6826 = vmatprep.subr.bf16.mxu0 %v6825_v62  ;;  %v5249_v3 = vld [vmem:[#allocation13 + $0x7e0] sm:$0xff]  ;;  %v5254_v62 = vld [vmem:[#allocation13 + $0x808] sm:$0xff] }
 0xb66   :  { %6788 = vmatpush1.bf16.msra.mxu1 %v6787_v44  ;;  %v6847_v44 = vpack.c.bf16 %v5249_v3, %v5245_v19  ;;  %v5289_v19 = vld [vmem:[#allocation13 + $0x920] sm:$0xff]  ;;  %v5287_v3 = vld [vmem:[#allocation13 + $0x910] sm:$0xff] }
 0xb67   :  { %6828 = vmatpush1.bf16.msra.mxu0 %v6827_v45  ;;  %6790 = vmatprep.subr.bf16.mxu1 %v6789_v28  ;;  %v6887_v45 = vpack.c.bf16 %v5251_v55, %v5247_v35  ;;  %v6849_v28 = vpack.c.bf16 %v5258_v30, %v5254_v62  ;;  %v5294_v55 = vld [vmem:[#allocation13 + $0x948] sm:$0xff]  ;;  %v5296_v30 = vld [vmem:[#allocation13 + $0x958] sm:$0xff] }
 0xb68   :  { %6830 = vmatprep.subr.bf16.mxu0 %v6829_v22  ;;  %v6889_v22 = vpack.c.bf16 %v5260_v61, %v5256_v15  ;;  %v5298_v62 = vld [vmem:[#allocation13 + $0x968] sm:$0xff] }
 0xb69   :  { %v6869_v61 = vpack.c.bf16 %v5298_v62, %v5294_v55 }
 0xb6a   :  { %6792 = vmatpush1.bf16.msra.mxu1 %v6791_v14  ;;  %v6891_v14 = vpack.c.bf16 %v5259_v25, %v5255_v9  ;;  %v5302_v9 = vld [vmem:[#allocation13 + $0x988] sm:$0xff]  ;;  %v5304_v25 = vld [vmem:[#allocation13 + $0x998] sm:$0xff] }
 0xb6b   :  { %6832 = vmatpush1.bf16.msra.mxu0 %v6831_v20  ;;  %6794 = vmatprep.subr.bf16.mxu1 %v6793_v18  ;;  %v6853_v20 = vpack.c.bf16 %v5266_v12, %v5262_v11  ;;  %v5261_v18 = vld [vmem:[#allocation13 + $0x840] sm:$0xff]  ;;  %v5308_v11 = vld [vmem:[#allocation13 + $0x9b8] sm:$0xff] }
 0xb6c   :  { %6834 = vmatprep.subr.bf16.mxu0 %v6833_v40  ;;  %v5267_v40 = vld [vmem:[#allocation13 + $0x870] sm:$0xff]  ;;  %v6855_v0 = vpack.c.bf16 %v5265_v29, %v5261_v18  ;;  %v6913_v18 = vpack.c.bf16 %v5308_v11, %v5304_v25 }
 0xb6d   :  { %v5307_v29 = vld [vmem:[#allocation13 + $0x9b0] sm:$0xff] }
 0xb6e   :  { %6796 = vmatpush1.bf16.msra.mxu1 %v6795_v16  ;;  %v6895_v16 = vpack.c.bf16 %v5267_v40, %v5263_v46  ;;  %v5310_v46 = vld [vmem:[#allocation13 + $0x9c8] sm:$0xff]  ;;  %v5312_v40 = vld [vmem:[#allocation13 + $0x9d8] sm:$0xff] }
 0xb6f   :  { %6836 = vmatpush1.bf16.msra.mxu0 %v6835_v17  ;;  %6798 = vmatprep.subr.bf16.mxu1 %v6797_v33  ;;  %v6857_v17 = vpack.c.bf16 %v5274_v51, %v5270_v41  ;;  %v5269_v33 = vld [vmem:[#allocation13 + $0x880] sm:$0xff]  ;;  %v5316_v41 = vld [vmem:[#allocation13 + $0x9f8] sm:$0xff] }
 0xb70   :  { %6838 = vmatprep.subr.bf16.mxu0 %v6837_v59  ;;  %v5275_v59 = vld [vmem:[#allocation13 + $0x8b0] sm:$0xff]  ;;  %v6859_v24 = vpack.c.bf16 %v5273_v34, %v5269_v33 }
 0xb71   :  { %v5311_v33 = vld [vmem:[#allocation13 + $0x9d0] sm:$0xff] }
 0xb72   :  { %6800 = vmatpush1.bf16.msra.mxu1 %v6799_v32  ;;  %v6899_v32 = vpack.c.bf16 %v5275_v59, %v5271_v48  ;;  %v5315_v34 = vld [vmem:[#allocation13 + $0x9f0] sm:$0xff]  ;;  %v5317_v59 = vrot.slane %v8491_v43, 7 }
 0xb73   :  { %6840 = vmatpush1.bf16.msra.mxu0 %v6839_v58  ;;  %6842 = vmatprep.subr.bf16.mxu1 %v6841_v5  ;;  %v6861_v58 = vpack.c.bf16 %v5282_v6, %v5278_v60  ;;  %v5277_v5 = vld [vmem:[#allocation13 + $0x8c0] sm:$0xff]  ;;  %v4494_v60 = vlaneseq }
 0xb74   :  { %6882 = vmatprep.subr.bf16.mxu0 %v6881_v36  ;;  %v6901_v36 = vpack.c.bf16 %v5284_v23, %v5280_v10  ;;  %v6863_v56 = vpack.c.bf16 %v5281_v31, %v5277_v5  ;;  %v3574_v23 = vld [vmem:[#allocation14] sm:$0xf] }
 0xb75   :  { %5156 = vmatmul.mubr.f32.vlgmr.msra.gmra.mrb[100].mxu1 %v5086_v2  ;;  %v4495_v6 = vshrl.u32 %v4494_v60, 7  ;;  %vm8529_vm4 = vcmp.lt.s32.totalorder %v4494_v60, 512 }
 0xb76   :  { %5227 = vmatmul.mubr.f32.vlgmr.msra.gmra.mrb[90].mxu0 %v5086_v2  ;;  %6844 = vmatpush1.bf16.msra.mxu1 %v6843_v1  ;;  %v5292_v1 = vld [vmem:[#allocation13 + $0x938] sm:$0xff]  ;;  %v6865_v2 = vpack.c.bf16 %v5290_v27, %v5286_v42 }
 0xb77   :  { %5699 = vmatprep.mubr.msk.f32.mxu1 %vm240_vm0, %v5318_v37  ;;  %6884 = vmatpush1.bf16.msra.mxu0 %v6883_v7  ;;  %v5285_v7 = vld [vmem:[#allocation13 + $0x900] sm:$0xff]  ;;  %v6905_v35 = vpack.c.bf16 %v5292_v1, %v5288_v47  ;;  %v4496_v10 = vsub.s32 0, %v4495_v6  ;;  %v4508_v31 = vsub.s32 3, %v4495_v6 }
 0xb78   :  { %5700 = vmatprep.mubr.msk.f32.mxu0 %vm240_vm0, %v5318_v37  ;;  %6846 = vmatprep.subr.bf16.mxu1 %v6845_v26  ;;  %v5291_v26 = vld [vmem:[#allocation13 + $0x930] sm:$0xff]  ;;  %v5300_v37 = vld [vmem:[#allocation13 + $0x978] sm:$0xff] }
 0xb79   :  { %6886 = vmatprep.subr.bf16.mxu0 %v6885_v50  ;;  %v6867_v50 = vpack.c.bf16 %v5289_v19, %v5285_v7  ;;  %v6907_v15 = vpack.c.bf16 %v5291_v26, %v5287_v3  ;;  %v6909_v39 = vpack.c.bf16 %v5300_v37, %v5296_v30  ;;  %v4497_v57 = vrot.slane %v3574_v23, %v4496_v10 }
 0xb7a   :  { %6848 = vmatpush1.bf16.msra.mxu1 %v6847_v44  ;;  %v5293_v44 = vld [vmem:[#allocation13 + $0x940] sm:$0xff]  ;;  %v4509_v27 = vrot.slane %v3574_v23, %v4508_v31 }
 0xb7b   :  { %6888 = vmatpush1.bf16.msra.mxu0 %v6887_v45  ;;  %6850 = vmatprep.subr.bf16.mxu1 %v6849_v28  ;;  %v5297_v45 = vld [vmem:[#allocation13 + $0x960] sm:$0xff]  ;;  %v5295_v28 = vld [vmem:[#allocation13 + $0x950] sm:$0xff] }
 0xb7c   :  { %6890 = vmatprep.subr.bf16.mxu0 %v6889_v22  ;;  %v5306_v22 = vld [vmem:[#allocation13 + $0x9a8] sm:$0xff]  ;;  %v6871_v12 = vpack.c.bf16 %v5297_v45, %v5293_v44  ;;  %v6911_v21 = vpack.c.bf16 %v5299_v38, %v5295_v28 }
 0xb7d   :  { %v6873_v8 = vpack.c.bf16 %v5306_v22, %v5302_v9 }
 0xb7e   :  { %6852 = vmatpush1.bf16.msra.mxu1 %v6851_v13  ;;  %v5301_v13 = vld [vmem:[#allocation13 + $0x980] sm:$0xff] }
 0xb7f   :  { %6892 = vmatpush1.bf16.msra.mxu0 %v6891_v14  ;;  %6854 = vmatprep.subr.bf16.mxu1 %v6853_v20  ;;  %v5305_v14 = vld [vmem:[#allocation13 + $0x9a0] sm:$0xff]  ;;  %v5303_v20 = vld [vmem:[#allocation13 + $0x990] sm:$0xff] }
 0xb80   :  { %6894 = vmatprep.subr.bf16.mxu0 %v6893_v4  ;;  %v5314_v4 = vld [vmem:[#allocation13 + $0x9e8] sm:$0xff]  ;;  %v6875_v51 = vpack.c.bf16 %v5305_v14, %v5301_v13  ;;  %v6915_v52 = vpack.c.bf16 %v5307_v29, %v5303_v20 }
 0xb81   :  { %v6877_v63 = vpack.c.bf16 %v5314_v4, %v5310_v46 }
 0xb82   :  { %6856 = vmatpush1.bf16.msra.mxu1 %v6855_v0  ;;  %v5309_v0 = vld [vmem:[#allocation13 + $0x9c0] sm:$0xff] }
 0xb83   :  { %6896 = vmatpush1.bf16.msra.mxu0 %v6895_v16  ;;  %6858 = vmatprep.subr.bf16.mxu1 %v6857_v17  ;;  %v5313_v16 = vld [vmem:[#allocation13 + $0x9e0] sm:$0xff]  ;;  %v6917_v17 = vpack.c.bf16 %v5316_v41, %v5312_v40 }
 0xb84   :  { %6898 = vmatprep.subr.bf16.mxu0 %v6897_v49  ;;  %v6879_v48 = vpack.c.bf16 %v5313_v16, %v5309_v0  ;;  %v6919_v49 = vpack.c.bf16 %v5315_v34, %v5311_v33 }
 0xb86   :  { %6860 = vmatpush1.bf16.msra.mxu1 %v6859_v24  ;;  %v4504_v24 = vsub.s32 2, %v4495_v6 }
 0xb87   :  { %6900 = vmatpush1.bf16.msra.mxu0 %v6899_v32  ;;  %6862 = vmatprep.subr.bf16.mxu1 %v6861_v58  ;;  %v4500_v32 = vsub.s32 1, %v4495_v6  ;;  %v7315_v58 = vmov 1966171168  }
 0xb88   :  { %6902 = vmatprep.subr.bf16.mxu0 %v6901_v36  ;;  %v4525_v5 = vunpack.c.l.s4 %v7315_v58  ;;  %v4505_v36 = vrot.slane %v3574_v23, %v4504_v24 }
 0xb89   :  { %v4501_v53 = vrot.slane %v3574_v23, %v4500_v32 }
 0xb8a   :  { %6864 = vmatpush1.bf16.msra.mxu1 %v6863_v56  ;;  %v4526_v42 = vunpack.c.0.s8 %v4525_v5 }
 0xb8b   :  { %6904 = vmatpush1.bf16.msra.mxu0 %v6903_v54  ;;  %6866 = vmatprep.subr.bf16.mxu1 %v6865_v2 }
 0xb8c   :  { %6906 = vmatprep.subr.bf16.mxu0 %v6905_v35  ;;  %v4529_v7 = vsub.s32 %v4526_v42, %v4495_v6 }
 0xb8e   :  { %6868 = vmatpush1.bf16.msra.mxu1 %v6867_v50 }
 0xb8f   :  { %6908 = vmatpush1.bf16.msra.mxu0 %v6907_v15  ;;  %6870 = vmatprep.subr.bf16.mxu1 %v6869_v61 }
 0xb90   :  { %6910 = vmatprep.subr.bf16.mxu0 %v6909_v39 }
 0xb92   :  { %6872 = vmatpush1.bf16.msra.mxu1 %v6871_v12 }
 0xb93   :  { %6912 = vmatpush1.bf16.msra.mxu0 %v6911_v21  ;;  %6874 = vmatprep.subr.bf16.mxu1 %v6873_v8 }
 0xb94   :  { %6914 = vmatprep.subr.bf16.mxu0 %v6913_v18 }
 0xb96   :  { %6876 = vmatpush1.bf16.msra.mxu1 %v6875_v51 }
 0xb97   :  { %6916 = vmatpush1.bf16.msra.mxu0 %v6915_v52  ;;  %6878 = vmatprep.subr.bf16.mxu1 %v6877_v63 }
 0xb98   :  { %6918 = vmatprep.subr.bf16.mxu0 %v6917_v17 }
 0xb9a   :  { %6880 = vmatpush1.bf16.msra.mxu1 %v6879_v48 }
 0xb9b   :  { %6920 = vmatpush1.bf16.msra.mxu0 %v6919_v49 }
 0xb9d   :  { %5387 = vmatmul.mubr.f32.vlgmr.msra.gmra.mrb[100].mxu1 %v5317_v59 }
 0xb9e   :  { %5458 = vmatmul.mubr.f32.vlgmr.msra.gmra.mrb[90].mxu0 %v5317_v59 }
 0xbd0   :  { %v4413_v47 = vpop.f32.mrb[98].mxu1 }
 0xbd1   :  { %v4514_v1 = vadd.f32 %v4497_v57, %v4413_v47  ;;  %v4484_v56 = vpop.f32.mrb[88].mxu0  ;;  %v4415_v43 = vpop.f32.mrb[99].mxu1 }
 0xbd2   :  { %v4516_v54 = vadd.f32 %v4505_v36, %v4484_v56  ;;  %v4515_v2 = vadd.f32 %v4501_v53, %v4415_v43  ;;  %v4486_v19 = vpop.f32.mrb[89].mxu0 }
 0xbd3   :  { %v4517_v3 = vadd.f32 %v4509_v27, %v4486_v19 }
 0xbd4   :  { %v4522_v35 = vcombine.low %v4514_v1, %v4515_v2 }
 0xbd5   :  { %v4523_v26 = vcombine.low %v4516_v54, %v4517_v3 }
 0xbd6   :  { %v4530_v55 = vrot.slane %v4522_v35, %v4529_v7 }
 0xbd7   :  { %v4537_v62 = vrot.slane %v4523_v26, %v4529_v7 }
 0xbd9   :  { %v4538_v30 = vcombine.low %v4530_v55, %v4537_v62 }
 0xbdb   :  { %v4545_v50 = vrot.slane %v4538_v30, %v4529_v7 }
 0xbdd   :  { %4551 = vst.msk [vmem:[#allocation16] ss:$2 sm:$0xf] %vm8529_vm4, %v4545_v50 }
 0xc70   :  { %v5388_v15 = vpop.f32.mrb[100].mxu1 }
 0xc71   :  { %v5468_v61 = vadd.f32 %v5388_v15, %v4497_v57  ;;  %v5459_v44 = vpop.f32.mrb[90].mxu0  ;;  %v5390_v45 = vpop.f32.mrb[101].mxu1 }
 0xc72   :  { %v5470_v28 = vadd.f32 %v5459_v44, %v4505_v36  ;;  %v5469_v39 = vadd.f32 %v5390_v45, %v4501_v53  ;;  %v5461_v38 = vpop.f32.mrb[91].mxu0 }
 0xc73   :  { %v5471_v9 = vadd.f32 %v5461_v38, %v4509_v27 }
 0xc74   :  { %v5476_v22 = vcombine.low %v5468_v61, %v5469_v39 }
 0xc75   :  { %v5477_v25 = vcombine.low %v5470_v28, %v5471_v9 }
 0xc76   :  { %v5484_v11 = vrot.slane %v5476_v22, %v4529_v7 }
 0xc77   :  { %v5491_v12 = vrot.slane %v5477_v25, %v4529_v7 }
 0xc79   :  { %v5492_v21 = vcombine.low %v5484_v11, %v5491_v12 }
 0xc7b   :  { %v5499_v8 = vrot.slane %v5492_v21, %v4529_v7 }
 0xc7d   :  { %5502 = vst.msk [vmem:[#allocation16 + $0x1] ss:$2 sm:$0xf] %vm8529_vm4, %v5499_v8 }
 0xc7e   :  { %7276 = shalt.err (!%p7273_p12)
}
 0xc7f   :  { %s8663_s0 = sld [smem:[#allocation43_spill]] }
 0xc85   :  { %s7277_s4 = scalar_lea.hbm %s8663_s0, 128 }
 0xc86   :  { %p7278_p13 = scmp.ne.s32.totalorder %s8663_s0, %s7277_s4  ;;  %p7281_p0 = scmp.lt.u32.totalorder %s7277_s4, %s8663_s0 }
 0xc88   :  { %p7283_p1 = pnand %p7281_p0, %p7278_p13 }
 0xc8a   :  { %7286 = shalt.err (!%p7283_p1)
}
 0xc8b   :  { %5512 = dma.vmem_to_hbm [thread:$0]  %s5510_s24, 128, %s8663_s0, [#allocation4]  }
 0xc8c   :  { %7297 = dma.done.wait [#allocation4], 128  }
 0xc8d   :  { %7298 = vsyncadd [#allocation4], 4294967168 }
 0xc8e   :  { %5516 = vsyncpa [#allocation3], 1 }
 0xc8f   :  { %5517 = vsyncpa [#allocation6], 1 }
 0xc90   :  { %5518 = vsyncpa [#allocation9], 1 }
 0xc91   :  { %5519 = vsyncpa [#allocation12], 1 }
 0xc92   :  { %5520 = vsyncpa [#allocation15], 1 }
 0xc93   :  { %5521 = vsyncpa [#allocation4], 1 }

</bundles_post_ra>
